<compile_context>
chip_gen: v5e
topology: v5e:2x2
jax: 0.10.0
libtpu: 0.0.40
codegen_flags: <defaults>
</compile_context>

<pallas_src>
import jax
import jax.numpy as jnp
from jax import lax
from jax.experimental import pallas as pl
from jax.experimental.pallas import tpu as pltpu

NEG_SLOPE = 0.2      # GATConv default negative_slope
NEG_INF = -1e30
LANE = 128


def _round_up(x, m):
    return (x + m - 1) // m * m


def _pad2(a, rows, cols):
    r, c = a.shape
    return jnp.pad(a, ((0, rows - r), (0, cols - c)))


def _probe_buffered_one():
    """pl.Buffered(1): single-buffer grid-invariant operands (if supported)."""
    try:
        mode = pl.Buffered(1)
        pl.BlockSpec((8, LANE), lambda l, t, j: (0, 0), pipeline_mode=mode)
        return mode
    except Exception:
        return None


_BUFFERED_ONE = _probe_buffered_one()


# --------------------------------------------------------------------------
# Fused kernel factory.  Grid = (layer, dst_tile, src_tile), layer-major and
# fully sequential: scratch carries h / g across dst tiles and layers, and the
# flash running state (m, l, acc, d) across the src axis of one dst tile.
# --------------------------------------------------------------------------
def _make_kernel(score_bf16):
    sdt = jnp.bfloat16 if score_bf16 else jnp.float32

    def kernel(x_ref, w1_ref, w2_ref, wl_ref,
               a1s_ref, a1d_ref, a2s_ref, a2d_ref,
               b1_ref, b2_ref, bl_ref,
               adj_ref, out_ref,
               h_scr, g_scr, s_scr, d_scr, m_scr, l_scr, acc_scr):
        layer = pl.program_id(0)
        t = pl.program_id(1)
        j = pl.program_id(2)
        n_src = pl.num_programs(2)
        tm, tk = adj_ref.shape
        row0 = pl.multiple_of(t * tm, tm)
        col0 = pl.multiple_of(j * tk, tk)

        # ---- per-layer projection: h = src @ W ; s_j = <h_j, a_src> --------
        # Chunked over row blocks so the f32 h temporary never exceeds
        # (tm, fp); s is produced lane-dense as a (1, n_p) row.
        def project(src_ref, w_ref, a_src_ref):
            n_rows = h_scr.shape[0]

            def body(i, carry):
                r0 = pl.multiple_of(i * tm, tm)
                hb = jnp.dot(src_ref[pl.ds(r0, tm), :], w_ref[...],
                             preferred_element_type=jnp.float32)
                s_scr[:, pl.ds(r0, tm)] = lax.dot_general(
                    a_src_ref[...], hb, (((1,), (1,)), ((), ())),
                    preferred_element_type=jnp.float32)
                h_scr[pl.ds(r0, tm), :] = hb.astype(jnp.bfloat16)
                return carry

            lax.fori_loop(0, n_rows // tm, body, 0)

        @pl.when(jnp.logical_and(layer == 0,
                                 jnp.logical_and(t == 0, j == 0)))
        def _():
            project(x_ref, w1_ref, a1s_ref)

        @pl.when(jnp.logical_and(layer == 1,
                                 jnp.logical_and(t == 0, j == 0)))
        def _():
            project(g_scr, w2_ref, a2s_ref)

        # ---- per-dst-tile init of the flash running state -------------------
        @pl.when(j == 0)
        def _():
            a_dst = jnp.where(layer == 0, a1d_ref[...], a2d_ref[...])
            hd = h_scr[pl.ds(row0, tm), :].astype(jnp.float32)
            d_scr[...] = jnp.sum(hd * a_dst, axis=-1, keepdims=True)   # (tm,1)
            m_scr[...] = jnp.full_like(m_scr, NEG_INF)
            l_scr[...] = jnp.zeros_like(l_scr)
            acc_scr[...] = jnp.zeros_like(acc_scr)

        # ---- one source chunk: scores -> online softmax -> accumulate -------
        s_chunk = s_scr[:, pl.ds(col0, tk)]                       # (1, tk) f32
        e = d_scr[...].astype(sdt) + s_chunk.astype(sdt)          # (tm, tk)
        e = jnp.maximum(e, NEG_SLOPE * e)                         # LeakyReLU
        e = jnp.where(adj_ref[...] != 0, e, jnp.asarray(NEG_INF, sdt))

        m_prev = m_scr[...]                                       # f32 (tm,1)
        m_new = jnp.maximum(
            m_prev, jnp.max(e, axis=-1, keepdims=True).astype(jnp.float32))
        alpha = jnp.exp(m_prev - m_new)                           # f32 rescale
        p = jnp.exp(e - m_new.astype(sdt))                        # masked -> 0
        l_scr[...] = alpha * l_scr[...] + jnp.sum(
            p.astype(jnp.float32), axis=-1, keepdims=True)
        acc_scr[...] = alpha * acc_scr[...] + jnp.dot(
            p.astype(jnp.bfloat16), h_scr[pl.ds(col0, tk), :],
            preferred_element_type=jnp.float32)
        m_scr[...] = m_new

        # ---- finalize this dst tile at the last source chunk ----------------
        @pl.when(jnp.logical_and(layer == 0, j == n_src - 1))
        def _():
            inv = pl.reciprocal(l_scr[...], approx=True)
            # bias + ReLU (dropout = identity in eval mode)
            g = jnp.maximum(acc_scr[...] * inv + b1_ref[...], 0.0)
            g_scr[pl.ds(row0, tm), :] = g.astype(jnp.bfloat16)

        @pl.when(jnp.logical_and(layer == 1, j == n_src - 1))
        def _():
            inv = pl.reciprocal(l_scr[...], approx=True)
            g = (acc_scr[...] * inv + b2_ref[...]).astype(jnp.bfloat16)
            out_ref[...] = (jnp.dot(g, wl_ref[...],
                                    preferred_element_type=jnp.float32)
                            + bl_ref[...])                 # fused nn.Linear

    return kernel


# --------------------------------------------------------------------------
# Wrapper: pad to lane-dense shapes, cast MXU operands to bf16, build specs.
# --------------------------------------------------------------------------
def gat_encoder_pallas(x, adj, params, *, tm=None, tk=None, score_bf16=None):
    n, fin = x.shape
    hidden = params["W1"].shape[1]
    latent = params["Wl"].shape[1]

    try:
        kind = jax.devices()[0].device_kind.lower()
    except Exception:
        kind = ""
    old_gen = any(v in kind for v in ("v2", "v3", "v4", "v5"))
    is_v7 = ("v7" in kind) or ("7x" in kind)

    if tm is None:
        tm = 128 if old_gen else 256          # v6e/v7x MXU is 256x256
    if tk is None:
        tk = 512
    if score_bf16 is None:
        score_bf16 = not old_gen              # no bf16 VPU/EUP on v5e

    fp = _round_up(max(hidden, latent), LANE)   # shared padded feature width
    fin_p = _round_up(fin, LANE)

    n_p = _round_up(n, LANE)
    tm = max(LANE, min(_round_up(tm, LANE), n_p))
    n_p = _round_up(n_p, tm)
    tk = max(LANE, min(_round_up(tk, LANE), n_p))
    while n_p % tk:
        tk -= LANE
    n_dst = n_p // tm
    n_src = n_p // tk

    xb = _pad2(x, n_p, fin_p).astype(jnp.bfloat16)
    w1 = _pad2(params["W1"], fin_p, fp).astype(jnp.bfloat16)
    w2 = _pad2(params["W2"], fp, fp).astype(jnp.bfloat16)
    wl = _pad2(params["Wl"], fp, fp).astype(jnp.bfloat16)
    a1s = _pad2(params["a1_src"], 1, fp)
    a1d = _pad2(params["a1_dst"], 1, fp)
    a2s = _pad2(params["a2_src"], 1, fp)
    a2d = _pad2(params["a2_dst"], 1, fp)
    b1 = _pad2(params["b1"], 1, fp)
    b2 = _pad2(params["b2"], 1, fp)
    bl = _pad2(params["bl"], 1, fp)
    adj_p = _pad2(adj.astype(jnp.int8), n_p, n_p)

    def rep(shape):  # fully resident, grid-invariant -> single-buffered
        idx = lambda l, t, j: (0, 0)
        if _BUFFERED_ONE is not None:
            return pl.BlockSpec(shape, idx, pipeline_mode=_BUFFERED_ONE)
        return pl.BlockSpec(shape, idx)

    in_specs = [
        rep((n_p, fin_p)),                                       # x
        rep((fin_p, fp)), rep((fp, fp)), rep((fp, fp)),          # W1, W2, Wl
        rep((1, fp)), rep((1, fp)), rep((1, fp)), rep((1, fp)),  # a1s a1d a2s a2d
        rep((1, fp)), rep((1, fp)), rep((1, fp)),                # b1 b2 bl
        pl.BlockSpec((tm, tk), lambda l, t, j: (t, j)),          # adj tile (int8)
    ]
    # Revisit mapping: every layer-0 step (and layer-1 t=0) targets block 0,
    # so nothing is flushed to HBM until a tile holds real layer-1 data ->
    # exactly one HBM write per output tile (no zero-fill / double writeback).
    out_specs = pl.BlockSpec((tm, fp), lambda l, t, j: (l * t, 0))

    scratch_shapes = [
        pltpu.VMEM((n_p, fp), jnp.bfloat16),   # h  : current-layer projections
        pltpu.VMEM((n_p, fp), jnp.bfloat16),   # g  : relu(GAT1 out), all nodes
        pltpu.VMEM((1, n_p), jnp.float32),     # s  : source-role logits (lane-dense)
        pltpu.VMEM((tm, 1), jnp.float32),      # d  : dst-role logits of this tile
        pltpu.VMEM((tm, 1), jnp.float32),      # m  : running row max
        pltpu.VMEM((tm, 1), jnp.float32),      # l  : running softmax denominator
        pltpu.VMEM((tm, fp), jnp.float32),     # acc: running weighted sum
    ]

    # VMEM budget estimate (resident operands, scratch, streamed tiles, temps)
    buf_mult = 1 if _BUFFERED_ONE is not None else 2
    small = 4 * (a1s.size + a1d.size + a2s.size + a2d.size
                 + b1.size + b2.size + bl.size)
    resident = buf_mult * (xb.size * 2
                           + (w1.size + w2.size + wl.size) * 2 + small)
    scratch_b = 2 * n_p * fp * 2 + 8 * n_p * 4 + 3 * tm * LANE * 4 + tm * fp * 4
    stream_b = 2 * tm * tk + 2 * tm * fp * 4        # adj int8 + out f32, 2 bufs
    score_bytes = 2 if score_bf16 else 4
    tmp_b = 4 * tm * tk * score_bytes + 2 * tm * tk * 4 + 2 * tm * fp * 4
    cap = (56 << 20) if is_v7 else (100 << 20)      # v7x: 64 MiB physical VMEM
    vmem_limit = int(min(max(int(1.5 * (resident + scratch_b + stream_b + tmp_b)),
                             32 << 20), cap))

    flops = (2 * n_p * fin_p * fp + 2 * n_p * fp * fp   # X@W1, g@W2
             + 2 * 2 * n_p * n_p * fp                   # two alpha@h
             + 2 * n_p * fp * fp)                       # final Linear
    cost = pl.CostEstimate(
        flops=int(flops),
        transcendentals=int(2 * n_p * n_p),
        bytes_accessed=int(2 * adj_p.size + 2 * xb.size + 4 * n_p * fp))

    out = pl.pallas_call(
        _make_kernel(score_bf16),
        out_shape=jax.ShapeDtypeStruct((n_p, fp), jnp.float32),
        grid_spec=pltpu.PrefetchScalarGridSpec(
            num_scalar_prefetch=0,
            grid=(2, n_dst, n_src),
            in_specs=in_specs,
            out_specs=out_specs,
            scratch_shapes=scratch_shapes),
        compiler_params=pltpu.CompilerParams(
            # All axes sequential: layer 1 consumes every tile's layer-0
            # output from g_scr, and the flash state is carried across src.
            dimension_semantics=("arbitrary", "arbitrary", "arbitrary"),
            vmem_limit_bytes=vmem_limit),
        cost_estimate=cost,
    )(xb, w1, w2, wl, a1s, a1d, a2s, a2d, b1, b2, bl, adj_p)

    return out[:n, :latent]


gat_encoder = jax.jit(gat_encoder_pallas,
                      static_argnames=("tm", "tk", "score_bf16"))


# --------------------------------------------------------------------------
# Parameters / graph helpers / pure-JAX reference
# --------------------------------------------------------------------------
def init_params(key, in_channels, hidden_dim, latent_dim):
    def glorot(k, shape):
        fan_in, fan_out = shape[-2], shape[-1]
        lim = (6.0 / (fan_in + fan_out)) ** 0.5
        return jax.random.uniform(k, shape, jnp.float32, -lim, lim)

    ks = jax.random.split(key, 8)
    return dict(
        W1=glorot(ks[0], (in_channels, hidden_dim)),
        a1_src=glorot(ks[1], (1, hidden_dim)),
        a1_dst=glorot(ks[2], (1, hidden_dim)),
        b1=jnp.zeros((1, hidden_dim), jnp.float32),
        W2=glorot(ks[3], (hidden_dim, latent_dim)),
        a2_src=glorot(ks[4], (1, latent_dim)),
        a2_dst=glorot(ks[5], (1, latent_dim)),
        b2=jnp.zeros((1, latent_dim), jnp.float32),
        Wl=glorot(ks[6], (latent_dim, latent_dim)),
        bl=glorot(ks[7], (1, latent_dim)),
    )


def build_adj(edge_index, num_nodes):
    """Dense int8 adjacency: adj[dst, src] = 1 per edge; self-loops added
    (add_self_loops=True; also guarantees a finite softmax denominator)."""
    src, dst = edge_index[0], edge_index[1]
    adj = jnp.zeros((num_nodes, num_nodes), jnp.int8)
    adj = adj.at[dst, src].set(1)
    idx = jnp.arange(num_nodes)
    adj = adj.at[idx, idx].set(1)
    return adj


def gat_encoder_reference(x, adj, params):
    """Pure-JAX f32 reference of the same forward pass."""
    def gat(x, w, a_src, a_dst, b, adj):
        h = x @ w
        d = jnp.sum(h * a_dst, axis=-1, keepdims=True)
        s = jnp.sum(h * a_src, axis=-1)[None, :]
        e = d + s
        e = jnp.where(e >= 0.0, e, NEG_SLOPE * e)
        e = jnp.where(adj != 0, e, NEG_INF)
        alpha = jax.nn.softmax(e, axis=-1)
        return alpha @ h + b

    h = jax.nn.relu(gat(x, params["W1"], params["a1_src"], params["a1_dst"],
                        params["b1"], adj))
    g = gat(h, params["W2"], params["a2_src"], params["a2_dst"],
            params["b2"], adj)
    return g @ params["Wl"] + params["bl"]


if __name__ == "__main__":
    in_channels, hidden_dim, latent_dim = 8, 32, 16

    def run_case(n_nodes, n_edges, seed, **kw):
        key = jax.random.PRNGKey(seed)
        kx, ksrc, kdst, kattr, kparams = jax.random.split(key, 5)
        x = jax.random.normal(kx, (n_nodes, in_channels), jnp.float32)
        src = jax.random.randint(ksrc, (n_edges,), 0, n_nodes)
        dst = jax.random.randint(kdst, (n_edges,), 0, n_nodes)
        edge_index = jnp.stack([src, dst], axis=0)           # [2, E]
        # edge_attr is accepted by the module but unused: PyG GATConv with the
        # default edge_dim=None ignores edge features in the attention logits.
        # TODO(synk): add lin_edge/att_edge path if GATConv(edge_dim=...) is set.
        _edge_attr = jax.random.normal(kattr, (n_edges, 4), jnp.float32)

        adj = build_adj(edge_index, n_nodes)
        params = init_params(kparams, in_channels, hidden_dim, latent_dim)

        out = jax.block_until_ready(gat_encoder(x, adj, params, **kw))
        ref = gat_encoder_reference(x, adj, params)

        assert out.shape == (n_nodes, latent_dim), out.shape
        assert bool(jnp.all(jnp.isfinite(out)))
        # bf16 MXU operands / scores with f32 accumulation -> ~1e-2 deviation.
        err = float(jnp.max(jnp.abs(out - ref)))
        assert bool(jnp.allclose(out, ref, rtol=1e-1, atol=1e-1)), err

    # Small case with device-default tiling / score precision.
    run_case(16, 48, 0)
    # Multi-tile case (2 dst tiles x 2 src chunks): exercises the online
    # softmax, per-tile g writes and the revisit-mapped output, f32 scores.
    run_case(200, 600, 1, tm=128, tk=128, score_bf16=False)
    # Same multi-tile case with the device-native (bf16 on v6e/v7x) scores.
    run_case(200, 600, 1, tm=128, tk=128)

    print("KERNEL_OK")
</pallas_src>

<mosaic_0001>
module attributes {stable_mosaic.version = 11 : i64} {
  func.func @kernel(%arg0: i32, %arg1: i32, %arg2: i32, %arg3: memref<128x128xbf16, #tpu.memory_space<vmem>>, %arg4: memref<128x128xbf16, #tpu.memory_space<vmem>>, %arg5: memref<128x128xbf16, #tpu.memory_space<vmem>>, %arg6: memref<128x128xbf16, #tpu.memory_space<vmem>>, %arg7: memref<1x128xf32, #tpu.memory_space<vmem>>, %arg8: memref<1x128xf32, #tpu.memory_space<vmem>>, %arg9: memref<1x128xf32, #tpu.memory_space<vmem>>, %arg10: memref<1x128xf32, #tpu.memory_space<vmem>>, %arg11: memref<1x128xf32, #tpu.memory_space<vmem>>, %arg12: memref<1x128xf32, #tpu.memory_space<vmem>>, %arg13: memref<1x128xf32, #tpu.memory_space<vmem>>, %arg14: memref<128x128xi8, #tpu.memory_space<vmem>>, %arg15: memref<128x128xf32, #tpu.memory_space<vmem>>, %arg16: memref<128x128xbf16, #tpu.memory_space<vmem>>, %arg17: memref<128x128xbf16, #tpu.memory_space<vmem>>, %arg18: memref<1x128xf32, #tpu.memory_space<vmem>>, %arg19: memref<128x1xf32, #tpu.memory_space<vmem>>, %arg20: memref<128x1xf32, #tpu.memory_space<vmem>>, %arg21: memref<128x1xf32, #tpu.memory_space<vmem>>, %arg22: memref<128x128xf32, #tpu.memory_space<vmem>>) attributes {dimension_semantics = [#tpu.dimension_semantics<arbitrary>, #tpu.dimension_semantics<arbitrary>, #tpu.dimension_semantics<arbitrary>], iteration_bounds = array<i64: 2, 1, 1>, scalar_prefetch = 0 : i64, scratch_operands = 7 : i64, tpu.core_type = #tpu.core_type<tc>, window_params = [{pipeline_mode = #tpu.pipeline_mode<synchronous>, transform_indices = @transform_0, window_bounds = array<i64: 128, 128>}, {pipeline_mode = #tpu.pipeline_mode<synchronous>, transform_indices = @transform_1, window_bounds = array<i64: 128, 128>}, {pipeline_mode = #tpu.pipeline_mode<synchronous>, transform_indices = @transform_2, window_bounds = array<i64: 128, 128>}, {pipeline_mode = #tpu.pipeline_mode<synchronous>, transform_indices = @transform_3, window_bounds = array<i64: 128, 128>}, {pipeline_mode = #tpu.pipeline_mode<synchronous>, transform_indices = @transform_4, window_bounds = array<i64: 1, 128>}, {pipeline_mode = #tpu.pipeline_mode<synchronous>, transform_indices = @transform_5, window_bounds = array<i64: 1, 128>}, {pipeline_mode = #tpu.pipeline_mode<synchronous>, transform_indices = @transform_6, window_bounds = array<i64: 1, 128>}, {pipeline_mode = #tpu.pipeline_mode<synchronous>, transform_indices = @transform_7, window_bounds = array<i64: 1, 128>}, {pipeline_mode = #tpu.pipeline_mode<synchronous>, transform_indices = @transform_8, window_bounds = array<i64: 1, 128>}, {pipeline_mode = #tpu.pipeline_mode<synchronous>, transform_indices = @transform_9, window_bounds = array<i64: 1, 128>}, {pipeline_mode = #tpu.pipeline_mode<synchronous>, transform_indices = @transform_10, window_bounds = array<i64: 1, 128>}, {transform_indices = @transform_11, window_bounds = array<i64: 128, 128>}, {transform_indices = @transform_12, window_bounds = array<i64: 128, 128>}]} {
    %c128_i32 = arith.constant 128 : i32
    %0 = arith.muli %arg1, %c128_i32 : i32
    %1 = tpu.assume_multiple %0, 128 : i32
    %c128_i32_0 = arith.constant 128 : i32
    %2 = arith.muli %arg2, %c128_i32_0 : i32
    %3 = tpu.assume_multiple %2, 128 : i32
    %c0_i32 = arith.constant 0 : i32
    %4 = arith.cmpi eq, %arg0, %c0_i32 : i32
    %c0_i32_1 = arith.constant 0 : i32
    %5 = arith.cmpi eq, %arg1, %c0_i32_1 : i32
    %c0_i32_2 = arith.constant 0 : i32
    %6 = arith.cmpi eq, %arg2, %c0_i32_2 : i32
    %7 = arith.andi %5, %6 : i1
    %8 = arith.andi %4, %7 : i1
    %9 = arith.extui %8 : i1 to i32
    %c0_i32_3 = arith.constant 0 : i32
    %10 = arith.cmpi ne, %9, %c0_i32_3 : i32
    scf.if %10 {
      %c0_i32_36 = arith.constant 0 : i32
      %c128_i32_37 = arith.constant 128 : i32
      %74 = arith.muli %c0_i32_36, %c128_i32_37 : i32
      %75 = tpu.assume_multiple %74, 128 : i32
      %76 = arith.index_cast %75 : i32 to index
      %c0_38 = arith.constant 0 : index
      %77 = vector.load %arg3[%76, %c0_38] : memref<128x128xbf16, #tpu.memory_space<vmem>>, vector<128x128xbf16>
      %c0_39 = arith.constant 0 : index
      %c0_40 = arith.constant 0 : index
      %78 = vector.load %arg4[%c0_39, %c0_40] : memref<128x128xbf16, #tpu.memory_space<vmem>>, vector<128x128xbf16>
      %cst_41 = arith.constant dense<0.000000e+00> : vector<128x128xf32>
      %79 = tpu.matmul %77, %78, %cst_41 {dimension_numbers = #tpu.dot_dimension_numbers<[1], [0], [0], [1], [0, 0, 1, 1], [], []>} : vector<128x128xbf16>, vector<128x128xbf16>, vector<128x128xf32> -> vector<128x128xf32>
      %c0_42 = arith.constant 0 : index
      %c0_43 = arith.constant 0 : index
      %80 = vector.load %arg7[%c0_42, %c0_43] : memref<1x128xf32, #tpu.memory_space<vmem>>, vector<1x128xf32>
      %cst_44 = arith.constant dense<0.000000e+00> : vector<1x128xf32>
      %81 = tpu.matmul %80, %79, %cst_44 {dimension_numbers = #tpu.dot_dimension_numbers<[1], [1], [0], [0], [0, 0, 1, 0], [], []>} : vector<1x128xf32>, vector<128x128xf32>, vector<1x128xf32> -> vector<1x128xf32>
      %c0_45 = arith.constant 0 : index
      %82 = arith.index_cast %75 : i32 to index
      %83 = vector.load %arg18[%c0_45, %82] : memref<1x128xf32, #tpu.memory_space<vmem>>, vector<1x128xf32>
      tpu.vector_store %arg18[%c0_45, %82], %81 {strides = array<i32>} : memref<1x128xf32, #tpu.memory_space<vmem>>, vector<1x128xf32>,
      %84 = arith.truncf %79 : vector<128x128xf32> to vector<128x128xbf16>
      %85 = arith.index_cast %75 : i32 to index
      %c0_46 = arith.constant 0 : index
      %86 = vector.load %arg16[%85, %c0_46] : memref<128x128xbf16, #tpu.memory_space<vmem>>, vector<128x128xbf16>
      tpu.vector_store %arg16[%85, %c0_46], %84 {strides = array<i32>} : memref<128x128xbf16, #tpu.memory_space<vmem>>, vector<128x128xbf16>,
      %c1_i32_47 = arith.constant 1 : i32
    } else {
    }
    %c1_i32 = arith.constant 1 : i32
    %11 = arith.cmpi eq, %arg0, %c1_i32 : i32
    %c0_i32_4 = arith.constant 0 : i32
    %12 = arith.cmpi eq, %arg1, %c0_i32_4 : i32
    %c0_i32_5 = arith.constant 0 : i32
    %13 = arith.cmpi eq, %arg2, %c0_i32_5 : i32
    %14 = arith.andi %12, %13 : i1
    %15 = arith.andi %11, %14 : i1
    %16 = arith.extui %15 : i1 to i32
    %c0_i32_6 = arith.constant 0 : i32
    %17 = arith.cmpi ne, %16, %c0_i32_6 : i32
    scf.if %17 {
      %c0_i32_36 = arith.constant 0 : i32
      %c128_i32_37 = arith.constant 128 : i32
      %74 = arith.muli %c0_i32_36, %c128_i32_37 : i32
      %75 = tpu.assume_multiple %74, 128 : i32
      %76 = arith.index_cast %75 : i32 to index
      %c0_38 = arith.constant 0 : index
      %77 = vector.load %arg17[%76, %c0_38] : memref<128x128xbf16, #tpu.memory_space<vmem>>, vector<128x128xbf16>
      %c0_39 = arith.constant 0 : index
      %c0_40 = arith.constant 0 : index
      %78 = vector.load %arg5[%c0_39, %c0_40] : memref<128x128xbf16, #tpu.memory_space<vmem>>, vector<128x128xbf16>
      %cst_41 = arith.constant dense<0.000000e+00> : vector<128x128xf32>
      %79 = tpu.matmul %77, %78, %cst_41 {dimension_numbers = #tpu.dot_dimension_numbers<[1], [0], [0], [1], [0, 0, 1, 1], [], []>} : vector<128x128xbf16>, vector<128x128xbf16>, vector<128x128xf32> -> vector<128x128xf32>
      %c0_42 = arith.constant 0 : index
      %c0_43 = arith.constant 0 : index
      %80 = vector.load %arg9[%c0_42, %c0_43] : memref<1x128xf32, #tpu.memory_space<vmem>>, vector<1x128xf32>
      %cst_44 = arith.constant dense<0.000000e+00> : vector<1x128xf32>
      %81 = tpu.matmul %80, %79, %cst_44 {dimension_numbers = #tpu.dot_dimension_numbers<[1], [1], [0], [0], [0, 0, 1, 0], [], []>} : vector<1x128xf32>, vector<128x128xf32>, vector<1x128xf32> -> vector<1x128xf32>
      %c0_45 = arith.constant 0 : index
      %82 = arith.index_cast %75 : i32 to index
      %83 = vector.load %arg18[%c0_45, %82] : memref<1x128xf32, #tpu.memory_space<vmem>>, vector<1x128xf32>
      tpu.vector_store %arg18[%c0_45, %82], %81 {strides = array<i32>} : memref<1x128xf32, #tpu.memory_space<vmem>>, vector<1x128xf32>,
      %84 = arith.truncf %79 : vector<128x128xf32> to vector<128x128xbf16>
      %85 = arith.index_cast %75 : i32 to index
      %c0_46 = arith.constant 0 : index
      %86 = vector.load %arg16[%85, %c0_46] : memref<128x128xbf16, #tpu.memory_space<vmem>>, vector<128x128xbf16>
      tpu.vector_store %arg16[%85, %c0_46], %84 {strides = array<i32>} : memref<128x128xbf16, #tpu.memory_space<vmem>>, vector<128x128xbf16>,
      %c1_i32_47 = arith.constant 1 : i32
    } else {
    }
    %c0_i32_7 = arith.constant 0 : i32
    %18 = arith.cmpi eq, %arg2, %c0_i32_7 : i32
    %19 = arith.extui %18 : i1 to i32
    %c0_i32_8 = arith.constant 0 : i32
    %20 = arith.cmpi ne, %19, %c0_i32_8 : i32
    scf.if %20 {
      %c0_i32_36 = arith.constant 0 : i32
      %74 = arith.cmpi eq, %arg0, %c0_i32_36 : i32
      %c0_37 = arith.constant 0 : index
      %c0_38 = arith.constant 0 : index
      %75 = vector.load %arg8[%c0_37, %c0_38] : memref<1x128xf32, #tpu.memory_space<vmem>>, vector<1x128xf32>
      %c0_39 = arith.constant 0 : index
      %c0_40 = arith.constant 0 : index
      %76 = vector.load %arg10[%c0_39, %c0_40] : memref<1x128xf32, #tpu.memory_space<vmem>>, vector<1x128xf32>
      %77 = arith.select %74, %75, %76 : vector<1x128xf32>
      %78 = arith.index_cast %1 : i32 to index
      %c0_41 = arith.constant 0 : index
      %79 = vector.load %arg16[%78, %c0_41] : memref<128x128xbf16, #tpu.memory_space<vmem>>, vector<128x128xbf16>
      %80 = arith.extf %79 : vector<128x128xbf16> to vector<128x128xf32>
      %81 = vector.broadcast %77 : vector<1x128xf32> to vector<128x128xf32>
      %82 = arith.mulf %80, %81 : vector<128x128xf32>
      %cst_42 = arith.constant dense<0.000000e+00> : vector<128xf32>
      %83 = vector.multi_reduction <add>, %82, %cst_42 [1] : vector<128x128xf32> to vector<128xf32>
      %84 = vector.shape_cast %83 : vector<128xf32> to vector<128x1xf32>
      %c0_43 = arith.constant 0 : index
      %c0_44 = arith.constant 0 : index
      %85 = vector.load %arg19[%c0_43, %c0_44] : memref<128x1xf32, #tpu.memory_space<vmem>>, vector<128x1xf32>
      tpu.vector_store %arg19[%c0_43, %c0_44], %84 {strides = array<i32>} : memref<128x1xf32, #tpu.memory_space<vmem>>, vector<128x1xf32>,
      %cst_45 = arith.constant -1.000000e+30 : f32
      %86 = vector.broadcast %cst_45 : f32 to vector<128x1xf32>
      %c0_46 = arith.constant 0 : index
      %c0_47 = arith.constant 0 : index
      %87 = vector.load %arg20[%c0_46, %c0_47] : memref<128x1xf32, #tpu.memory_space<vmem>>, vector<128x1xf32>
      tpu.vector_store %arg20[%c0_46, %c0_47], %86 {strides = array<i32>} : memref<128x1xf32, #tpu.memory_space<vmem>>, vector<128x1xf32>,
      %cst_48 = arith.constant 0.000000e+00 : f32
      %88 = vector.broadcast %cst_48 : f32 to vector<128x1xf32>
      %c0_49 = arith.constant 0 : index
      %c0_50 = arith.constant 0 : index
      %89 = vector.load %arg21[%c0_49, %c0_50] : memref<128x1xf32, #tpu.memory_space<vmem>>, vector<128x1xf32>
      tpu.vector_store %arg21[%c0_49, %c0_50], %88 {strides = array<i32>} : memref<128x1xf32, #tpu.memory_space<vmem>>, vector<128x1xf32>,
      %cst_51 = arith.constant 0.000000e+00 : f32
      %90 = vector.broadcast %cst_51 : f32 to vector<128x128xf32>
      %c0_52 = arith.constant 0 : index
      %c0_53 = arith.constant 0 : index
      %91 = vector.load %arg22[%c0_52, %c0_53] : memref<128x128xf32, #tpu.memory_space<vmem>>, vector<128x128xf32>
      tpu.vector_store %arg22[%c0_52, %c0_53], %90 {strides = array<i32>} : memref<128x128xf32, #tpu.memory_space<vmem>>, vector<128x128xf32>,
    } else {
    }
    %c0 = arith.constant 0 : index
    %21 = arith.index_cast %3 : i32 to index
    %22 = vector.load %arg18[%c0, %21] : memref<1x128xf32, #tpu.memory_space<vmem>>, vector<1x128xf32>
    %c0_9 = arith.constant 0 : index
    %c0_10 = arith.constant 0 : index
    %23 = vector.load %arg19[%c0_9, %c0_10] : memref<128x1xf32, #tpu.memory_space<vmem>>, vector<128x1xf32>
    %24 = arith.truncf %23 : vector<128x1xf32> to vector<128x1xbf16>
    %25 = arith.truncf %22 : vector<1x128xf32> to vector<1x128xbf16>
    %26 = vector.broadcast %24 : vector<128x1xbf16> to vector<128x128xbf16>
    %27 = vector.broadcast %25 : vector<1x128xbf16> to vector<128x128xbf16>
    %28 = arith.addf %26, %27 : vector<128x128xbf16>
    %cst = arith.constant 2.001950e-01 : bf16
    %29 = vector.broadcast %cst : bf16 to vector<128x128xbf16>
    %30 = arith.mulf %29, %28 : vector<128x128xbf16>
    %31 = arith.maximumf %28, %30 : vector<128x128xbf16>
    %c0_11 = arith.constant 0 : index
    %c0_12 = arith.constant 0 : index
    %32 = vector.load %arg14[%c0_11, %c0_12] : memref<128x128xi8, #tpu.memory_space<vmem>>, vector<128x128xi8>
    %c0_i8 = arith.constant 0 : i8
    %33 = vector.broadcast %c0_i8 : i8 to vector<128x128xi8>
    %34 = arith.cmpi ne, %32, %33 : vector<128x128xi8>
    %cst_13 = arith.constant -1.000260e+30 : bf16
    %35 = vector.broadcast %cst_13 : bf16 to vector<128x128xbf16>
    %36 = arith.select %34, %31, %35 : vector<128x128xi1>, vector<128x128xbf16>
    %c0_14 = arith.constant 0 : index
    %c0_15 = arith.constant 0 : index
    %37 = vector.load %arg20[%c0_14, %c0_15] : memref<128x1xf32, #tpu.memory_space<vmem>>, vector<128x1xf32>
    %cst_16 = arith.constant dense<0xFF80> : vector<128xbf16>
    %38 = vector.multi_reduction <maximumf>, %36, %cst_16 [1] : vector<128x128xbf16> to vector<128xbf16>
    %39 = vector.shape_cast %38 : vector<128xbf16> to vector<128x1xbf16>
    %40 = arith.extf %39 : vector<128x1xbf16> to vector<128x1xf32>
    %41 = arith.maximumf %37, %40 : vector<128x1xf32>
    %42 = arith.subf %37, %41 : vector<128x1xf32>
    %43 = math.exp %42 : vector<128x1xf32>
    %44 = arith.truncf %41 : vector<128x1xf32> to vector<128x1xbf16>
    %45 = vector.broadcast %44 : vector<128x1xbf16> to vector<128x128xbf16>
    %46 = arith.subf %36, %45 : vector<128x128xbf16>
    %47 = math.exp %46 : vector<128x128xbf16>
    %c0_17 = arith.constant 0 : index
    %c0_18 = arith.constant 0 : index
    %48 = vector.load %arg21[%c0_17, %c0_18] : memref<128x1xf32, #tpu.memory_space<vmem>>, vector<128x1xf32>
    %49 = arith.mulf %43, %48 : vector<128x1xf32>
    %50 = arith.extf %47 : vector<128x128xbf16> to vector<128x128xf32>
    %cst_19 = arith.constant dense<0.000000e+00> : vector<128xf32>
    %51 = vector.multi_reduction <add>, %50, %cst_19 [1] : vector<128x128xf32> to vector<128xf32>
    %52 = vector.shape_cast %51 : vector<128xf32> to vector<128x1xf32>
    %53 = arith.addf %49, %52 : vector<128x1xf32>
    %c0_20 = arith.constant 0 : index
    %c0_21 = arith.constant 0 : index
    %54 = vector.load %arg21[%c0_20, %c0_21] : memref<128x1xf32, #tpu.memory_space<vmem>>, vector<128x1xf32>
    tpu.vector_store %arg21[%c0_20, %c0_21], %53 {strides = array<i32>} : memref<128x1xf32, #tpu.memory_space<vmem>>, vector<128x1xf32>,
    %c0_22 = arith.constant 0 : index
    %c0_23 = arith.constant 0 : index
    %55 = vector.load %arg22[%c0_22, %c0_23] : memref<128x128xf32, #tpu.memory_space<vmem>>, vector<128x128xf32>
    %56 = vector.broadcast %43 : vector<128x1xf32> to vector<128x128xf32>
    %57 = arith.mulf %56, %55 : vector<128x128xf32>
    %58 = arith.index_cast %3 : i32 to index
    %c0_24 = arith.constant 0 : index
    %59 = vector.load %arg16[%58, %c0_24] : memref<128x128xbf16, #tpu.memory_space<vmem>>, vector<128x128xbf16>
    %cst_25 = arith.constant dense<0.000000e+00> : vector<128x128xf32>
    %60 = tpu.matmul %47, %59, %cst_25 {dimension_numbers = #tpu.dot_dimension_numbers<[1], [0], [0], [1], [0, 0, 1, 1], [], []>} : vector<128x128xbf16>, vector<128x128xbf16>, vector<128x128xf32> -> vector<128x128xf32>
    %61 = arith.addf %57, %60 : vector<128x128xf32>
    %c0_26 = arith.constant 0 : index
    %c0_27 = arith.constant 0 : index
    %62 = vector.load %arg22[%c0_26, %c0_27] : memref<128x128xf32, #tpu.memory_space<vmem>>, vector<128x128xf32>
    tpu.vector_store %arg22[%c0_26, %c0_27], %61 {strides = array<i32>} : memref<128x128xf32, #tpu.memory_space<vmem>>, vector<128x128xf32>,
    %c0_28 = arith.constant 0 : index
    %c0_29 = arith.constant 0 : index
    %63 = vector.load %arg20[%c0_28, %c0_29] : memref<128x1xf32, #tpu.memory_space<vmem>>, vector<128x1xf32>
    tpu.vector_store %arg20[%c0_28, %c0_29], %41 {strides = array<i32>} : memref<128x1xf32, #tpu.memory_space<vmem>>, vector<128x1xf32>,
    %c0_i32_30 = arith.constant 0 : i32
    %64 = arith.cmpi eq, %arg0, %c0_i32_30 : i32
    %c0_i32_31 = arith.constant 0 : i32
    %65 = arith.cmpi eq, %arg2, %c0_i32_31 : i32
    %66 = arith.andi %64, %65 : i1
    %67 = arith.extui %66 : i1 to i32
    %c0_i32_32 = arith.constant 0 : i32
    %68 = arith.cmpi ne, %67, %c0_i32_32 : i32
    scf.if %68 {
      %c0_36 = arith.constant 0 : index
      %c0_37 = arith.constant 0 : index
      %74 = vector.load %arg21[%c0_36, %c0_37] : memref<128x1xf32, #tpu.memory_space<vmem>>, vector<128x1xf32>
      %75 = tpu.reciprocal %74 {approx = true} : vector<128x1xf32> -> vector<128x1xf32>
      %c0_38 = arith.constant 0 : index
      %c0_39 = arith.constant 0 : index
      %76 = vector.load %arg22[%c0_38, %c0_39] : memref<128x128xf32, #tpu.memory_space<vmem>>, vector<128x128xf32>
      %77 = vector.broadcast %75 : vector<128x1xf32> to vector<128x128xf32>
      %78 = arith.mulf %76, %77 : vector<128x128xf32>
      %c0_40 = arith.constant 0 : index
      %c0_41 = arith.constant 0 : index
      %79 = vector.load %arg11[%c0_40, %c0_41] : memref<1x128xf32, #tpu.memory_space<vmem>>, vector<1x128xf32>
      %80 = vector.broadcast %79 : vector<1x128xf32> to vector<128x128xf32>
      %81 = arith.addf %78, %80 : vector<128x128xf32>
      %cst_42 = arith.constant 0.000000e+00 : f32
      %82 = vector.broadcast %cst_42 : f32 to vector<128x128xf32>
      %83 = arith.maximumf %81, %82 : vector<128x128xf32>
      %84 = arith.truncf %83 : vector<128x128xf32> to vector<128x128xbf16>
      %85 = arith.index_cast %1 : i32 to index
      %c0_43 = arith.constant 0 : index
      %86 = vector.load %arg17[%85, %c0_43] : memref<128x128xbf16, #tpu.memory_space<vmem>>, vector<128x128xbf16>
      tpu.vector_store %arg17[%85, %c0_43], %84 {strides = array<i32>} : memref<128x128xbf16, #tpu.memory_space<vmem>>, vector<128x128xbf16>,
    } else {
    }
    %c1_i32_33 = arith.constant 1 : i32
    %69 = arith.cmpi eq, %arg0, %c1_i32_33 : i32
    %c0_i32_34 = arith.constant 0 : i32
    %70 = arith.cmpi eq, %arg2, %c0_i32_34 : i32
    %71 = arith.andi %69, %70 : i1
    %72 = arith.extui %71 : i1 to i32
    %c0_i32_35 = arith.constant 0 : i32
    %73 = arith.cmpi ne, %72, %c0_i32_35 : i32
    scf.if %73 {
      %c0_36 = arith.constant 0 : index
      %c0_37 = arith.constant 0 : index
      %74 = vector.load %arg21[%c0_36, %c0_37] : memref<128x1xf32, #tpu.memory_space<vmem>>, vector<128x1xf32>
      %75 = tpu.reciprocal %74 {approx = true} : vector<128x1xf32> -> vector<128x1xf32>
      %c0_38 = arith.constant 0 : index
      %c0_39 = arith.constant 0 : index
      %76 = vector.load %arg22[%c0_38, %c0_39] : memref<128x128xf32, #tpu.memory_space<vmem>>, vector<128x128xf32>
      %77 = vector.broadcast %75 : vector<128x1xf32> to vector<128x128xf32>
      %78 = arith.mulf %76, %77 : vector<128x128xf32>
      %c0_40 = arith.constant 0 : index
      %c0_41 = arith.constant 0 : index
      %79 = vector.load %arg12[%c0_40, %c0_41] : memref<1x128xf32, #tpu.memory_space<vmem>>, vector<1x128xf32>
      %80 = vector.broadcast %79 : vector<1x128xf32> to vector<128x128xf32>
      %81 = arith.addf %78, %80 : vector<128x128xf32>
      %82 = arith.truncf %81 : vector<128x128xf32> to vector<128x128xbf16>
      %c0_42 = arith.constant 0 : index
      %c0_43 = arith.constant 0 : index
      %83 = vector.load %arg6[%c0_42, %c0_43] : memref<128x128xbf16, #tpu.memory_space<vmem>>, vector<128x128xbf16>
      %cst_44 = arith.constant dense<0.000000e+00> : vector<128x128xf32>
      %84 = tpu.matmul %82, %83, %cst_44 {dimension_numbers = #tpu.dot_dimension_numbers<[1], [0], [0], [1], [0, 0, 1, 1], [], []>} : vector<128x128xbf16>, vector<128x128xbf16>, vector<128x128xf32> -> vector<128x128xf32>
      %c0_45 = arith.constant 0 : index
      %c0_46 = arith.constant 0 : index
      %85 = vector.load %arg13[%c0_45, %c0_46] : memref<1x128xf32, #tpu.memory_space<vmem>>, vector<1x128xf32>
      %86 = vector.broadcast %85 : vector<1x128xf32> to vector<128x128xf32>
      %87 = arith.addf %84, %86 : vector<128x128xf32>
      %c0_47 = arith.constant 0 : index
      %c0_48 = arith.constant 0 : index
      %88 = vector.load %arg15[%c0_47, %c0_48] : memref<128x128xf32, #tpu.memory_space<vmem>>, vector<128x128xf32>
      tpu.vector_store %arg15[%c0_47, %c0_48], %87 {strides = array<i32>} : memref<128x128xf32, #tpu.memory_space<vmem>>, vector<128x128xf32>,
    } else {
    }
    return
  }
  func.func @transform_0(%arg0: i32, %arg1: i32, %arg2: i32) -> (i32, i32) {
    %c0_i32 = arith.constant 0 : i32
    %c0_i32_0 = arith.constant 0 : i32
    %c0_i32_1 = arith.constant 0 : i32
    return %c0_i32, %c0_i32_0 : i32, i32
  }
  func.func @transform_1(%arg0: i32, %arg1: i32, %arg2: i32) -> (i32, i32) {
    %c0_i32 = arith.constant 0 : i32
    %c0_i32_0 = arith.constant 0 : i32
    %c0_i32_1 = arith.constant 0 : i32
    return %c0_i32, %c0_i32_0 : i32, i32
  }
  func.func @transform_2(%arg0: i32, %arg1: i32, %arg2: i32) -> (i32, i32) {
    %c0_i32 = arith.constant 0 : i32
    %c0_i32_0 = arith.constant 0 : i32
    %c0_i32_1 = arith.constant 0 : i32
    return %c0_i32, %c0_i32_0 : i32, i32
  }
  func.func @transform_3(%arg0: i32, %arg1: i32, %arg2: i32) -> (i32, i32) {
    %c0_i32 = arith.constant 0 : i32
    %c0_i32_0 = arith.constant 0 : i32
    %c0_i32_1 = arith.constant 0 : i32
    return %c0_i32, %c0_i32_0 : i32, i32
  }
  func.func @transform_4(%arg0: i32, %arg1: i32, %arg2: i32) -> (i32, i32) {
    %c0_i32 = arith.constant 0 : i32
    %c0_i32_0 = arith.constant 0 : i32
    %c0_i32_1 = arith.constant 0 : i32
    return %c0_i32, %c0_i32_0 : i32, i32
  }
  func.func @transform_5(%arg0: i32, %arg1: i32, %arg2: i32) -> (i32, i32) {
    %c0_i32 = arith.constant 0 : i32
    %c0_i32_0 = arith.constant 0 : i32
    %c0_i32_1 = arith.constant 0 : i32
    return %c0_i32, %c0_i32_0 : i32, i32
  }
  func.func @transform_6(%arg0: i32, %arg1: i32, %arg2: i32) -> (i32, i32) {
    %c0_i32 = arith.constant 0 : i32
    %c0_i32_0 = arith.constant 0 : i32
    %c0_i32_1 = arith.constant 0 : i32
    return %c0_i32, %c0_i32_0 : i32, i32
  }
  func.func @transform_7(%arg0: i32, %arg1: i32, %arg2: i32) -> (i32, i32) {
    %c0_i32 = arith.constant 0 : i32
    %c0_i32_0 = arith.constant 0 : i32
    %c0_i32_1 = arith.constant 0 : i32
    return %c0_i32, %c0_i32_0 : i32, i32
  }
  func.func @transform_8(%arg0: i32, %arg1: i32, %arg2: i32) -> (i32, i32) {
    %c0_i32 = arith.constant 0 : i32
    %c0_i32_0 = arith.constant 0 : i32
    %c0_i32_1 = arith.constant 0 : i32
    return %c0_i32, %c0_i32_0 : i32, i32
  }
  func.func @transform_9(%arg0: i32, %arg1: i32, %arg2: i32) -> (i32, i32) {
    %c0_i32 = arith.constant 0 : i32
    %c0_i32_0 = arith.constant 0 : i32
    %c0_i32_1 = arith.constant 0 : i32
    return %c0_i32, %c0_i32_0 : i32, i32
  }
  func.func @transform_10(%arg0: i32, %arg1: i32, %arg2: i32) -> (i32, i32) {
    %c0_i32 = arith.constant 0 : i32
    %c0_i32_0 = arith.constant 0 : i32
    %c0_i32_1 = arith.constant 0 : i32
    return %c0_i32, %c0_i32_0 : i32, i32
  }
  func.func @transform_11(%arg0: i32, %arg1: i32, %arg2: i32) -> (i32, i32) {
    %c0_i32 = arith.constant 0 : i32
    return %arg1, %arg2 : i32, i32
  }
  func.func @transform_12(%arg0: i32, %arg1: i32, %arg2: i32) -> (i32, i32) {
    %0 = arith.muli %arg0, %arg1 : i32
    %c0_i32 = arith.constant 0 : i32
    %c0_i32_0 = arith.constant 0 : i32
    return %0, %c0_i32 : i32, i32
  }
}

</mosaic_0001>

<bundles_post_ra>
// kernel: gat_encoder_pallas.1
= control target key start
LH: loop header
LB: loop body
LE: loop exit
PB: predicated region body
PF: predicated region fallthrough
CT: control target
= control target key end

     0   :  { %s3926_s21 = smov 0   ;;  %s3928_s22 = smov 0   ;;  %s4980_s0 = inlined_call_operand.vmem [shape: bf16[128,128], index: 0, kind: input, shape index: {}]   ;;  %s4981_s1 = inlined_call_operand.vmem [shape: bf16[128,128], index: 1, kind: input, shape index: {}]   ;;  %s4982_s2 = inlined_call_operand.vmem [shape: bf16[128,128], index: 2, kind: input, shape index: {}]   ;;  %s4983_s3 = inlined_call_operand.vmem [shape: bf16[128,128], index: 3, kind: input, shape index: {}]   ;;  %s4984_s4 = inlined_call_operand.vmem [shape: f32[1,128], index: 4, kind: input, shape index: {}]   ;;  %s4985_s5 = inlined_call_operand.vmem [shape: f32[1,128], index: 5, kind: input, shape index: {}]   ;;  %s4986_s6 = inlined_call_operand.vmem [shape: f32[1,128], index: 6, kind: input, shape index: {}]   ;;  %s4987_s7 = inlined_call_operand.vmem [shape: f32[1,128], index: 7, kind: input, shape index: {}]   ;;  %s4988_s8 = inlined_call_operand.vmem [shape: f32[1,128], index: 8, kind: input, shape index: {}]   ;;  %s4989_s9 = inlined_call_operand.vmem [shape: f32[1,128], index: 9, kind: input, shape index: {}]   ;;  %s4990_s10 = inlined_call_operand.vmem [shape: f32[1,128], index: 10, kind: input, shape index: {}]   ;;  %s4991_s11 = inlined_call_operand.vmem [shape: s8[128,128], index: 11, kind: input, shape index: {}]   ;;  %s4992_s12 = inlined_call_operand.vmem [shape: f32[128,128], index: 12, kind: output, shape index: {}]  }
   0x1   :  { %s3930_s23 = smov 0  }
   0x2 LB: > { %s41_s24 = sadd.s32 1, %s3849_s22  ;;  %p3116_p0 = scmp.ge.s32.totalorder %s3853_s23, 1  ;;  %s3853_s23 = sphi %s3930_s23, %s22_s23   ;;  %s3849_s22 = sphi %s3928_s22, %s5033_s22   ;;  %s3845_s21 = sphi %s3926_s21, %s5032_s21  }
   0x3   : > { %p43_p1 = scmp.ge.s32.totalorder %s41_s24, 2  ;;  %p389_p2 = scmp.lt.s32.totalorder %s3853_s23, 3 }
   0x5   : > { %s5035_s24 = smov (%p43_p1, %s41_s24), 0  ;;  %p390_p3 = pnand %p3116_p0, %p389_p2 }
   0x6   : > { %p458_p4 = scmp.eq.s32.totalorder (!%p390_p3), %s3845_s21, 0 }
   0x7   : > { %393 = sbr.rel (%p390_p3) target bundleno = 1962 (0x7aa), region = 68 }
   0xc   : > { %466 = sbr.rel (!%p458_p4) target bundleno = 390 (0x186), region = 72  ;;  %v3365_v0 = vld [vmem:[%s4981_s1 + $0x38] sm:$0xff] (%p458_p4)  ;;  %v3364_v1 = vld [vmem:[%s4981_s1 + $0x30] sm:$0xff] (%p458_p4)  ;;  %v3363_v2 = vld [vmem:[%s4981_s1 + $0x28] sm:$0xff] (%p458_p4) }
   0xd   : > { %3581 = vmatpush.bf16.msra.mxu2 (%p458_p4), %v3365_v0  ;;  %3582 = vmatpush.bf16.msra.mxu3 (%p458_p4), %v3365_v0  ;;  %v3362_v3 = vld [vmem:[%s4981_s1 + $0x20] sm:$0xff] (%p458_p4)  ;;  %v3361_v4 = vld [vmem:[%s4981_s1 + $0x18] sm:$0xff] (%p458_p4)  ;;  %v3360_v5 = vld [vmem:[%s4981_s1 + $0x10] sm:$0xff] (%p458_p4) }
   0xe   : > { %595 = vmatpush.bf16.msra.mxu0 (%p458_p4), %v3365_v0  ;;  %v3359_v6 = vld [vmem:[%s4981_s1 + $0x8] sm:$0xff] (%p458_p4)  ;;  %v3358_v7 = vld [vmem:[%s4981_s1] sm:$0xff] (%p458_p4)  ;;  %v3353_v8 = vld [vmem:[%s4980_s0 + $0x18] sm:$0xff] (%p458_p4) }
   0xf   : > { %v3356_v9 = vld [vmem:[%s4980_s0 + $0x30] sm:$0xff] (%p458_p4)  ;;  %v3350_v10 = vld [vmem:[%s4980_s0] sm:$0xff] (%p458_p4)  ;;  %v3357_v12 = vld [vmem:[%s4980_s0 + $0x38] sm:$0xff] (%p458_p4) }
  0x10   : > { %v3354_v11 = vld [vmem:[%s4980_s0 + $0x20] sm:$0xff] (%p458_p4)  ;;  %v3351_v13 = vld [vmem:[%s4980_s0 + $0x8] sm:$0xff] (%p458_p4)  ;;  %v3352_v15 = vld [vmem:[%s4980_s0 + $0x10] sm:$0xff] (%p458_p4) }
  0x11   : > { %3583 = vmatpush.bf16.msra.mxu2 %v3364_v1  ;;  %3584 = vmatpush.bf16.msra.mxu3 %v3364_v1  ;;  %v3355_v14 = vld [vmem:[%s4980_s0 + $0x28] sm:$0xff]  ;;  %v644_v40 = vld [vmem:[%s4984_s4] sm:$0x1] }
  0x12   : > { %596 = vmatpush.bf16.msra.mxu0 %v3364_v1 }
  0x15   : > { %3585 = vmatpush.bf16.msra.mxu2 %v3363_v2  ;;  %3586 = vmatpush.bf16.msra.mxu3 %v3363_v2 }
  0x16   : > { %597 = vmatpush.bf16.msra.mxu0 %v3363_v2 }
  0x19   : > { %3587 = vmatpush.bf16.msra.mxu2 %v3362_v3  ;;  %3588 = vmatpush.bf16.msra.mxu3 %v3362_v3 }
  0x1a   : > { %598 = vmatpush.bf16.msra.mxu0 %v3362_v3 }
  0x1d   : > { %3589 = vmatpush.bf16.msra.mxu2 %v3361_v4  ;;  %3590 = vmatpush.bf16.msra.mxu3 %v3361_v4 }
  0x1e   : > { %599 = vmatpush.bf16.msra.mxu0 %v3361_v4 }
  0x21   : > { %3591 = vmatpush.bf16.msra.mxu2 %v3360_v5  ;;  %3592 = vmatpush.bf16.msra.mxu3 %v3360_v5 }
  0x22   : > { %600 = vmatpush.bf16.msra.mxu0 %v3360_v5 }
  0x25   : > { %3593 = vmatpush.bf16.msra.mxu2 %v3359_v6  ;;  %3594 = vmatpush.bf16.msra.mxu3 %v3359_v6 }
  0x26   : > { %601 = vmatpush.bf16.msra.mxu0 %v3359_v6 }
  0x29   : > { %3595 = vmatpush.bf16.msra.mxu2 %v3358_v7  ;;  %3596 = vmatpush.bf16.msra.mxu3 %v3358_v7 }
  0x2a   : > { %602 = vmatpush.bf16.msra.mxu0 %v3358_v7 }
  0x2c   : > { %618 = vmatmul.bf16.vlgmr.msra.gmra.mxu2 %v3353_v8  ;;  %633 = vmatmul.bf16.vlgmr.msra.gmra.mxu3 %v3356_v9 }
  0x2d   : > { %603 = vmatmul.bf16.vlgmr.msra.gmra.mxu0 %v3350_v10 }
  0x3c   : > { %623 = vmatmul.bf16.gmra.mxu2 %v3354_v11  ;;  %638 = vmatmul.bf16.gmra.mxu3 %v3357_v12 }
  0x3d   : > { %608 = vmatmul.bf16.gmra.mxu0 %v3351_v13 }
  0x4c   : > { %628 = vmatmul.bf16.gmra.mxu2 %v3355_v14 }
  0x4d   : > { %613 = vmatmul.bf16.gmra.mxu0 %v3352_v15 }
  0xaa   : > { %v604_v16 = vpop.f32.mrf.mxu0 }
  0xaf   : > { %v619_v17 = vpop.f32.mrf.mxu2  ;;  %v634_v18 = vpop.f32.mrf.mxu3 }
  0xb2   : > { %v606_v19 = vpop.f32.mrf.mxu0 }
  0xb3   : > { %v3404_v20 = vpack.c.bf16 %v606_v19, %v604_v16 }
  0xb5   : > { %3405 = vst [vmem:[#allocation2 + $0x30] sm:$0xff] %v3404_v20  }
  0xb7   : > { %v621_v21 = vpop.f32.mrf.mxu2  ;;  %v636_v22 = vpop.f32.mrf.mxu3 }
  0xb8   : > { %v3419_v23 = vpack.c.bf16 %v621_v21, %v619_v17  ;;  %v3434_v24 = vpack.c.bf16 %v636_v22, %v634_v18 }
  0xba   : > { %3555 = vst [vmem:[#allocation2 + $0x10] sm:$0xff] %v3419_v23   ;;  %v609_v25 = vpop.f32.mrf.mxu0 }
  0xbb   : > { %3558 = vst [vmem:[#allocation2 + $0x28] sm:$0xff] %v3434_v24  }
  0xbf   : > { %v624_v26 = vpop.f32.mrf.mxu2  ;;  %v639_v27 = vpop.f32.mrf.mxu3 }
  0xc2   : > { %v611_v28 = vpop.f32.mrf.mxu0 }
  0xc3   : > { %v3409_v29 = vpack.c.bf16 %v611_v28, %v609_v25 }
  0xc5   : > { %3553 = vst [vmem:[#allocation2] sm:$0xff] %v3409_v29  }
  0xc7   : > { %v626_v30 = vpop.f32.mrf.mxu2  ;;  %v641_v31 = vpop.f32.mrf.mxu3 }
  0xc8   : > { %v3424_v32 = vpack.c.bf16 %v626_v30, %v624_v26  ;;  %v3439_v33 = vpack.c.bf16 %v641_v31, %v639_v27  ;;  %645 = vmatpush.xpose.msra.mxu1 %v641_v31 }
  0xca   : > { %3556 = vst [vmem:[#allocation2 + $0x8] sm:$0xff] %v3424_v32   ;;  %v614_v34 = vpop.f32.mrf.mxu0 }
  0xcb   : > { %3559 = vst [vmem:[#allocation2 + $0x38] sm:$0xff] %v3439_v33  }
  0xcc   : > { %646 = vmatpush.xpose.msra.mxu1 %v639_v27 }
  0xcf   : > { %v629_v35 = vpop.f32.mrf.mxu2 }
  0xd0   : > { %647 = vmatpush.xpose.msra.mxu1 %v636_v22 }
  0xd2   : > { %v616_v36 = vpop.f32.mrf.mxu0 }
  0xd3   : > { %v3414_v37 = vpack.c.bf16 %v616_v36, %v614_v34 }
  0xd4   : > { %648 = vmatpush.xpose.msra.mxu1 %v634_v18 }
  0xd5   : > { %3554 = vst [vmem:[#allocation2 + $0x18] sm:$0xff] %v3414_v37  }
  0xd7   : > { %v631_v38 = vpop.f32.mrf.mxu2 }
  0xd8   : > { %v3429_v39 = vpack.c.bf16 %v631_v38, %v629_v35  ;;  %649 = vmatpush.xpose.msra.mxu1 %v631_v38 }
  0xda   : > { %3557 = vst [vmem:[#allocation2 + $0x20] sm:$0xff] %v3429_v39  }
  0xdc   : > { %650 = vmatpush.xpose.msra.mxu1 %v629_v35 }
  0xe0   : > { %651 = vmatpush.xpose.msra.mxu1 %v626_v30 }
  0xe4   : > { %652 = vmatpush.xpose.msra.mxu1 %v624_v26 }
  0xe8   : > { %653 = vmatpush.xpose.msra.mxu1 %v621_v21 }
  0xec   : > { %654 = vmatpush.xpose.msra.mxu1 %v619_v17 }
  0xf0   : > { %655 = vmatpush.xpose.msra.mxu1 %v616_v36 }
  0xf4   : > { %656 = vmatpush.xpose.msra.mxu1 %v614_v34 }
  0xf8   : > { %657 = vmatpush.xpose.msra.mxu1 %v611_v28 }
  0xfc   : > { %658 = vmatpush.xpose.msra.mxu1 %v609_v25 }
 0x100   : > { %659 = vmatpush.xpose.msra.mxu1 %v606_v19 }
 0x104   : > { %660 = vmatpush.xpose.msra.mxu1 %v604_v16 }
 0x107   : > { %661 = vmatmul.f32.vlgmr.msra.gmra.mxu1 %v644_v40 }
 0x184   : > { %v662_v41 = vpop.f32.mrf.mxu1 }
 0x185   : > { %665 = vst [vmem:[#allocation4] sm:$0x1] %v662_v41 }
 0x186 PF: > { %p698_p5 = scmp.eq.s32.totalorder %s3845_s21, 1 }
 0x187   : > { %v3382_v42 = vld [vmem:[%s4982_s2 + $0x38] sm:$0xff] (%p698_p5)  ;;  %v3381_v43 = vld [vmem:[%s4982_s2 + $0x30] sm:$0xff] (%p698_p5)  ;;  %v3380_v44 = vld [vmem:[%s4982_s2 + $0x28] sm:$0xff] (%p698_p5) }
 0x188   : > { %702 = sbr.rel (!%p698_p5) target bundleno = 769 (0x301), region = 76  ;;  %3597 = vmatpush.bf16.msra.mxu2 (%p698_p5), %v3382_v42  ;;  %3598 = vmatpush.bf16.msra.mxu3 (%p698_p5), %v3382_v42  ;;  %v3379_v45 = vld [vmem:[%s4982_s2 + $0x20] sm:$0xff] (%p698_p5)  ;;  %v3378_v46 = vld [vmem:[%s4982_s2 + $0x18] sm:$0xff] (%p698_p5)  ;;  %v3377_v47 = vld [vmem:[%s4982_s2 + $0x10] sm:$0xff] (%p698_p5) }
 0x189   : > { %831 = vmatpush.bf16.msra.mxu0 (%p698_p5), %v3382_v42  ;;  %v3376_v48 = vld [vmem:[%s4982_s2 + $0x8] sm:$0xff] (%p698_p5)  ;;  %v3375_v49 = vld [vmem:[%s4982_s2] sm:$0xff] (%p698_p5)  ;;  %v3373_v51 = vld [vmem:[#allocation3 + $0x30] sm:$0xff] (%p698_p5) }
 0x18a   : > { %v3370_v50 = vld [vmem:[#allocation3 + $0x20] sm:$0xff] (%p698_p5)  ;;  %v3371_v53 = vld [vmem:[#allocation3 + $0x28] sm:$0xff] (%p698_p5)  ;;  %v3374_v54 = vld [vmem:[#allocation3 + $0x38] sm:$0xff] (%p698_p5) }
 0x18b   : > { %v3367_v52 = vld [vmem:[#allocation3] sm:$0xff] (%p698_p5)  ;;  %v3368_v55 = vld [vmem:[#allocation3 + $0x18] sm:$0xff] (%p698_p5)  ;;  %v3372_v56 = vld [vmem:[#allocation3 + $0x8] sm:$0xff] (%p698_p5) }
 0x18c   : > { %3599 = vmatpush.bf16.msra.mxu2 (%p698_p5), %v3381_v43  ;;  %3600 = vmatpush.bf16.msra.mxu3 (%p698_p5), %v3381_v43  ;;  %v3369_v57 = vld [vmem:[#allocation3 + $0x10] sm:$0xff] (%p698_p5)  ;;  %v880_v18 = vld [vmem:[%s4986_s6] sm:$0x1] (%p698_p5) }
 0x18d   : > { %832 = vmatpush.bf16.msra.mxu0 %v3381_v43 }
 0x190   : > { %3601 = vmatpush.bf16.msra.mxu2 %v3380_v44  ;;  %3602 = vmatpush.bf16.msra.mxu3 %v3380_v44 }
 0x191   : > { %833 = vmatpush.bf16.msra.mxu0 %v3380_v44 }
 0x194   : > { %3603 = vmatpush.bf16.msra.mxu2 %v3379_v45  ;;  %3604 = vmatpush.bf16.msra.mxu3 %v3379_v45 }
 0x195   : > { %834 = vmatpush.bf16.msra.mxu0 %v3379_v45 }
 0x198   : > { %3605 = vmatpush.bf16.msra.mxu2 %v3378_v46  ;;  %3606 = vmatpush.bf16.msra.mxu3 %v3378_v46 }
 0x199   : > { %835 = vmatpush.bf16.msra.mxu0 %v3378_v46 }
 0x19c   : > { %3607 = vmatpush.bf16.msra.mxu2 %v3377_v47  ;;  %3608 = vmatpush.bf16.msra.mxu3 %v3377_v47 }
 0x19d   : > { %836 = vmatpush.bf16.msra.mxu0 %v3377_v47 }
 0x1a0   : > { %3609 = vmatpush.bf16.msra.mxu2 %v3376_v48  ;;  %3610 = vmatpush.bf16.msra.mxu3 %v3376_v48 }
 0x1a1   : > { %837 = vmatpush.bf16.msra.mxu0 %v3376_v48 }
 0x1a4   : > { %3611 = vmatpush.bf16.msra.mxu2 %v3375_v49  ;;  %3612 = vmatpush.bf16.msra.mxu3 %v3375_v49 }
 0x1a5   : > { %838 = vmatpush.bf16.msra.mxu0 %v3375_v49 }
 0x1a7   : > { %854 = vmatmul.bf16.vlgmr.msra.gmra.mxu2 %v3370_v50  ;;  %869 = vmatmul.bf16.vlgmr.msra.gmra.mxu3 %v3373_v51 }
 0x1a8   : > { %839 = vmatmul.bf16.vlgmr.msra.gmra.mxu0 %v3367_v52 }
 0x1b7   : > { %859 = vmatmul.bf16.gmra.mxu2 %v3371_v53  ;;  %874 = vmatmul.bf16.gmra.mxu3 %v3374_v54 }
 0x1b8   : > { %844 = vmatmul.bf16.gmra.mxu0 %v3368_v55 }
 0x1c7   : > { %864 = vmatmul.bf16.gmra.mxu2 %v3372_v56 }
 0x1c8   : > { %849 = vmatmul.bf16.gmra.mxu0 %v3369_v57 }
 0x225   : > { %v840_v58 = vpop.f32.mrf.mxu0 }
 0x22a   : > { %v855_v59 = vpop.f32.mrf.mxu2  ;;  %v870_v60 = vpop.f32.mrf.mxu3 }
 0x22d   : > { %v842_v61 = vpop.f32.mrf.mxu0 }
 0x22e   : > { %v3444_v62 = vpack.c.bf16 %v842_v61, %v840_v58 }
 0x230   : > { %3445 = vst [vmem:[#allocation2 + $0x30] sm:$0xff] %v3444_v62  }
 0x232   : > { %v857_v63 = vpop.f32.mrf.mxu2  ;;  %v872_v0 = vpop.f32.mrf.mxu3 }
 0x233   : > { %v3459_v1 = vpack.c.bf16 %v857_v63, %v855_v59  ;;  %v3474_v2 = vpack.c.bf16 %v872_v0, %v870_v60 }
 0x235   : > { %3562 = vst [vmem:[#allocation2 + $0x10] sm:$0xff] %v3459_v1   ;;  %v845_v3 = vpop.f32.mrf.mxu0 }
 0x236   : > { %3565 = vst [vmem:[#allocation2 + $0x28] sm:$0xff] %v3474_v2  }
 0x23a   : > { %v860_v4 = vpop.f32.mrf.mxu2  ;;  %v875_v5 = vpop.f32.mrf.mxu3 }
 0x23d   : > { %v847_v6 = vpop.f32.mrf.mxu0 }
 0x23e   : > { %v3449_v7 = vpack.c.bf16 %v847_v6, %v845_v3 }
 0x240   : > { %3560 = vst [vmem:[#allocation2] sm:$0xff] %v3449_v7  }
 0x242   : > { %v862_v8 = vpop.f32.mrf.mxu2  ;;  %v877_v9 = vpop.f32.mrf.mxu3 }
 0x243   : > { %v3464_v10 = vpack.c.bf16 %v862_v8, %v860_v4  ;;  %v3479_v11 = vpack.c.bf16 %v877_v9, %v875_v5  ;;  %881 = vmatpush.xpose.msra.mxu1 %v877_v9 }
 0x245   : > { %3563 = vst [vmem:[#allocation2 + $0x8] sm:$0xff] %v3464_v10   ;;  %v850_v12 = vpop.f32.mrf.mxu0 }
 0x246   : > { %3566 = vst [vmem:[#allocation2 + $0x38] sm:$0xff] %v3479_v11  }
 0x247   : > { %882 = vmatpush.xpose.msra.mxu1 %v875_v5 }
 0x24a   : > { %v865_v13 = vpop.f32.mrf.mxu2 }
 0x24b   : > { %883 = vmatpush.xpose.msra.mxu1 %v872_v0 }
 0x24d   : > { %v852_v14 = vpop.f32.mrf.mxu0 }
 0x24e   : > { %v3454_v15 = vpack.c.bf16 %v852_v14, %v850_v12 }
 0x24f   : > { %884 = vmatpush.xpose.msra.mxu1 %v870_v60 }
 0x250   : > { %3561 = vst [vmem:[#allocation2 + $0x18] sm:$0xff] %v3454_v15  }
 0x252   : > { %v867_v16 = vpop.f32.mrf.mxu2 }
 0x253   : > { %v3469_v17 = vpack.c.bf16 %v867_v16, %v865_v13  ;;  %885 = vmatpush.xpose.msra.mxu1 %v867_v16 }
 0x255   : > { %3564 = vst [vmem:[#allocation2 + $0x20] sm:$0xff] %v3469_v17  }
 0x257   : > { %886 = vmatpush.xpose.msra.mxu1 %v865_v13 }
 0x25b   : > { %887 = vmatpush.xpose.msra.mxu1 %v862_v8 }
 0x25f   : > { %888 = vmatpush.xpose.msra.mxu1 %v860_v4 }
 0x263   : > { %889 = vmatpush.xpose.msra.mxu1 %v857_v63 }
 0x267   : > { %890 = vmatpush.xpose.msra.mxu1 %v855_v59 }
 0x26b   : > { %891 = vmatpush.xpose.msra.mxu1 %v852_v14 }
 0x26f   : > { %892 = vmatpush.xpose.msra.mxu1 %v850_v12 }
 0x273   : > { %893 = vmatpush.xpose.msra.mxu1 %v847_v6 }
 0x277   : > { %894 = vmatpush.xpose.msra.mxu1 %v845_v3 }
 0x27b   : > { %895 = vmatpush.xpose.msra.mxu1 %v842_v61 }
 0x27f   : > { %896 = vmatpush.xpose.msra.mxu1 %v840_v58 }
 0x282   : > { %897 = vmatmul.f32.vlgmr.msra.gmra.mxu1 %v880_v18 }
 0x2ff   : > { %v898_v19 = vpop.f32.mrf.mxu1 }
 0x300   : > { %901 = vst [vmem:[#allocation4] sm:$0x1] %v898_v19 }
 0x301 PF: > { %v937_v20 = vld [vmem:[%s4985_s5] sm:$0x1]  ;;  %s939_s25 = scalar_select %p458_p4, 1, 0  ;;  %v3482_v23 = vld [vmem:[#allocation2 + $0x30] sm:$0xff]   ;;  %v3568_v24 = vld [vmem:[#allocation2 + $0x18] sm:$0xff]  }
 0x302   : > { %v938_v21 = vld [vmem:[%s4987_s7] sm:$0x1]  ;;  %v3483_v27 = vunpack.c.l.bf16 %v3482_v23  ;;  %v3491_v28 = vunpack.c.l.bf16 %v3568_v24  ;;  %v3484_v34 = vunpack.c.h.bf16 %v3482_v23  ;;  %v3492_v36 = vunpack.c.h.bf16 %v3568_v24  ;;  %v3569_v40 = vld [vmem:[#allocation2 + $0x10] sm:$0xff]   ;;  %v3570_v41 = vld [vmem:[#allocation2 + $0x8] sm:$0xff]  }
 0x303   : > { %v3567_v22 = vld [vmem:[#allocation2] sm:$0xff]   ;;  %v940_v25 = vstv %s939_s25  ;;  %v3495_v42 = vunpack.c.l.bf16 %v3569_v40  ;;  %v3496_v43 = vunpack.c.h.bf16 %v3569_v40  ;;  %v3499_v44 = vunpack.c.l.bf16 %v3570_v41  ;;  %v3572_v55 = vld [vmem:[#allocation2 + $0x28] sm:$0xff]   ;;  %v3573_v56 = vld [vmem:[#allocation2 + $0x38] sm:$0xff]  }
 0x304   : > { %vm941_vm0 = vcmp.eq.s32.totalorder %v940_v25, 1  ;;  %v3487_v26 = vunpack.c.l.bf16 %v3567_v22  ;;  %v3488_v35 = vunpack.c.h.bf16 %v3567_v22  ;;  %v3571_v48 = vld [vmem:[#allocation2 + $0x20] sm:$0xff]   ;;  %v3500_v49 = vunpack.c.h.bf16 %v3570_v41 }
 0x305   : > { %v942_v29 = vsel %vm941_vm0, %v937_v20, %v938_v21  ;;  %v3503_v50 = vunpack.c.l.bf16 %v3571_v48  ;;  %v3504_v51 = vunpack.c.h.bf16 %v3571_v48  ;;  %v3507_v57 = vunpack.c.l.bf16 %v3572_v55 }
 0x306   : > { %v980_v30 = vperm.slane %v942_v29, 0  ;;  %v3508_v58 = vunpack.c.h.bf16 %v3572_v55  ;;  %v3511_v59 = vunpack.c.l.bf16 %v3573_v56  ;;  %v3512_v63 = vunpack.c.h.bf16 %v3573_v56  ;;  %v1426_v55 = vld [vmem:[%s4991_s11 + $0x8] sm:$0xff] }
 0x307   : > { %v3855_v1 = vmov 0   ;;  %vm1030_vm1 = vcmask 7168   ;;  %v1098_v56 = vld [vmem:[#allocation4] sm:$0x1]  ;;  %vm1430_vm3 = vnez %v1426_v55 }
 0x308   : > { %v984_v31 = vmul.f32 %v3487_v26, %v980_v30  ;;  %v982_v32 = vmul.f32 %v3483_v27, %v980_v30  ;;  %v986_v33 = vmul.f32 %v3491_v28, %v980_v30  ;;  %v983_v37 = vmul.f32 %v3484_v34, %v980_v30  ;;  %3693 = vset.pattern.permute.xlu0 %v3855_v1 }
 0x309   : > { %v985_v38 = vmul.f32 %v3488_v35, %v980_v30  ;;  %v987_v39 = vmul.f32 %v3492_v36, %v980_v30  ;;  %v988_v45 = vmul.f32 %v3495_v42, %v980_v30  ;;  %v989_v46 = vmul.f32 %v3496_v43, %v980_v30  ;;  %3691 = vset.pattern.permute.xlu1 %v3855_v1 }
 0x30a   : > { %1002 = vadd.xlane.f32.xlu1 %v984_v31  ;;  %998 = vadd.xlane.f32.xlu0 %v982_v32  ;;  %v990_v47 = vmul.f32 %v3499_v44, %v980_v30  ;;  %v991_v52 = vmul.f32 %v3500_v49, %v980_v30  ;;  %v992_v53 = vmul.f32 %v3503_v50, %v980_v30  ;;  %v1425_v50 = vld [vmem:[%s4991_s11] sm:$0xff] }
 0x30b   : > { %1006 = vadd.xlane.f32.xlu2 %v986_v33  ;;  %v993_v54 = vmul.f32 %v3504_v51, %v980_v30  ;;  %v994_v60 = vmul.f32 %v3507_v57, %v980_v30  ;;  %v995_v61 = vmul.f32 %v3508_v58, %v980_v30  ;;  %v996_v62 = vmul.f32 %v3511_v59, %v980_v30 }
 0x30c   : > { %v997_v0 = vmul.f32 %v3512_v63, %v980_v30  ;;  %3692 = vset.pattern.permute.xlu2 %v3855_v1  ;;  %vm1429_vm2 = vnez %v1425_v50  ;;  %v1434_v57 = vsel %vm1430_vm3, 16843009, %v3855_v1 }
 0x30d   : > { %v1433_v51 = vsel %vm1429_vm2, 16843009, %v3855_v1 }
 0x30e   : > { %v1437_v58 = vunpack.c.0.s8 %v1433_v51  ;;  %v1439_v59 = vunpack.c.2.s8 %v1433_v51 }
 0x312   : > { %1000 = vadd.xlane.f32.xlu0 %v983_v37  ;;  %1004 = vadd.xlane.f32.xlu1 %v985_v38 }
 0x313   : > { %1008 = vadd.xlane.f32.xlu2 %v987_v39 }
 0x31a   : > { %1010 = vadd.xlane.f32.xlu0 %v988_v45  ;;  %1012 = vadd.xlane.f32.xlu1 %v989_v46 }
 0x31b   : > { %1014 = vadd.xlane.f32.xlu2 %v990_v47 }
 0x322   : > { %1016 = vadd.xlane.f32.xlu0 %v991_v52  ;;  %1018 = vadd.xlane.f32.xlu1 %v992_v53  ;;  %v1438_v52 = vunpack.c.1.s8 %v1433_v51 }
 0x323   : > { %1020 = vadd.xlane.f32.xlu2 %v993_v54 }
 0x324   : > { %v1455_v53 = vpack.c.b16 %v1438_v52, %v1438_v52 }
 0x326   : > { %v1456_v54 = vpack.c.b8 %v1455_v53, %v1455_v53 }
 0x328   : > { %vm1486_vm4 = vnez %v1456_v54 }
 0x329   : > { %v1502_v63 = vsel %vm1486_vm4, 16843009, %v3855_v1 }
 0x32a   : > { %1022 = vadd.xlane.f32.xlu0 %v994_v60  ;;  %1024 = vadd.xlane.f32.xlu1 %v995_v61  ;;  %v1442_v60 = vunpack.c.1.s8 %v1434_v57  ;;  %v1131_v61 = vpack.c.bf16 %v1098_v56, %v1098_v56 }
 0x32b   : > { %1026 = vadd.xlane.f32.xlu2 %v996_v62  ;;  %v1453_v62 = vpack.c.b16 %v1437_v58, %v1437_v58 }
 0x332   : > { %1028 = vadd.xlane.f32.xlu0 %v997_v0  ;;  %v1457_v0 = vpack.c.b16 %v1439_v59, %v1439_v59 }
 0x37d   : > { %v1003_v2 = vpop.xlane.xlu1 %1002  ;;  %v999_v3 = vpop.xlane.xlu0 %998 }
 0x37e   : > { %1033 = vst.msk [vmem:[#allocation5 + $0x10] sm:$0xff] %vm1030_vm1, %v1003_v2  ;;  %v1007_v4 = vpop.xlane.xlu2 %1006  ;;  %v3856_v2 = vmov 839922192  }
 0x37f   : > { %1031 = vst.msk [vmem:[#allocation5] sm:$0xff] %vm1030_vm1, %v999_v3  ;;  %v1138_v3 = vunpack.c.l.s4 %v3856_v2 }
 0x380   : > { %1035 = vst.msk [vmem:[#allocation5 + $0x20] sm:$0xff] %vm1030_vm1, %v1007_v4  ;;  %v1463_v4 = vpack.c.b16 %v1442_v60, %v1442_v60 }
 0x385   : > { %v1001_v5 = vpop.xlane.xlu0 %1000  ;;  %v1101_v6 = vld [vmem:[#allocation5 + $0x10] sm:$0xff]  ;;  %v1005_v7 = vpop.xlane.xlu1 %1004 }
 0x386   : > { %1032 = vst.msk [vmem:[#allocation5 + $0x8] sm:$0xff] %vm1030_vm1, %v1001_v5  ;;  %v1117_v8 = vpack.c.bf16 %v1101_v6, %v1101_v6  ;;  %v1099_v9 = vld [vmem:[#allocation5] sm:$0xff]  ;;  %v1009_v10 = vpop.xlane.xlu2 %1008  ;;  %v1277_v5 = vpack.i.b16 %v1131_v61, %v1131_v61  ;;  %v1454_v6 = vpack.c.b8 %v1453_v62, %v1453_v62 }
 0x387   : > { %v1115_v11 = vpack.c.bf16 %v1099_v9, %v1099_v9  ;;  %1036 = vst.msk [vmem:[#allocation5 + $0x28] sm:$0xff] %vm1030_vm1, %v1009_v10  ;;  %v1103_v12 = vld [vmem:[#allocation5 + $0x20] sm:$0xff]  ;;  %v1520_v9 = vunpack.c.1.s8 %v1502_v63  ;;  %v1458_v10 = vpack.c.b8 %v1457_v0, %v1457_v0 }
 0x388   : > { %1152 = vperm.xlu0 %3693, %v1117_v8   ;;  %1034 = vst.msk [vmem:[#allocation5 + $0x18] sm:$0xff] %vm1030_vm1, %v1005_v7  ;;  %v1119_v14 = vpack.c.bf16 %v1103_v12, %v1103_v12  ;;  %v1521_v7 = vunpack.c.0.s8 %v1502_v63  ;;  %v1440_v8 = vunpack.c.3.s8 %v1433_v51  ;;  %v1464_v12 = vpack.c.b8 %v1463_v4, %v1463_v4 }
 0x389   : > { %1134 = vperm.xlu1 %3691, %v1115_v11   ;;  %v4066_v11 = vunpack.c.0.s8 %v1138_v3  ;;  %vm1485_vm5 = vnez %v1454_v6  ;;  %vm1487_vm6 = vnez %v1458_v10 }
 0x38a   : > { %vm1490_vm7 = vnez %v1464_v12 }
 0x38d   : > { %v1011_v13 = vpop.xlane.xlu0 %1010  ;;  %v1100_v15 = vld [vmem:[#allocation5 + $0x8] sm:$0xff]  ;;  %v1013_v16 = vpop.xlane.xlu1 %1012 }
 0x38e   : > { %1037 = vst.msk [vmem:[#allocation5 + $0x30] sm:$0xff] %vm1030_vm1, %v1011_v13  ;;  %v1116_v17 = vpack.c.bf16 %v1100_v15, %v1100_v15  ;;  %v1015_v18 = vpop.xlane.xlu2 %1014  ;;  %v1104_v26 = vld [vmem:[#allocation5 + $0x28] sm:$0xff]  ;;  %v1279_v13 = vperm.slane %v1277_v5, 0  ;;  %v1441_v15 = vunpack.c.0.s8 %v1434_v57 }
 0x38f   : > { %1039 = vst.msk [vmem:[#allocation5 + $0x40] sm:$0xff] %vm1030_vm1, %v1015_v18  ;;  %v1102_v19 = vld [vmem:[#allocation5 + $0x18] sm:$0xff]  ;;  %v1120_v28 = vpack.c.bf16 %v1104_v26, %v1104_v26  ;;  %v4074_v18 = vunpack.i.l.s16 %v1521_v7 }
 0x390   : > { %1143 = vperm.xlu2 %3692, %v1116_v17   ;;  %1038 = vst.msk [vmem:[#allocation5 + $0x38] sm:$0xff] %vm1030_vm1, %v1013_v16  ;;  %v1118_v20 = vpack.c.bf16 %v1102_v19, %v1102_v19  ;;  %v4069_v16 = vunpack.c.l.b16 %v3855_v1  ;;  %v4072_v17 = vunpack.c.h.b16 %v3855_v1  ;;  %v3250_v19 = vunpack.i.l.s16 %v1520_v9 }
 0x391   : > { %1170 = vperm.xlu1 %3691, %v1119_v14   ;;  %v1459_v14 = vpack.c.b16 %v1440_v8, %v1440_v8 }
 0x392   : > { %vm1576_vm9 = vcmp.ne.s32.totalorder %v4074_v18, %v4069_v16  ;;  %vm1577_vm10 = vcmp.ne.s32.totalorder %v3250_v19, %v4072_v17 }
 0x393   : > { %vm4120_vm15 = vmpackc.low %vm1577_vm10, %vm1576_vm9 }
 0x395   : > { %v1017_v21 = vpop.xlane.xlu0 %1016  ;;  %v1105_v22 = vld [vmem:[#allocation5 + $0x30] sm:$0xff]  ;;  %v1019_v23 = vpop.xlane.xlu1 %1018 }
 0x396   : > { %1040 = vst.msk [vmem:[#allocation5 + $0x48] sm:$0xff] %vm1030_vm1, %v1017_v21  ;;  %v1121_v24 = vpack.c.bf16 %v1105_v22, %v1105_v22  ;;  %v1021_v25 = vpop.xlane.xlu2 %1020  ;;  %v1107_v27 = vld [vmem:[#allocation5 + $0x40] sm:$0xff]  ;;  %v1461_v21 = vpack.c.b16 %v1441_v15, %v1441_v15 }
 0x397   : > { %1042 = vst.msk [vmem:[#allocation5 + $0x58] sm:$0xff] %vm1030_vm1, %v1021_v25  ;;  %v1123_v30 = vpack.c.bf16 %v1107_v27, %v1107_v27  ;;  %v1106_v35 = vld [vmem:[#allocation5 + $0x38] sm:$0xff]  ;;  %v1503_v27 = vsel %vm1487_vm6, 16843009, %v3855_v1 }
 0x398   : > { %1161 = vperm.xlu2 %3692, %v1118_v20   ;;  %1041 = vst.msk [vmem:[#allocation5 + $0x50] sm:$0xff] %vm1030_vm1, %v1019_v23  ;;  %v1122_v37 = vpack.c.bf16 %v1106_v35, %v1106_v35  ;;  %v1460_v20 = vpack.c.b8 %v1459_v14, %v1459_v14  ;;  %v1501_v23 = vsel %vm1485_vm5, 16843009, %v3855_v1  ;;  %v1462_v26 = vpack.c.b8 %v1461_v21, %v1461_v21 }
 0x399   : > { %1188 = vperm.xlu1 %3691, %v1121_v24   ;;  %v4077_v24 = vunpack.c.l.bf16 %v1279_v13 }
 0x39a   : > { %vm1488_vm8 = vnez %v1460_v20  ;;  %vm1489_vm11 = vnez %v1462_v26 }
 0x39d   : > { %v1023_v29 = vpop.xlane.xlu0 %1022  ;;  %v1108_v31 = vld [vmem:[#allocation5 + $0x48] sm:$0xff]  ;;  %v1025_v32 = vpop.xlane.xlu1 %1024 }
 0x39e   : > { %1043 = vst.msk [vmem:[#allocation5 + $0x60] sm:$0xff] %vm1030_vm1, %v1023_v29  ;;  %v1124_v33 = vpack.c.bf16 %v1108_v31, %v1108_v31  ;;  %v1027_v34 = vpop.xlane.xlu2 %1026  ;;  %v1110_v36 = vld [vmem:[#allocation5 + $0x58] sm:$0xff]  ;;  %v1444_v29 = vunpack.c.3.s8 %v1434_v57 }
 0x39f   : > { %1045 = vst.msk [vmem:[#allocation5 + $0x70] sm:$0xff] %vm1030_vm1, %v1027_v34  ;;  %v1126_v39 = vpack.c.bf16 %v1110_v36, %v1110_v36  ;;  %v1109_v42 = vld [vmem:[#allocation5 + $0x50] sm:$0xff]  ;;  %v1506_v34 = vsel %vm1490_vm7, 16843009, %v3855_v1  ;;  %v1443_v36 = vunpack.c.2.s8 %v1434_v57 }
 0x3a0   : > { %1179 = vperm.xlu2 %3692, %v1120_v28   ;;  %1215 = vperm.xlu0 %3693, %v1124_v33   ;;  %1044 = vst.msk [vmem:[#allocation5 + $0x68] sm:$0xff] %vm1030_vm1, %v1025_v32  ;;  %v1125_v44 = vpack.c.bf16 %v1109_v42, %v1109_v42  ;;  %v1504_v28 = vsel %vm1488_vm8, 16843009, %v3855_v1  ;;  %v1517_v32 = vunpack.c.1.s8 %v1501_v23  ;;  %v1518_v33 = vunpack.c.0.s8 %v1501_v23 }
 0x3a1   : > { %1206 = vperm.xlu1 %3691, %v1123_v30   ;;  %v1427_v30 = vld [vmem:[%s4991_s11 + $0x10] sm:$0xff]  ;;  %v1467_v35 = vpack.c.b16 %v1444_v29, %v1444_v29 }
 0x3a2   : > { %vm1431_vm12 = vnez %v1427_v30  ;;  %v4094_v50 = vunpack.i.l.s16 %v1518_v33  ;;  %v4096_v51 = vunpack.i.l.s16 %v1517_v32 }
 0x3a3   : > { %v1468_v42 = vpack.c.b8 %v1467_v35, %v1467_v35 }
 0x3a4   : > { %vm1569_vm6 = vcmp.ne.s32.totalorder %v4094_v50, %v4069_v16  ;;  %vm1570_vm7 = vcmp.ne.s32.totalorder %v4096_v51, %v4072_v17 }
 0x3a5   : > { %v1029_v38 = vpop.xlane.xlu0 %1028  ;;  %v1111_v40 = vld [vmem:[#allocation5 + $0x60] sm:$0xff]  ;;  %vm1492_vm13 = vnez %v1468_v42 }
 0x3a6   : > { %1046 = vst.msk [vmem:[#allocation5 + $0x78] sm:$0xff] %vm1030_vm1, %v1029_v38  ;;  %v1127_v41 = vpack.c.bf16 %v1111_v40, %v1111_v40  ;;  %v1113_v43 = vld [vmem:[#allocation5 + $0x70] sm:$0xff]  ;;  %v1523_v38 = vunpack.c.1.s8 %v1503_v27  ;;  %v1526_v40 = vunpack.c.1.s8 %v1504_v28  ;;  %v1508_v4 = vsel %vm1492_vm13, 16843009, %v3855_v1 }
 0x3a7   : > { %v1129_v45 = vpack.c.bf16 %v1113_v43, %v1113_v43  ;;  %v1112_v48 = vld [vmem:[#allocation5 + $0x68] sm:$0xff]  ;;  %v1465_v43 = vpack.c.b16 %v1443_v36, %v1443_v36  ;;  %v1538_v21 = vunpack.c.1.s8 %v1508_v4  ;;  %v1539_v32 = vunpack.c.0.s8 %v1508_v4  ;;  %v1428_v4 = vld [vmem:[%s4991_s11 + $0x18] sm:$0xff] }
 0x3a8   : > { %1197 = vperm.xlu2 %3692, %v1122_v37   ;;  %1242 = vperm.xlu0 %3693, %v1127_v41   ;;  %v1128_v49 = vpack.c.bf16 %v1112_v48, %v1112_v48  ;;  %v1527_v41 = vunpack.c.0.s8 %v1504_v28  ;;  %v1533_v48 = vunpack.c.0.s8 %v1506_v34  ;;  %v4102_v57 = vunpack.i.l.s16 %v1523_v38 }
 0x3a9   : > { %1233 = vperm.xlu1 %3691, %v1126_v39   ;;  %v1524_v39 = vunpack.c.0.s8 %v1503_v27  ;;  %v1466_v52 = vpack.c.b8 %v1465_v43, %v1465_v43  ;;  %v4106_v59 = vunpack.i.l.s16 %v1526_v40 }
 0x3aa   : > { %v4104_v58 = vunpack.i.l.s16 %v1527_v41  ;;  %v4108_v2 = vunpack.i.l.s16 %v1533_v48  ;;  %vm1584_vm5 = vcmp.ne.s32.totalorder %v4102_v57, %v4072_v17  ;;  %v4162_v48 = vunpack.i.l.s16 %v1538_v21 }
 0x3ab   : > { %v4100_v56 = vunpack.i.l.s16 %v1524_v39  ;;  %vm1491_vm14 = vnez %v1466_v52  ;;  %vm1591_vm2 = vcmp.ne.s32.totalorder %v4106_v59, %v4072_v17 }
 0x3ac   : > { %vm1590_vm0 = vcmp.ne.s32.totalorder %v4104_v58, %v4069_v16  ;;  %v1507_v12 = vsel %vm1491_vm14, 16843009, %v3855_v1  ;;  %vm1604_vm8 = vcmp.ne.s32.totalorder %v4108_v2, %v4069_v16  ;;  %vm1432_vm14 = vnez %v1428_v4 }
 0x3ad   : > { %v1114_v46 = vld [vmem:[#allocation5 + $0x78] sm:$0xff]  ;;  %v1536_v33 = vunpack.c.0.s8 %v1507_v12  ;;  %vm1583_vm4 = vcmp.ne.s32.totalorder %v4100_v56, %v4069_v16  ;;  %v1535_v39 = vunpack.c.1.s8 %v1507_v12 }
 0x3ae   : > { %v1130_v47 = vpack.c.bf16 %v1114_v46, %v1114_v46  ;;  %v1505_v46 = vsel %vm1489_vm11, 16843009, %v3855_v1  ;;  %vm1592_vm11 = vmpackc.low %vm1591_vm2, %vm1590_vm0  ;;  %vm1619_vm0 = vcmp.ne.s32.totalorder %v4162_v48, %v4072_v17 }
 0x3af   : > { %v1529_v60 = vunpack.c.1.s8 %v1505_v46  ;;  %v1530_v0 = vunpack.c.0.s8 %v1505_v46 }
 0x3b0   : > { %1224 = vperm.xlu2 %3692, %v1125_v44   ;;  %1269 = vperm.xlu0 %3693, %v1130_v47   ;;  %v4091_v44 = vsel %vm1431_vm12, 16843009, %v3855_v1  ;;  %v1532_v47 = vunpack.c.1.s8 %v1506_v34 }
 0x3b1   : > { %1260 = vperm.xlu1 %3691, %v1129_v45   ;;  %v1447_v53 = vunpack.c.2.s8 %v4091_v44  ;;  %v1445_v8 = vunpack.c.0.s8 %v4091_v44  ;;  %v4128_v10 = vunpack.i.l.s16 %v1529_v60  ;;  %v4131_v20 = vunpack.i.l.s16 %v1530_v0 }
 0x3b2   : > { %v4110_v3 = vunpack.i.l.s16 %v1532_v47  ;;  %v1446_v23 = vunpack.c.1.s8 %v4091_v44  ;;  %v4160_v47 = vunpack.i.l.s16 %v1539_v32 }
 0x3b3   : > { %v1473_v63 = vpack.c.b16 %v1447_v53, %v1447_v53  ;;  %v1469_v15 = vpack.c.b16 %v1445_v8, %v1445_v8  ;;  %vm1597_vm12 = vcmp.ne.s32.totalorder %v4131_v20, %v4069_v16  ;;  %vm1598_vm13 = vcmp.ne.s32.totalorder %v4128_v10, %v4072_v17 }
 0x3b4   : > { %v1471_v41 = vpack.c.b16 %v1446_v23, %v1446_v23  ;;  %vm1605_vm9 = vcmp.ne.s32.totalorder %v4110_v3, %v4072_v17 }
 0x3b5   : > { %v1474_v7 = vpack.c.b8 %v1473_v63, %v1473_v63  ;;  %v4169_v63 = vunpack.i.l.s16 %v1535_v39 }
 0x3b6   : > { %v1472_v0 = vpack.c.b8 %v1471_v41, %v1471_v41 }
 0x3b7   : > { %vm1495_vm3 = vnez %v1474_v7 }
 0x3b8   : > { %1251 = vperm.xlu2 %3692, %v1128_v49   ;;  %vm1494_vm2 = vnez %v1472_v0 }
 0x3ea   : > { %v1144_v22 = vpop.permute.xlu2 %1143 }
 0x3eb   : > { %v1149_v25 = vperm.slane %v1144_v22, %v4066_v11  ;;  %v1511_v22 = vsel %vm1495_vm3, 16843009, %v3855_v1  ;;  %vm4206_vm3 = vmpackc.low %vm1584_vm5, %vm1583_vm4 }
 0x3ec   : > { %v1548_v40 = vunpack.c.0.s8 %v1511_v22  ;;  %vm1606_vm4 = vmpackc.low %vm1605_vm9, %vm1604_vm8 }
 0x3ed   : > { %v1281_v31 = vunpack.c.l.bf16 %v1149_v25  ;;  %vm4271_vm9 = vmpackc.low %vm1598_vm13, %vm1597_vm12 }
 0x3ee   : > { %v4181_v9 = vunpack.i.l.s16 %v1548_v40 }
 0x3ef   : > { %v1298_v37 = vadd.f32 %v4077_v24, %v1281_v31 }
 0x3f1   : > { %v1314_v45 = vpack.c.bf16 %v1298_v37, %v1298_v37  ;;  %v1470_v37 = vpack.c.b8 %v1469_v15, %v1469_v15 }
 0x3f2   : > { %v1162_v49 = vpop.permute.xlu2 %1161 }
 0x3f3   : > { %v1330_v54 = vunpack.c.l.bf16 %v1314_v45  ;;  %v1167_v55 = vperm.slane %v1162_v49, %v4066_v11  ;;  %vm1493_vm10 = vnez %v1470_v37  ;;  %v1547_v49 = vunpack.c.1.s8 %v1511_v22 }
 0x3f5   : > { %v1346_v61 = vmul.f32 0.20019531, %v1330_v54  ;;  %v1283_v62 = vunpack.c.l.bf16 %v1167_v55  ;;  %v4167_v55 = vsel %vm1493_vm10, 16843009, %v3855_v1  ;;  %vm4220_vm10 = vmpackc.low %vm1570_vm7, %vm1569_vm6  ;;  %vm1612_vm6 = vcmp.ne.s32.totalorder %v4169_v63, %v4072_v17 }
 0x3f6   : > { %v1541_v15 = vunpack.c.1.s8 %v4167_v55  ;;  %vm1639_vm7 = vcmp.ne.s32.totalorder %v4181_v9, %v4069_v16 }
 0x3f7   : > { %v1300_v5 = vadd.f32 %v4077_v24, %v1283_v62  ;;  %v1394_v6 = vmax.f32 %v1330_v54, %v1346_v61  ;;  %v4164_v54 = vunpack.i.l.s16 %v1536_v33  ;;  %v1510_v33 = vsel %vm1494_vm2, 16843009, %v3855_v1 }
 0x3f8   : > { %v1544_v50 = vunpack.c.1.s8 %v1510_v33  ;;  %v1545_v51 = vunpack.c.0.s8 %v1510_v33 }
 0x3f9   : > { %v1316_v13 = vpack.c.bf16 %v1300_v5, %v1300_v5  ;;  %v1410_v14 = vpack.c.bf16 %v1394_v6, %v1394_v6  ;;  %vm1611_vm5 = vcmp.ne.s32.totalorder %v4164_v54, %v4069_v16 }
 0x3fa   : > { %v1180_v18 = vpop.permute.xlu2 %1179  ;;  %v1153_v19 = vpop.permute.xlu0 %1152  ;;  %v4288_v10 = vunpack.i.l.s16 %v1544_v50  ;;  %vm4326_vm2 = vmpackc.low %vm1612_vm6, %vm1611_vm5 }
 0x3fb   : > { %v1332_v25 = vunpack.c.l.bf16 %v1316_v13  ;;  %v1135_v26 = vpop.permute.xlu1 %1134  ;;  %v1185_v27 = vperm.slane %v1180_v18, %v4066_v11  ;;  %v1158_v28 = vperm.slane %v1153_v19, %v4066_v11  ;;  %v4139_v29 = vsel %vm4120_vm15, %v1410_v14, 4048220490 }
 0x3fc   : > { %v1140_v30 = vperm.slane %v1135_v26, %v4066_v11  ;;  %v1710_v31 = vunpack.c.l.bf16 %v4139_v29  ;;  %v4184_v14 = vunpack.i.l.s16 %v1547_v49  ;;  %vm1618_vm15 = vcmp.ne.s32.totalorder %v4160_v47, %v4069_v16 }
 0x3fd   : > { %v1348_v34 = vmul.f32 0.20019531, %v1332_v25  ;;  %v1285_v35 = vunpack.c.l.bf16 %v1185_v27  ;;  %v1282_v36 = vunpack.c.l.bf16 %v1158_v28  ;;  %v1542_v27 = vunpack.c.0.s8 %v4167_v55 }
 0x3fe   : > { %v1280_v38 = vunpack.c.l.bf16 %v1140_v30  ;;  %1727 = vmax.xlane.f32.xlu1 %v1710_v31  ;;  %vm1640_vm8 = vcmp.ne.s32.totalorder %v4184_v14, %v4072_v17  ;;  %vm1633_vm13 = vcmp.ne.s32.totalorder %v4288_v10, %v4072_v17 }
 0x3ff   : > { %v1302_v42 = vadd.f32 %v4077_v24, %v1285_v35  ;;  %v1299_v43 = vadd.f32 %v4077_v24, %v1282_v36  ;;  %v1396_v45 = vmax.f32 %v1332_v25, %v1348_v34  ;;  %v4212_v34 = vsel %vm1432_vm14, 16843009, %v3855_v1 }
 0x400   : > { %v1297_v46 = vadd.f32 %v4077_v24, %v1280_v38  ;;  %v4256_v4 = vunpack.i.l.s16 %v1542_v27 }
 0x401   : > { %v1318_v52 = vpack.c.bf16 %v1302_v42, %v1302_v42  ;;  %v1315_v53 = vpack.c.bf16 %v1299_v43, %v1299_v43  ;;  %v1412_v62 = vpack.c.bf16 %v1396_v45, %v1396_v45 }
 0x402   : > { %v1313_v60 = vpack.c.bf16 %v1297_v46, %v1297_v46  ;;  %v1198_v61 = vpop.permute.xlu2 %1197  ;;  %v1450_v46 = vunpack.c.1.s8 %v4212_v34  ;;  %vm1625_vm14 = vcmp.ne.s32.totalorder %v4256_v4, %v4069_v16 }
 0x403   : > { %v1334_v5 = vunpack.c.l.bf16 %v1318_v52  ;;  %v1331_v6 = vunpack.c.l.bf16 %v1315_v53  ;;  %v1171_v7 = vpop.permute.xlu1 %1170  ;;  %v1203_v8 = vperm.slane %v1198_v61, %v4066_v11  ;;  %v4191_v22 = vsel %vm1592_vm11, %v1412_v62, 4048220490  ;;  %vm4284_vm11 = vmpackc.low %vm1619_vm0, %vm1618_vm15 }
 0x404   : > { %v1329_v12 = vunpack.c.l.bf16 %v1313_v60  ;;  %v1176_v13 = vperm.slane %v1171_v7, %v4066_v11  ;;  %v1712_v36 = vunpack.c.l.bf16 %v4191_v22 }
 0x405   : > { %v1350_v18 = vmul.f32 0.20019531, %v1334_v5  ;;  %v1347_v19 = vmul.f32 0.20019531, %v1331_v6  ;;  %v1287_v21 = vunpack.c.l.bf16 %v1203_v8  ;;  %v1479_v8 = vpack.c.b16 %v1450_v46, %v1450_v46 }
 0x406   : > { %v1345_v58 = vmul.f32 0.20019531, %v1329_v12  ;;  %v1284_v59 = vunpack.c.l.bf16 %v1176_v13 }
 0x407   : > { %v1304_v23 = vadd.f32 %v4077_v24, %v1287_v21  ;;  %v1395_v25 = vmax.f32 %v1331_v6, %v1347_v19  ;;  %v1398_v26 = vmax.f32 %v1334_v5, %v1350_v18  ;;  %v4258_v5 = vunpack.i.l.s16 %v1541_v15 }
 0x408   : > { %v1301_v28 = vadd.f32 %v4077_v24, %v1284_v59  ;;  %v1393_v30 = vmax.f32 %v1329_v12, %v1345_v58  ;;  %v1448_v12 = vunpack.c.3.s8 %v4091_v44  ;;  %v4276_v21 = vunpack.i.l.s16 %v1545_v51 }
 0x409   : > { %v1320_v35 = vpack.c.bf16 %v1304_v23, %v1304_v23  ;;  %v1411_v57 = vpack.c.bf16 %v1395_v25, %v1395_v25  ;;  %v1414_v37 = vpack.c.bf16 %v1398_v26, %v1398_v26  ;;  %v1480_v20 = vpack.c.b8 %v1479_v8, %v1479_v8 }
 0x40a   : > { %v1317_v38 = vpack.c.bf16 %v1301_v28, %v1301_v28  ;;  %v1225_v39 = vpop.permute.xlu2 %1224  ;;  %v1409_v40 = vpack.c.bf16 %v1393_v30, %v1393_v30  ;;  %v1475_v28 = vpack.c.b16 %v1448_v12, %v1448_v12  ;;  %v1449_v30 = vunpack.c.0.s8 %v4212_v34 }
 0x40b   : > { %v1336_v41 = vunpack.c.l.bf16 %v1320_v35  ;;  %v1230_v42 = vperm.slane %v1225_v39, %v4066_v11  ;;  %v1189_v43 = vpop.permute.xlu1 %1188  ;;  %v4234_v45 = vsel %vm4206_vm3, %v1411_v57, 4048220490  ;;  %v4244_v61 = vsel %vm1606_vm4, %v1414_v37, 4048220490  ;;  %vm1641_vm3 = vmpackc.low %vm1640_vm8, %vm1639_vm7 }
 0x40c   : > { %v1333_v49 = vunpack.c.l.bf16 %v1317_v38  ;;  %v1194_v52 = vperm.slane %v1189_v43, %v4066_v11  ;;  %v4240_v2 = vsel %vm4220_vm10, %v1409_v40, 4048220490  ;;  %v1711_v3 = vunpack.c.l.bf16 %v4234_v45 }
 0x40d   : > { %v1352_v53 = vmul.f32 0.20019531, %v1336_v41  ;;  %v1290_v55 = vunpack.c.l.bf16 %v1230_v42  ;;  %v1709_v60 = vunpack.c.l.bf16 %v4240_v2  ;;  %v1714_v19 = vunpack.c.l.bf16 %v4244_v61 }
 0x40e   : > { %v1349_v62 = vmul.f32 0.20019531, %v1333_v49  ;;  %v1286_v0 = vunpack.c.l.bf16 %v1194_v52  ;;  %1729 = vmax.xlane.f32.xlu0 %v1711_v3  ;;  %v1451_v35 = vunpack.c.2.s8 %v4212_v34  ;;  %vm1632_vm12 = vcmp.ne.s32.totalorder %v4276_v21, %v4069_v16 }
 0x40f   : > { %v1307_v6 = vadd.f32 %v4077_v24, %v1290_v55  ;;  %1725 = vmax.xlane.f32.xlu2 %v1709_v60  ;;  %v1400_v7 = vmax.f32 %v1336_v41, %v1352_v53  ;;  %vm1626_vm15 = vcmp.ne.s32.totalorder %v4258_v5, %v4072_v17  ;;  %vm1498_vm0 = vnez %v1480_v20  ;;  %vm4369_vm6 = vmpackc.low %vm1633_vm13, %vm1632_vm12 }
 0x410   : > { %v1303_v13 = vadd.f32 %v4077_v24, %v1286_v0  ;;  %v1397_v18 = vmax.f32 %v1333_v49, %v1349_v62  ;;  %v1476_v43 = vpack.c.b8 %v1475_v28, %v1475_v28  ;;  %v1514_v53 = vsel %vm1498_vm0, 16843009, %v3855_v1  ;;  %vm4380_vm7 = vmpackc.low %vm1626_vm15, %vm1625_vm14 }
 0x411   : > { %v1323_v58 = vpack.c.bf16 %v1307_v6, %v1307_v6  ;;  %v1416_v59 = vpack.c.bf16 %v1400_v7, %v1400_v7  ;;  %v1556_v6 = vunpack.c.1.s8 %v1514_v53  ;;  %v1557_v7 = vunpack.c.0.s8 %v1514_v53 }
 0x412   : > { %v1319_v23 = vpack.c.bf16 %v1303_v13, %v1303_v13  ;;  %v1252_v25 = vpop.permute.xlu2 %1251  ;;  %v1216_v26 = vpop.permute.xlu0 %1215  ;;  %v1413_v27 = vpack.c.bf16 %v1397_v18, %v1397_v18  ;;  %vm4338_vm10 = vnez %v1476_v43 }
 0x413   : > { %v1339_v32 = vunpack.c.l.bf16 %v1323_v58  ;;  %v1257_v47 = vperm.slane %v1252_v25, %v4066_v11  ;;  %v1207_v33 = vpop.permute.xlu1 %1206  ;;  %v1221_v48 = vperm.slane %v1216_v26, %v4066_v11  ;;  %v4301_v38 = vsel %vm4284_vm11, %v1416_v59, 4048220490 }
 0x414   : > { %v1335_v56 = vunpack.c.l.bf16 %v1319_v23  ;;  %v1212_v57 = vperm.slane %v1207_v33, %v4066_v11  ;;  %v4297_v37 = vsel %vm4271_vm9, %v1413_v27, 4048220490  ;;  %v4993_v13 = vunpack.c.l.bf16 %v4301_v38 }
 0x415   : > { %v1355_v39 = vmul.f32 0.20019531, %v1339_v32  ;;  %v1293_v40 = vunpack.c.l.bf16 %v1257_v47  ;;  %v1289_v50 = vunpack.c.l.bf16 %v1221_v48  ;;  %v1713_v51 = vunpack.c.l.bf16 %v4297_v37 }
 0x416   : > { %v1351_v41 = vmul.f32 0.20019531, %v1335_v56  ;;  %v1288_v42 = vunpack.c.l.bf16 %v1212_v57  ;;  %v3273_v58 = vunpack.i.l.s16 %v1557_v7  ;;  %v3274_v59 = vunpack.i.l.s16 %v1556_v6 }
 0x417   : > { %v1310_v46 = vadd.f32 %v4077_v24, %v1293_v40  ;;  %v1306_v49 = vadd.f32 %v4077_v24, %v1289_v50  ;;  %1731 = vmax.xlane.f32.xlu2 %v1712_v36  ;;  %1733 = vmax.xlane.f32.xlu1 %v1713_v51  ;;  %v1403_v52 = vmax.f32 %v1339_v32, %v1355_v39 }
 0x418   : > { %v1305_v55 = vadd.f32 %v4077_v24, %v1288_v42  ;;  %v1399_v62 = vmax.f32 %v1335_v56, %v1351_v41  ;;  %vm1660_vm4 = vcmp.ne.s32.totalorder %v3273_v58, %v4069_v16  ;;  %vm1661_vm5 = vcmp.ne.s32.totalorder %v3274_v59, %v4072_v17 }
 0x419   : > { %v1326_v8 = vpack.c.bf16 %v1310_v46, %v1310_v46  ;;  %v1322_v12 = vpack.c.bf16 %v1306_v49, %v1306_v49  ;;  %v1419_v18 = vpack.c.bf16 %v1403_v52, %v1403_v52  ;;  %v1512_v41 = vsel %vm4338_vm10, 16843009, %v3855_v1  ;;  %vm1662_vm8 = vmpackc.low %vm1661_vm5, %vm1660_vm4 }
 0x41a   : > { %v1321_v54 = vpack.c.bf16 %v1305_v55, %v1305_v55  ;;  %v1243_v63 = vpop.permute.xlu0 %1242  ;;  %v1415_v15 = vpack.c.bf16 %v1399_v62, %v1399_v62  ;;  %v1550_v49 = vunpack.c.1.s8 %v1512_v41  ;;  %v1551_v52 = vunpack.c.0.s8 %v1512_v41 }
 0x41b   : > { %v1342_v44 = vunpack.c.l.bf16 %v1326_v8  ;;  %v1338_v20 = vunpack.c.l.bf16 %v1322_v12  ;;  %v1234_v23 = vpop.permute.xlu1 %1233  ;;  %v1248_v25 = vperm.slane %v1243_v63, %v4066_v11  ;;  %v4347_v28 = vsel %vm1641_vm3, %v1419_v18, 4048220490 }
 0x41c   : > { %v1337_v27 = vunpack.c.l.bf16 %v1321_v54  ;;  %v1239_v9 = vperm.slane %v1234_v23, %v4066_v11  ;;  %v4345_v14 = vsel %vm4326_vm2, %v1415_v15, 4048220490  ;;  %v4996_v55 = vunpack.c.l.bf16 %v4347_v28 }
 0x41d   : > { %v1358_v32 = vmul.f32 0.20019531, %v1342_v44  ;;  %v1354_v47 = vmul.f32 0.20019531, %v1338_v20  ;;  %v1292_v33 = vunpack.c.l.bf16 %v1248_v25  ;;  %v4994_v48 = vunpack.c.l.bf16 %v4345_v14 }
 0x41e   : > { %v1353_v56 = vmul.f32 0.20019531, %v1337_v27  ;;  %v1291_v57 = vunpack.c.l.bf16 %v1239_v9  ;;  %v3269_v8 = vunpack.i.l.s16 %v1551_v52  ;;  %v3270_v12 = vunpack.i.l.s16 %v1550_v49 }
 0x41f   : > { %v1309_v39 = vadd.f32 %v4077_v24, %v1292_v33  ;;  %1735 = vmax.xlane.f32.xlu2 %v1714_v19  ;;  %1739 = vmax.xlane.f32.xlu1 %v4993_v13  ;;  %v1402_v40 = vmax.f32 %v1338_v20, %v1354_v47  ;;  %v1406_v50 = vmax.f32 %v1342_v44, %v1358_v32  ;;  %v1452_v33 = vunpack.c.3.s8 %v4212_v34 }
 0x420   : > { %v1308_v42 = vadd.f32 %v4077_v24, %v1291_v57  ;;  %1737 = vmax.xlane.f32.xlu0 %v4994_v48  ;;  %v1401_v43 = vmax.f32 %v1337_v27, %v1353_v56  ;;  %v1477_v63 = vpack.c.b16 %v1449_v30, %v1449_v30  ;;  %vm1646_vm9 = vcmp.ne.s32.totalorder %v3269_v8, %v4069_v16 }
 0x421   : > { %v1325_v53 = vpack.c.bf16 %v1309_v39, %v1309_v39  ;;  %v1418_v10 = vpack.c.bf16 %v1402_v40, %v1402_v40  ;;  %v1422_v62 = vpack.c.bf16 %v1406_v50, %v1406_v50  ;;  %vm1647_vm11 = vcmp.ne.s32.totalorder %v3270_v12, %v4072_v17 }
 0x422   : > { %v1324_v0 = vpack.c.bf16 %v1308_v42, %v1308_v42  ;;  %v1270_v6 = vpop.permute.xlu0 %1269  ;;  %v1417_v7 = vpack.c.bf16 %v1401_v43, %v1401_v43  ;;  %v1478_v47 = vpack.c.b8 %v1477_v63, %v1477_v63  ;;  %v1481_v39 = vpack.c.b16 %v1451_v35, %v1451_v35  ;;  %vm4420_vm12 = vmpackc.low %vm1647_vm11, %vm1646_vm9 }
 0x423   : > { %v1341_v4 = vunpack.c.l.bf16 %v1325_v53  ;;  %v1261_v18 = vpop.permute.xlu1 %1260  ;;  %v1275_v5 = vperm.slane %v1270_v6, %v4066_v11  ;;  %v4391_v54 = vsel %vm4369_vm6, %v1418_v10, 4048220490  ;;  %v4403_v26 = vsel %vm1662_vm8, %v1422_v62, 4048220490 }
 0x424   : > { %v1340_v15 = vunpack.c.l.bf16 %v1324_v0  ;;  %v1266_v58 = vperm.slane %v1261_v18, %v4066_v11  ;;  %v4399_v59 = vsel %vm4380_vm7, %v1417_v7, 4048220490  ;;  %v1718_v44 = vunpack.c.l.bf16 %v4391_v54 }
 0x425   : > { %v1357_v20 = vmul.f32 0.20019531, %v1341_v4  ;;  %v1295_v23 = vunpack.c.l.bf16 %v1275_v5  ;;  %v5001_v25 = vunpack.c.l.bf16 %v4399_v59  ;;  %v5000_v50 = vunpack.c.l.bf16 %v4403_v26 }
 0x426   : > { %v1356_v27 = vmul.f32 0.20019531, %v1340_v15  ;;  %v1294_v9 = vunpack.c.l.bf16 %v1266_v58  ;;  %vm1497_vm13 = vnez %v1478_v47  ;;  %v1483_v42 = vpack.c.b16 %v1452_v33, %v1452_v33 }
 0x427   : > { %v1312_v30 = vadd.f32 %v4077_v24, %v1295_v23  ;;  %1745 = vmax.xlane.f32.xlu1 %v4996_v55  ;;  %1741 = vmax.xlane.f32.xlu2 %v5001_v25  ;;  %v1405_v32 = vmax.f32 %v1341_v4, %v1357_v20  ;;  %v3857_v43 = vmov -1e+30   ;;  %v1513_v49 = vsel %vm1497_vm13, 16843009, %v3855_v1 }
 0x428   : > { %v1311_v56 = vadd.f32 %v4077_v24, %v1294_v9  ;;  %1743 = vmax.xlane.f32.xlu0 %v1718_v44  ;;  %v1404_v57 = vmax.f32 %v1340_v15, %v1356_v27  ;;  %1048 = vst.msk [vmem:[#allocation6 + $0x8] sm:$0xff] %vm1030_vm1, %v3857_v43  ;;  %v1482_v34 = vpack.c.b8 %v1481_v39, %v1481_v39  ;;  %v1553_v52 = vunpack.c.1.s8 %v1513_v49 }
 0x429   : > { %v1328_v40 = vpack.c.bf16 %v1312_v30, %v1312_v30  ;;  %1047 = vst.msk [vmem:[#allocation6] sm:$0xff] %vm1030_vm1, %v3857_v43  ;;  %v1554_v53 = vunpack.c.0.s8 %v1513_v49  ;;  %v1484_v21 = vpack.c.b8 %v1483_v42, %v1483_v42  ;;  %v1421_v0 = vpack.c.bf16 %v1405_v32, %v1405_v32 }
 0x42a   : > { %v1327_v24 = vpack.c.bf16 %v1311_v56, %v1311_v56  ;;  %v1420_v46 = vpack.c.bf16 %v1404_v57, %v1404_v57  ;;  %1049 = vst.msk [vmem:[#allocation6 + $0x10] sm:$0xff] %vm1030_vm1, %v3857_v43  ;;  %vm1499_vm14 = vnez %v1482_v34  ;;  %v3272_v12 = vunpack.i.l.s16 %v1553_v52 }
 0x42b   : > { %v1344_v35 = vunpack.c.l.bf16 %v1328_v40  ;;  %1050 = vst.msk [vmem:[#allocation6 + $0x18] sm:$0xff] %vm1030_vm1, %v3857_v43  ;;  %v3271_v8 = vunpack.i.l.s16 %v1554_v53  ;;  %v1515_v18 = vsel %vm1499_vm14, 16843009, %v3855_v1  ;;  %vm1500_vm15 = vnez %v1484_v21 }
 0x42c   : > { %v1343_v10 = vunpack.c.l.bf16 %v1327_v24  ;;  %v4433_v62 = vsel %vm4420_vm12, %v1420_v46, 4048220490  ;;  %1051 = vst.msk [vmem:[#allocation6 + $0x20] sm:$0xff] %vm1030_vm1, %v3857_v43  ;;  %vm1654_vm2 = vcmp.ne.s32.totalorder %v3272_v12, %v4072_v17  ;;  %v1559_v5 = vunpack.c.1.s8 %v1515_v18 }
 0x42d   : > { %v1360_v6 = vmul.f32 0.20019531, %v1344_v35  ;;  %v4995_v7 = vunpack.c.l.bf16 %v4433_v62  ;;  %1052 = vst.msk [vmem:[#allocation6 + $0x28] sm:$0xff] %vm1030_vm1, %v3857_v43  ;;  %vm1653_vm0 = vcmp.ne.s32.totalorder %v3271_v8, %v4069_v16  ;;  %v1560_v63 = vunpack.c.0.s8 %v1515_v18 }
 0x42e   : > { %v1359_v4 = vmul.f32 0.20019531, %v1343_v10  ;;  %1053 = vst.msk [vmem:[#allocation6 + $0x30] sm:$0xff] %vm1030_vm1, %v3857_v43  ;;  %vm1655_vm3 = vmpackc.low %vm1654_vm2, %vm1653_vm0  ;;  %v1516_v20 = vsel %vm1500_vm15, 16843009, %v3855_v1  ;;  %v3276_v9 = vunpack.i.l.s16 %v1559_v5 }
 0x42f   : > { %1751 = vmax.xlane.f32.xlu1 %v5000_v50  ;;  %1747 = vmax.xlane.f32.xlu2 %v4995_v7  ;;  %v1408_v58 = vmax.f32 %v1344_v35, %v1360_v6  ;;  %1054 = vst.msk [vmem:[#allocation6 + $0x38] sm:$0xff] %vm1030_vm1, %v3857_v43  ;;  %v4454_v23 = vsel %vm1655_vm3, %v1421_v0, 4048220490  ;;  %v3275_v27 = vunpack.i.l.s16 %v1560_v63  ;;  %v1562_v30 = vunpack.c.1.s8 %v1516_v20  ;;  %v4505_v24 = vld [vmem:[#allocation6 + $0x8] sm:$0xff] }
 0x430   : > { %v1407_v15 = vmax.f32 %v1343_v10, %v1359_v4  ;;  %1055 = vst.msk [vmem:[#allocation6 + $0x40] sm:$0xff] %vm1030_vm1, %v3857_v43  ;;  %v4999_v32 = vunpack.c.l.bf16 %v4454_v23  ;;  %v1563_v33 = vunpack.c.0.s8 %v1516_v20  ;;  %vm1668_vm4 = vcmp.ne.s32.totalorder %v3276_v9, %v4072_v17  ;;  %v4518_v6 = vld [vmem:[#allocation6] sm:$0xff] }
 0x431   : > { %1056 = vst.msk [vmem:[#allocation6 + $0x48] sm:$0xff] %vm1030_vm1, %v3857_v43  ;;  %vm1667_vm10 = vcmp.ne.s32.totalorder %v3275_v27, %v4069_v16  ;;  %v3278_v1 = vunpack.i.l.s16 %v1562_v30  ;;  %v1424_v56 = vpack.c.bf16 %v1408_v58, %v1408_v58  ;;  %v4516_v0 = vld [vmem:[#allocation6 + $0x10] sm:$0xff] }
 0x432   : > { %v1423_v47 = vpack.c.bf16 %v1407_v15, %v1407_v15  ;;  %1057 = vst.msk [vmem:[#allocation6 + $0x50] sm:$0xff] %vm1030_vm1, %v3857_v43  ;;  %1749 = vmax.xlane.f32.xlu0 %v4999_v32  ;;  %vm1669_vm5 = vmpackc.low %vm1668_vm4, %vm1667_vm10  ;;  %v3277_v57 = vunpack.i.l.s16 %v1563_v33  ;;  %v4534_v9 = vld [vmem:[#allocation6 + $0x18] sm:$0xff] }
 0x433   : > { %1058 = vst.msk [vmem:[#allocation6 + $0x58] sm:$0xff] %vm1030_vm1, %v3857_v43  ;;  %vm1675_vm6 = vcmp.ne.s32.totalorder %v3278_v1, %v4072_v17  ;;  %v4536_v30 = vld [vmem:[#allocation6 + $0x20] sm:$0xff] }
 0x434   : > { %v4469_v39 = vsel %vm1669_vm5, %v1423_v47, 4048220490  ;;  %1059 = vst.msk [vmem:[#allocation6 + $0x60] sm:$0xff] %vm1030_vm1, %v3857_v43  ;;  %vm1674_vm7 = vcmp.ne.s32.totalorder %v3277_v57, %v4069_v16  ;;  %v3858_v16 = vmov 0.0  }
 0x435   : > { %v4998_v40 = vunpack.c.l.bf16 %v4469_v39  ;;  %1060 = vst.msk [vmem:[#allocation6 + $0x68] sm:$0xff] %vm1030_vm1, %v3857_v43  ;;  %vm1676_vm8 = vmpackc.low %vm1675_vm6, %vm1674_vm7 }
 0x436   : > { %1061 = vst.msk [vmem:[#allocation6 + $0x70] sm:$0xff] %vm1030_vm1, %v3857_v43  ;;  %v4482_v41 = vsel %vm1676_vm8, %v1424_v56, 4048220490 }
 0x437   : > { %1753 = vmax.xlane.f32.xlu2 %v4998_v40  ;;  %1062 = vst.msk [vmem:[#allocation6 + $0x78] sm:$0xff] %vm1030_vm1, %v3857_v43  ;;  %v4997_v17 = vunpack.c.l.bf16 %v4482_v41 }
 0x438   : > { %1063 = vst.msk [vmem:[#allocation7] sm:$0xff] %vm1030_vm1, %v3858_v16 }
 0x439   : > { %1064 = vst.msk [vmem:[#allocation7 + $0x8] sm:$0xff] %vm1030_vm1, %v3858_v16 }
 0x43a   : > { %1755 = vmax.xlane.f32.xlu0 %v4997_v17  ;;  %1065 = vst.msk [vmem:[#allocation7 + $0x10] sm:$0xff] %vm1030_vm1, %v3858_v16 }
 0x43b   : > { %1066 = vst.msk [vmem:[#allocation7 + $0x18] sm:$0xff] %vm1030_vm1, %v3858_v16 }
 0x43c   : > { %1067 = vst.msk [vmem:[#allocation7 + $0x20] sm:$0xff] %vm1030_vm1, %v3858_v16 }
 0x43d   : > { %1068 = vst.msk [vmem:[#allocation7 + $0x28] sm:$0xff] %vm1030_vm1, %v3858_v16 }
 0x43e   : > { %1069 = vst.msk [vmem:[#allocation7 + $0x30] sm:$0xff] %vm1030_vm1, %v3858_v16 }
 0x43f   : > { %1070 = vst.msk [vmem:[#allocation7 + $0x38] sm:$0xff] %vm1030_vm1, %v3858_v16 }
 0x440   : > { %1071 = vst.msk [vmem:[#allocation7 + $0x40] sm:$0xff] %vm1030_vm1, %v3858_v16 }
 0x441   : > { %1072 = vst.msk [vmem:[#allocation7 + $0x48] sm:$0xff] %vm1030_vm1, %v3858_v16 }
 0x442   : > { %1073 = vst.msk [vmem:[#allocation7 + $0x50] sm:$0xff] %vm1030_vm1, %v3858_v16 }
 0x443   : > { %1074 = vst.msk [vmem:[#allocation7 + $0x58] sm:$0xff] %vm1030_vm1, %v3858_v16 }
 0x444   : > { %1075 = vst.msk [vmem:[#allocation7 + $0x60] sm:$0xff] %vm1030_vm1, %v3858_v16 }
 0x445   : > { %1076 = vst.msk [vmem:[#allocation7 + $0x68] sm:$0xff] %vm1030_vm1, %v3858_v16 }
 0x446   : > { %1077 = vst.msk [vmem:[#allocation7 + $0x70] sm:$0xff] %vm1030_vm1, %v3858_v16 }
 0x447   : > { %1078 = vst.msk [vmem:[#allocation7 + $0x78] sm:$0xff] %vm1030_vm1, %v3858_v16 }
 0x471   : > { %v1728_v42 = vpop.xlane.xlu1 %1727 }
 0x472   : > { %v1758_v43 = vpack.c.bf16 %v1728_v42, %v1728_v42 }
 0x474   : > { %v1774_v46 = vunpack.c.l.bf16 %v1758_v43 }
 0x476   : > { %v4508_v49 = vmax.f32 %v4505_v24, %v1774_v46 }
 0x478   : > { %v1806_v34 = vsub.f32 %v4505_v24, %v4508_v49  ;;  %2484 = vst.msk [vmem:[#allocation6 + $0x8] sm:$0xff] %vm1030_vm1, %v4508_v49  ;;  %v1854_v35 = vpack.c.bf16 %v4508_v49, %v4508_v49  ;;  %v3390_v24 = vld [vmem:[#allocation2 + $0x38] sm:$0xff] }
 0x479   : > { %2402 = vmatpush.bf16.msra.mxu0 %v3390_v24  ;;  %3613 = vmatpush.bf16.msra.mxu1 %v3390_v24 }
 0x47a   : > { %1880 = vperm.xlu2 %3692, %v1854_v35   ;;  %3614 = vmatpush.bf16.msra.mxu2 %v3390_v24 }
 0x47b   : > { %3615 = vmatpush.bf16.msra.mxu3 %v3390_v24  ;;  %v3385_v24 = vld [vmem:[#allocation2 + $0x18] sm:$0xff] }
 0x481   : > { %v1730_v52 = vpop.xlane.xlu0 %1729 }
 0x482   : > { %v1726_v53 = vpop.xlane.xlu2 %1725  ;;  %v1759_v21 = vpack.c.bf16 %v1730_v52, %v1730_v52 }
 0x483   : > { %v1757_v10 = vpack.c.bf16 %v1726_v53, %v1726_v53  ;;  %v4552_v53 = vld [vmem:[#allocation6 + $0x28] sm:$0xff] }
 0x484   : > { %v1775_v8 = vunpack.c.l.bf16 %v1759_v21  ;;  %v4554_v21 = vld [vmem:[#allocation6 + $0x38] sm:$0xff] }
 0x485   : > { %v1773_v12 = vunpack.c.l.bf16 %v1757_v10 }
 0x486   : > { %v4521_v4 = vmax.f32 %v4516_v0, %v1775_v8 }
 0x487   : > { %v4524_v18 = vmax.f32 %v4518_v6, %v1773_v12 }
 0x488   : > { %2485 = vst.msk [vmem:[#allocation6 + $0x10] sm:$0xff] %vm1030_vm1, %v4521_v4  ;;  %v1855_v5 = vpack.c.bf16 %v4521_v4, %v4521_v4 }
 0x489   : > { %2483 = vst.msk [vmem:[#allocation6] sm:$0xff] %vm1030_vm1, %v4524_v18  ;;  %v1853_v63 = vpack.c.bf16 %v4524_v18, %v4524_v18 }
 0x48a   : > { %v1732_v15 = vpop.xlane.xlu2 %1731  ;;  %v1734_v58 = vpop.xlane.xlu1 %1733  ;;  %1889 = vperm.xlu0 %3693, %v1855_v5   ;;  %v4556_v5 = vld [vmem:[#allocation6 + $0x30] sm:$0xff] }
 0x48b   : > { %v1760_v20 = vpack.c.bf16 %v1732_v15, %v1732_v15  ;;  %v1761_v27 = vpack.c.bf16 %v1734_v58, %v1734_v58  ;;  %1871 = vperm.xlu1 %3691, %v1853_v63  }
 0x48d   : > { %v1776_v47 = vunpack.c.l.bf16 %v1760_v20  ;;  %v1777_v33 = vunpack.c.l.bf16 %v1761_v27 }
 0x48f   : > { %v4539_v1 = vmax.f32 %v4534_v9, %v1776_v47  ;;  %v4542_v56 = vmax.f32 %v4536_v30, %v1777_v33 }
 0x491   : > { %2486 = vst.msk [vmem:[#allocation6 + $0x18] sm:$0xff] %vm1030_vm1, %v4539_v1  ;;  %v1856_v57 = vpack.c.bf16 %v4539_v1, %v4539_v1  ;;  %v1857_v16 = vpack.c.bf16 %v4542_v56, %v4542_v56 }
 0x492   : > { %2487 = vst.msk [vmem:[#allocation6 + $0x20] sm:$0xff] %vm1030_vm1, %v4542_v56  ;;  %v1736_v42 = vpop.xlane.xlu2 %1735  ;;  %v1740_v43 = vpop.xlane.xlu1 %1739 }
 0x493   : > { %v1762_v46 = vpack.c.bf16 %v1736_v42, %v1736_v42  ;;  %v1764_v35 = vpack.c.bf16 %v1740_v43, %v1740_v43  ;;  %v1738_v52 = vpop.xlane.xlu0 %1737  ;;  %1898 = vperm.xlu1 %3691, %v1856_v57   ;;  %1907 = vperm.xlu0 %3693, %v1857_v16  }
 0x494   : > { %v1763_v10 = vpack.c.bf16 %v1738_v52, %v1738_v52 }
 0x495   : > { %v1778_v8 = vunpack.c.l.bf16 %v1762_v46  ;;  %v1780_v12 = vunpack.c.l.bf16 %v1764_v35  ;;  %v4577_v46 = vld [vmem:[#allocation6 + $0x40] sm:$0xff]  ;;  %v4579_v35 = vld [vmem:[#allocation6 + $0x50] sm:$0xff] }
 0x496   : > { %v1779_v63 = vunpack.c.l.bf16 %v1763_v10 }
 0x497   : > { %v4559_v15 = vmax.f32 %v4552_v53, %v1778_v8  ;;  %v4562_v58 = vmax.f32 %v4554_v21, %v1780_v12  ;;  %v4581_v12 = vld [vmem:[#allocation6 + $0x48] sm:$0xff] }
 0x498   : > { %v4565_v20 = vmax.f32 %v4556_v5, %v1779_v63 }
 0x499   : > { %2488 = vst.msk [vmem:[#allocation6 + $0x28] sm:$0xff] %vm1030_vm1, %v4559_v15  ;;  %v1858_v27 = vpack.c.bf16 %v4559_v15, %v4559_v15 }
 0x49a   : > { %2490 = vst.msk [vmem:[#allocation6 + $0x38] sm:$0xff] %vm1030_vm1, %v4562_v58  ;;  %v1742_v47 = vpop.xlane.xlu2 %1741  ;;  %v1746_v33 = vpop.xlane.xlu1 %1745  ;;  %v1859_v57 = vpack.c.bf16 %v4565_v20, %v4565_v20 }
 0x49b   : > { %2489 = vst.msk [vmem:[#allocation6 + $0x30] sm:$0xff] %vm1030_vm1, %v4565_v20  ;;  %v1765_v16 = vpack.c.bf16 %v1742_v47, %v1742_v47  ;;  %v1767_v42 = vpack.c.bf16 %v1746_v33, %v1746_v33  ;;  %v1744_v43 = vpop.xlane.xlu0 %1743  ;;  %1916 = vperm.xlu2 %3692, %v1858_v27  }
 0x49c   : > { %v1766_v52 = vpack.c.bf16 %v1744_v43, %v1744_v43  ;;  %1925 = vperm.xlu1 %3691, %v1859_v57  }
 0x49d   : > { %v1781_v10 = vunpack.c.l.bf16 %v1765_v16  ;;  %v1783_v8 = vunpack.c.l.bf16 %v1767_v42 }
 0x49e   : > { %v1782_v63 = vunpack.c.l.bf16 %v1766_v52  ;;  %v4602_v52 = vld [vmem:[#allocation6 + $0x58] sm:$0xff] }
 0x49f   : > { %v4584_v13 = vmax.f32 %v4577_v46, %v1781_v10  ;;  %v4587_v48 = vmax.f32 %v4579_v35, %v1783_v8  ;;  %v4604_v10 = vld [vmem:[#allocation6 + $0x68] sm:$0xff] }
 0x4a0   : > { %v4590_v47 = vmax.f32 %v4581_v12, %v1782_v63 }
 0x4a1   : > { %2491 = vst.msk [vmem:[#allocation6 + $0x40] sm:$0xff] %vm1030_vm1, %v4584_v13  ;;  %v1861_v27 = vpack.c.bf16 %v4584_v13, %v4584_v13 }
 0x4a2   : > { %2493 = vst.msk [vmem:[#allocation6 + $0x50] sm:$0xff] %vm1030_vm1, %v4587_v48  ;;  %v1748_v33 = vpop.xlane.xlu2 %1747  ;;  %v1752_v57 = vpop.xlane.xlu1 %1751  ;;  %v1862_v16 = vpack.c.bf16 %v4590_v47, %v4590_v47 }
 0x4a3   : > { %2492 = vst.msk [vmem:[#allocation6 + $0x48] sm:$0xff] %vm1030_vm1, %v4590_v47  ;;  %v1768_v42 = vpack.c.bf16 %v1748_v33, %v1748_v33  ;;  %v1770_v43 = vpack.c.bf16 %v1752_v57, %v1752_v57  ;;  %1943 = vperm.xlu0 %3693, %v1861_v27   ;;  %v4616_v33 = vld [vmem:[#allocation6 + $0x60] sm:$0xff]  ;;  %v4629_v27 = vld [vmem:[#allocation6 + $0x70] sm:$0xff] }
 0x4a4   : > { %1952 = vperm.xlu2 %3692, %v1862_v16  }
 0x4a5   : > { %v1784_v8 = vunpack.c.l.bf16 %v1768_v42  ;;  %v1786_v63 = vunpack.c.l.bf16 %v1770_v43  ;;  %v1750_v17 = vpop.xlane.xlu0 %1749  ;;  %v1863_v42 = vpack.c.bf16 %v4587_v48, %v4587_v48 }
 0x4a6   : > { %v1769_v40 = vpack.c.bf16 %v1750_v17, %v1750_v17 }
 0x4a7   : > { %v4607_v7 = vmax.f32 %v4602_v52, %v1784_v8  ;;  %v4610_v55 = vmax.f32 %v4604_v10, %v1786_v63  ;;  %v1807_v63 = vsub.f32 %v4516_v0, %v4521_v4  ;;  %v4640_v0 = vld [vmem:[#allocation6 + $0x78] sm:$0xff] }
 0x4a8   : > { %v1785_v16 = vunpack.c.l.bf16 %v1769_v40 }
 0x4a9   : > { %2494 = vst.msk [vmem:[#allocation6 + $0x58] sm:$0xff] %vm1030_vm1, %v4607_v7  ;;  %v1866_v57 = vpack.c.bf16 %v4610_v55, %v4610_v55 }
 0x4aa   : > { %2496 = vst.msk [vmem:[#allocation6 + $0x68] sm:$0xff] %vm1030_vm1, %v4610_v55  ;;  %v1754_v43 = vpop.xlane.xlu2 %1753  ;;  %v4625_v17 = vmax.f32 %v4616_v33, %v1785_v16 }
 0x4ab   : > { %1988 = vperm.xlu0 %3693, %v1866_v57   ;;  %v1771_v8 = vpack.c.bf16 %v1754_v43, %v1754_v43  ;;  %v1825_v43 = vmul.f32 1.442695, %v1807_v63  ;;  %v1864_v63 = vpack.c.bf16 %v4607_v7, %v4607_v7 }
 0x4ac   : > { %1961 = vperm.xlu2 %3692, %v1863_v42   ;;  %2495 = vst.msk [vmem:[#allocation6 + $0x60] sm:$0xff] %vm1030_vm1, %v4625_v17  ;;  %v1865_v40 = vpack.c.bf16 %v4625_v17, %v4625_v17  ;;  %v1805_v42 = vsub.f32 %v4518_v6, %v4524_v18  ;;  %v1809_v6 = vsub.f32 %v4536_v30, %v4542_v56  ;;  %v1823_v56 = vmul.f32 1.442695, %v1806_v34 }
 0x4ad   : > { %v1787_v32 = vunpack.c.l.bf16 %v1771_v8  ;;  %v1756_v50 = vpop.xlane.xlu0 %1755  ;;  %3694 = vpow2.f32 %v1825_v43  ;;  %v1812_v43 = vsub.f32 %v4554_v21, %v4562_v58  ;;  %v1811_v34 = vsub.f32 %v4556_v5, %v4565_v20 }
 0x4ae   : > { %v1772_v16 = vpack.c.bf16 %v1756_v50, %v1756_v50  ;;  %1979 = vperm.xlu1 %3691, %v1865_v40   ;;  %v1821_v50 = vmul.f32 1.442695, %v1805_v42  ;;  %v1813_v5 = vsub.f32 %v4577_v46, %v4584_v13  ;;  %v1816_v13 = vsub.f32 %v4602_v52, %v4607_v7  ;;  %v3389_v7 = vld [vmem:[#allocation2 + $0x28] sm:$0xff]  ;;  %v3388_v52 = vld [vmem:[#allocation2 + $0x20] sm:$0xff] }
 0x4af   : > { %v4636_v57 = vmax.f32 %v4629_v27, %v1787_v32  ;;  %v1835_v49 = vmul.f32 1.442695, %v1812_v43  ;;  %v1817_v46 = vsub.f32 %v4616_v33, %v4625_v17  ;;  %2403 = vmatpush.bf16.msra.mxu0 %v3389_v7  ;;  %3616 = vmatpush.bf16.msra.mxu1 %v3389_v7 }
 0x4b0   : > { %v1788_v8 = vunpack.c.l.bf16 %v1772_v16  ;;  %3696 = vpow2.f32 %v1821_v50  ;;  %v1829_v16 = vmul.f32 1.442695, %v1809_v6  ;;  %3617 = vmatpush.bf16.msra.mxu2 %v3389_v7  ;;  %3618 = vmatpush.bf16.msra.mxu3 %v3389_v7 }
 0x4b1   : > { %v1819_v4 = vsub.f32 %v4629_v27, %v4636_v57  ;;  %2497 = vst.msk [vmem:[#allocation6 + $0x70] sm:$0xff] %vm1030_vm1, %v4636_v57  ;;  %v1867_v25 = vpack.c.bf16 %v4636_v57, %v4636_v57  ;;  %v5031_v27 = vsub.f32 %v4604_v10, %v4610_v55 }
 0x4b2   : > { %v4649_v32 = vmax.f32 %v4640_v0, %v1788_v8  ;;  %3698 = vpow2.f32 %v1829_v16  ;;  %v1860_v8 = vpack.c.bf16 %v4562_v58, %v4562_v58 }
 0x4b3   : > { %1997 = vperm.xlu0 %3693, %v1867_v25   ;;  %v1808_v25 = vsub.f32 %v4534_v9, %v4539_v1  ;;  %v4663_v30 = vpop.eup %3694  ;;  %3700 = vpow2.f32 %v1823_v56  ;;  %v1810_v9 = vsub.f32 %v4552_v53, %v4559_v15  ;;  %v1833_v53 = vmul.f32 1.442695, %v1811_v34  ;;  %2404 = vmatpush.bf16.msra.mxu0 %v3388_v52  ;;  %v3383_v34 = vld [vmem:[#allocation2 + $0x30] sm:$0xff] }
 0x4b4   : > { %v1820_v18 = vsub.f32 %v4640_v0, %v4649_v32  ;;  %2498 = vst.msk [vmem:[#allocation6 + $0x78] sm:$0xff] %vm1030_vm1, %v4649_v32  ;;  %v1868_v40 = vpack.c.bf16 %v4649_v32, %v4649_v32  ;;  %v1815_v15 = vsub.f32 %v4579_v35, %v4587_v48  ;;  %v1837_v48 = vmul.f32 1.442695, %v1813_v5  ;;  %3619 = vmatpush.bf16.msra.mxu1 %v3388_v52 }
 0x4b5   : > { %v1827_v42 = vmul.f32 1.442695, %v1808_v25  ;;  %v1831_v21 = vmul.f32 1.442695, %v1810_v9  ;;  %v1845_v56 = vmul.f32 1.442695, %v1817_v46  ;;  %3620 = vmatpush.bf16.msra.mxu2 %v3388_v52  ;;  %3621 = vmatpush.bf16.msra.mxu3 %v3388_v52 }
 0x4b6   : > { %1970 = vperm.xlu1 %3691, %v1864_v63   ;;  %2006 = vperm.xlu2 %3692, %v1868_v40   ;;  %v4673_v50 = vpop.eup %3696  ;;  %v1841_v20 = vmul.f32 1.442695, %v1815_v15  ;;  %v1814_v63 = vsub.f32 %v4581_v12, %v4590_v47  ;;  %v1843_v47 = vmul.f32 1.442695, %v1816_v13  ;;  %v3386_v9 = vld [vmem:[#allocation2 + $0x10] sm:$0xff] }
 0x4b7   : > { %3702 = vpow2.f32 %v1827_v42  ;;  %v1847_v57 = vmul.f32 1.442695, %v5031_v27 }
 0x4b8   : > { %v4680_v1 = vpop.eup %3698  ;;  %3704 = vpow2.f32 %v1835_v49  ;;  %v1839_v35 = vmul.f32 1.442695, %v1814_v63  ;;  %v3384_v49 = vld [vmem:[#allocation2] sm:$0xff] }
 0x4b9   : > { %v4685_v58 = vpop.eup %3700  ;;  %3706 = vpow2.f32 %v1831_v21 }
 0x4ba   : > { %3708 = vpow2.f32 %v1833_v53 }
 0x4bb   : > { %2250 = vperm.xlu0 %3693, %v4663_v30   ;;  %3710 = vpow2.f32 %v1841_v20 }
 0x4bc   : > { %3712 = vpow2.f32 %v1837_v48 }
 0x4bd   : > { %v4687_v6 = vpop.eup %3702  ;;  %3714 = vpow2.f32 %v1839_v35 }
 0x4be   : > { %1934 = vperm.xlu1 %3691, %v1860_v8   ;;  %2240 = vperm.xlu2 %3692, %v4673_v50   ;;  %v4695_v40 = vpop.eup %3704  ;;  %3716 = vpow2.f32 %v1843_v47  ;;  %v3387_v8 = vld [vmem:[#allocation2 + $0x8] sm:$0xff] }
 0x4bf   : > { %v4698_v25 = vpop.eup %3706  ;;  %3718 = vpow2.f32 %v1845_v56  ;;  %2405 = vmatpush.bf16.msra.mxu0 %v3387_v8  ;;  %3622 = vmatpush.bf16.msra.mxu1 %v3387_v8 }
 0x4c0   : > { %v4700_v16 = vpop.eup %3708  ;;  %3623 = vmatpush.bf16.msra.mxu2 %v3387_v8  ;;  %3624 = vmatpush.bf16.msra.mxu3 %v3387_v8 }
 0x4c1   : > { %v4708_v12 = vpop.eup %3710 }
 0x4c2   : > { %v4711_v42 = vpop.eup %3712 }
 0x4c3   : > { %2260 = vperm.xlu0 %3693, %v4680_v1   ;;  %v4713_v43 = vpop.eup %3714  ;;  %2406 = vmatpush.bf16.msra.mxu0 %v3386_v9 }
 0x4c4   : > { %v4717_v33 = vpop.eup %3716  ;;  %3625 = vmatpush.bf16.msra.mxu1 %v3386_v9  ;;  %3626 = vmatpush.bf16.msra.mxu2 %v3386_v9 }
 0x4c5   : > { %v4719_v17 = vpop.eup %3718  ;;  %3627 = vmatpush.bf16.msra.mxu3 %v3386_v9 }
 0x4c6   : > { %2245 = vperm.xlu1 %3691, %v4685_v58   ;;  %2255 = vperm.xlu2 %3692, %v4687_v6  }
 0x4c7   : > { %2407 = vmatpush.bf16.msra.mxu0 %v3385_v24 }
 0x4c8   : > { %3628 = vmatpush.bf16.msra.mxu1 %v3385_v24  ;;  %3629 = vmatpush.bf16.msra.mxu2 %v3385_v24 }
 0x4c9   : > { %3630 = vmatpush.bf16.msra.mxu3 %v3385_v24 }
 0x4cb   : > { %2275 = vperm.xlu0 %3693, %v4695_v40   ;;  %2408 = vmatpush.bf16.msra.mxu0 %v3384_v49 }
 0x4cc   : > { %3631 = vmatpush.bf16.msra.mxu1 %v3384_v49  ;;  %3632 = vmatpush.bf16.msra.mxu2 %v3384_v49 }
 0x4cd   : > { %3633 = vmatpush.bf16.msra.mxu3 %v3384_v49 }
 0x4ce   : > { %2265 = vperm.xlu1 %3691, %v4698_v25   ;;  %2270 = vperm.xlu2 %3692, %v4700_v16  }
 0x4cf   : > { %2409 = vmatpush.bf16.msra.mxu0 %v3383_v34 }
 0x4d0   : > { %3634 = vmatpush.bf16.msra.mxu1 %v3383_v34  ;;  %3635 = vmatpush.bf16.msra.mxu2 %v3383_v34 }
 0x4d1   : > { %3636 = vmatpush.bf16.msra.mxu3 %v3383_v34 }
 0x4d3   : > { %2290 = vperm.xlu0 %3693, %v4708_v12  }
 0x4d4   : > { %v1881_v21 = vpop.permute.xlu2 %1880 }
 0x4d5   : > { %v1886_v53 = vperm.slane %v1881_v21, %v4066_v11 }
 0x4d6   : > { %2280 = vperm.xlu1 %3691, %v4711_v42   ;;  %2285 = vperm.xlu2 %3692, %v4713_v43  }
 0x4d7   : > { %v2014_v20 = vunpack.c.l.bf16 %v1886_v53 }
 0x4d9   : > { %v2030_v47 = vsub.f32 %v1710_v31, %v2014_v20 }
 0x4de   : > { %2295 = vperm.xlu1 %3691, %v4717_v33   ;;  %2300 = vperm.xlu2 %3692, %v4719_v17  }
 0x4f5   : > { %v1917_v63 = vpop.permute.xlu2 %1916 }
 0x4f6   : > { %v1922_v13 = vperm.slane %v1917_v63, %v4066_v11 }
 0x4f8   : > { %v2018_v52 = vunpack.c.l.bf16 %v1922_v13 }
 0x4fa   : > { %v2034_v29 = vsub.f32 %v1714_v19, %v2018_v52 }
 0x4fc   : > { %v1890_v15 = vpop.permute.xlu0 %1889 }
 0x4fd   : > { %v1872_v5 = vpop.permute.xlu1 %1871  ;;  %v1895_v46 = vperm.slane %v1890_v15, %v4066_v11 }
 0x4fe   : > { %v1877_v48 = vperm.slane %v1872_v5, %v4066_v11 }
 0x4ff   : > { %v2015_v8 = vunpack.c.l.bf16 %v1895_v46 }
 0x500   : > { %v2013_v35 = vunpack.c.l.bf16 %v1877_v48 }
 0x501   : > { %v2031_v31 = vsub.f32 %v1711_v3, %v2015_v8 }
 0x502   : > { %v2029_v56 = vsub.f32 %v1709_v60, %v2013_v35 }
 0x504   : > { %v2045_v7 = vpack.c.bf16 %v2030_v47, %v2029_v56 }
 0x505   : > { %v1899_v9 = vpop.permute.xlu1 %1898  ;;  %v1908_v24 = vpop.permute.xlu0 %1907 }
 0x506   : > { %v2053_v49 = vunpack.c.l.bf16 %v2045_v7  ;;  %v2054_v34 = vunpack.c.h.bf16 %v2045_v7  ;;  %v1904_v21 = vperm.slane %v1899_v9, %v4066_v11  ;;  %v1913_v53 = vperm.slane %v1908_v24, %v4066_v11  ;;  %v1953_v7 = vpop.permute.xlu2 %1952 }
 0x507   : > { %v1958_v22 = vperm.slane %v1953_v7, %v4066_v11 }
 0x508   : > { %v2069_v5 = vmul.f32 1.442695, %v2053_v49  ;;  %v2071_v63 = vmul.f32 1.442695, %v2054_v34  ;;  %v2016_v15 = vunpack.c.l.bf16 %v1904_v21  ;;  %v2017_v48 = vunpack.c.l.bf16 %v1913_v53 }
 0x509   : > { %v2022_v24 = vunpack.c.l.bf16 %v1958_v22  ;;  %v5023_v22 = vunpack.c.l.bf16 %v4403_v26 }
 0x50a   : > { %3720 = vpow2.f32 %v2069_v5  ;;  %v2032_v2 = vsub.f32 %v1712_v36, %v2016_v15  ;;  %v2033_v60 = vsub.f32 %v1713_v51, %v2017_v48 }
 0x50b   : > { %3722 = vpow2.f32 %v2071_v63  ;;  %v2038_v15 = vsub.f32 %v1718_v44, %v2022_v24 }
 0x50c   : > { %v2046_v20 = vpack.c.bf16 %v2032_v2, %v2031_v31  ;;  %v2047_v35 = vpack.c.bf16 %v2034_v29, %v2033_v60  ;;  %v5022_v29 = vunpack.c.l.bf16 %v4399_v59 }
 0x50e   : > { %v2055_v13 = vunpack.c.l.bf16 %v2046_v20  ;;  %v2056_v46 = vunpack.c.h.bf16 %v2046_v20  ;;  %v2057_v47 = vunpack.c.l.bf16 %v2047_v35  ;;  %v2058_v56 = vunpack.c.h.bf16 %v2047_v35  ;;  %v1962_v5 = vpop.permute.xlu2 %1961  ;;  %v1926_v48 = vpop.permute.xlu1 %1925 }
 0x50f   : > { %v1967_v24 = vperm.slane %v1962_v5, %v4066_v11  ;;  %v5025_v5 = vunpack.c.l.bf16 %v4469_v39 }
 0x510   : > { %v3721_v61 = vpop.eup %3720  ;;  %v2073_v19 = vmul.f32 1.442695, %v2055_v13  ;;  %v2075_v52 = vmul.f32 1.442695, %v2056_v46  ;;  %v2077_v9 = vmul.f32 1.442695, %v2057_v47 }
 0x511   : > { %v3723_v45 = vpop.eup %3722  ;;  %v2079_v3 = vmul.f32 1.442695, %v2058_v56 }
 0x512   : > { %3724 = vpow2.f32 %v2073_v19  ;;  %v2101_v36 = vpack.c.bf16 %v3723_v45, %v3721_v61 }
 0x513   : > { %3726 = vpow2.f32 %v2075_v52 }
 0x514   : > { %3728 = vpow2.f32 %v2077_v9  ;;  %2410 = vmatmul.bf16.vlgmr.msra.gmra.mxu0 %v2101_v36  ;;  %v2141_v37 = vunpack.c.l.bf16 %v2101_v36  ;;  %v2142_v51 = vunpack.c.h.bf16 %v2101_v36 }
 0x515   : > { %3730 = vpow2.f32 %v2079_v3  ;;  %v1944_v8 = vpop.permute.xlu0 %1943 }
 0x516   : > { %2157 = vadd.xlane.f32.xlu0 %v2141_v37  ;;  %2159 = vadd.xlane.f32.xlu2 %v2142_v51  ;;  %v1949_v49 = vperm.slane %v1944_v8, %v4066_v11  ;;  %v2007_v9 = vpop.permute.xlu2 %2006 }
 0x517   : > { %v2012_v51 = vperm.slane %v2007_v9, %v4066_v11 }
 0x518   : > { %v3725_v34 = vpop.eup %3724  ;;  %v2021_v21 = vunpack.c.l.bf16 %v1949_v49  ;;  %v5024_v49 = vunpack.c.l.bf16 %v4454_v23 }
 0x519   : > { %v3727_v53 = vpop.eup %3726 }
 0x51a   : > { %v3729_v63 = vpop.eup %3728  ;;  %v2037_v31 = vsub.f32 %v5022_v29, %v2021_v21  ;;  %v2102_v2 = vpack.c.bf16 %v3727_v53, %v3725_v34 }
 0x51b   : > { %v3731_v60 = vpop.eup %3730 }
 0x51c   : > { %v2049_v20 = vpack.c.bf16 %v2038_v15, %v2037_v31  ;;  %v2103_v35 = vpack.c.bf16 %v3731_v60, %v3729_v63  ;;  %v2144_v13 = vunpack.c.h.bf16 %v2102_v2  ;;  %v2143_v46 = vunpack.c.l.bf16 %v2102_v2 }
 0x51d   : > { %v1989_v47 = vpop.permute.xlu0 %1988  ;;  %v2028_v31 = vunpack.c.l.bf16 %v2012_v51  ;;  %v2023_v60 = vunpack.c.l.bf16 %v1967_v24 }
 0x51e   : > { %v2061_v56 = vunpack.c.l.bf16 %v2049_v20  ;;  %v2062_v7 = vunpack.c.h.bf16 %v2049_v20  ;;  %2420 = vmatmul.bf16.vlgmr.msra.gmra.mxu1 %v2103_v35  ;;  %2163 = vadd.xlane.f32.xlu0 %v2144_v13  ;;  %v2145_v61 = vunpack.c.l.bf16 %v2103_v35  ;;  %v1994_v19 = vperm.slane %v1989_v47, %v4066_v11 }
 0x51f   : > { %2161 = vadd.xlane.f32.xlu1 %v2143_v46  ;;  %v2146_v37 = vunpack.c.h.bf16 %v2103_v35 }
 0x520   : > { %v2085_v54 = vmul.f32 1.442695, %v2061_v56  ;;  %v2087_v44 = vmul.f32 1.442695, %v2062_v7  ;;  %2165 = vadd.xlane.f32.xlu2 %v2145_v61  ;;  %v2026_v59 = vunpack.c.l.bf16 %v1994_v19  ;;  %v1980_v52 = vpop.permute.xlu1 %1979  ;;  %v5026_v61 = vunpack.c.l.bf16 %v4482_v41 }
 0x521   : > { %v1985_v45 = vperm.slane %v1980_v52, %v4066_v11  ;;  %v5028_v52 = vunpack.c.l.bf16 %v4433_v62  ;;  %v5029_v62 = vunpack.c.l.bf16 %v4345_v14 }
 0x522   : > { %3732 = vpow2.f32 %v2085_v54  ;;  %v2042_v36 = vsub.f32 %v5023_v22, %v2026_v59  ;;  %v2044_v19 = vsub.f32 %v5026_v61, %v2028_v31  ;;  %v5027_v54 = vunpack.c.l.bf16 %v4347_v28 }
 0x523   : > { %3734 = vpow2.f32 %v2087_v44  ;;  %v2025_v3 = vunpack.c.l.bf16 %v1985_v45  ;;  %v1931_v59 = vperm.slane %v1926_v48, %v4066_v11 }
 0x524   : > { %2415 = vmatmul.bf16.gmra.mxu0 %v2102_v2  ;;  %v2039_v44 = vsub.f32 %v5027_v54, %v2023_v60 }
 0x525   : > { %v1998_v8 = vpop.permute.xlu0 %1997  ;;  %v2041_v34 = vsub.f32 %v5024_v49, %v2025_v3  ;;  %v2019_v22 = vunpack.c.l.bf16 %v1931_v59 }
 0x526   : > { %v2003_v21 = vperm.slane %v1998_v8, %v4066_v11 }
 0x527   : > { %2167 = vadd.xlane.f32.xlu1 %v2146_v37  ;;  %v2051_v15 = vpack.c.bf16 %v2042_v36, %v2041_v34 }
 0x528   : > { %v3733_v53 = vpop.eup %3732  ;;  %v2027_v29 = vunpack.c.l.bf16 %v2003_v21  ;;  %v1971_v2 = vpop.permute.xlu1 %1970  ;;  %v2035_v21 = vsub.f32 %v5029_v62, %v2019_v22 }
 0x529   : > { %v3735_v63 = vpop.eup %3734  ;;  %v2065_v20 = vunpack.c.l.bf16 %v2051_v15  ;;  %v2066_v35 = vunpack.c.h.bf16 %v2051_v15  ;;  %v1976_v13 = vperm.slane %v1971_v2, %v4066_v11 }
 0x52a   : > { %v4756_v26 = vpack.c.bf16 %v3735_v63, %v3733_v53  ;;  %v2043_v23 = vsub.f32 %v5025_v5, %v2027_v29  ;;  %v5030_v53 = vunpack.c.l.bf16 %v4301_v38 }
 0x52b   : > { %v2093_v47 = vmul.f32 1.442695, %v2065_v20  ;;  %v2095_v56 = vmul.f32 1.442695, %v2066_v35  ;;  %v2024_v7 = vunpack.c.l.bf16 %v1976_v13 }
 0x52c   : > { %2430 = vmatmul.bf16.vlgmr.msra.gmra.mxu2 %v4756_v26  ;;  %v2149_v46 = vunpack.c.l.bf16 %v4756_v26  ;;  %v2052_v9 = vpack.c.bf16 %v2044_v19, %v2043_v23 }
 0x52d   : > { %3736 = vpow2.f32 %v2093_v47  ;;  %v2040_v39 = vsub.f32 %v5028_v52, %v2024_v7  ;;  %v2150_v52 = vunpack.c.h.bf16 %v4756_v26  ;;  %v1851_v26 = vmul.f32 1.442695, %v1820_v18  ;;  %v2110_v18 = vld [vmem:[#allocation7 + $0x8] sm:$0xff] }
 0x52e   : > { %3738 = vpow2.f32 %v2095_v56  ;;  %v2067_v51 = vunpack.c.l.bf16 %v2052_v9  ;;  %v2068_v49 = vunpack.c.h.bf16 %v2052_v9  ;;  %v2126_v62 = vmul.f32 %v4685_v58, %v2110_v18 }
 0x52f   : > { %2173 = vadd.xlane.f32.xlu1 %v2149_v46  ;;  %v2050_v45 = vpack.c.bf16 %v2040_v39, %v2039_v44  ;;  %v2241_v39 = vpop.permute.xlu2 %2240 }
 0x530   : > { %v1935_v3 = vpop.permute.xlu1 %1934  ;;  %v2097_v29 = vmul.f32 1.442695, %v2067_v51  ;;  %v2099_v31 = vmul.f32 1.442695, %v2068_v49 }
 0x531   : > { %v2063_v36 = vunpack.c.l.bf16 %v2050_v45  ;;  %v2064_v37 = vunpack.c.h.bf16 %v2050_v45  ;;  %v1940_v41 = vperm.slane %v1935_v3, %v4066_v11  ;;  %v1849_v3 = vmul.f32 1.442695, %v1819_v4 }
 0x533   : > { %v3737_v8 = vpop.eup %3736  ;;  %v2089_v28 = vmul.f32 1.442695, %v2063_v36  ;;  %v2091_v24 = vmul.f32 1.442695, %v2064_v37  ;;  %v2020_v48 = vunpack.c.l.bf16 %v1940_v41  ;;  %v4781_v37 = vpop.permute.xlu0 %2250 }
 0x534   : > { %v3739_v34 = vpop.eup %3738 }
 0x535   : > { %3740 = vpow2.f32 %v2089_v28  ;;  %v2036_v63 = vsub.f32 %v5030_v53, %v2020_v48  ;;  %v2107_v15 = vpack.c.bf16 %v3739_v34, %v3737_v8  ;;  %v2109_v34 = vld [vmem:[#allocation7] sm:$0xff] }
 0x536   : > { %3742 = vpow2.f32 %v2091_v24 }
 0x537   : > { %v2048_v2 = vpack.c.bf16 %v2036_v63, %v2035_v21  ;;  %2440 = vmatmul.bf16.vlgmr.msra.gmra.mxu3 %v2107_v15  ;;  %3744 = vpow2.f32 %v2097_v29  ;;  %v2154_v9 = vunpack.c.h.bf16 %v2107_v15  ;;  %v2153_v45 = vunpack.c.l.bf16 %v2107_v15  ;;  %v4779_v36 = vpop.permute.xlu2 %2255 }
 0x538   : > { %3746 = vpow2.f32 %v2099_v31  ;;  %v2246_v4 = vpop.permute.xlu1 %2245  ;;  %v2125_v21 = vmul.f32 %v4673_v50, %v2109_v34 }
 0x539   : > { %v2059_v11 = vunpack.c.l.bf16 %v2048_v2  ;;  %v2060_v60 = vunpack.c.h.bf16 %v2048_v2  ;;  %v2111_v2 = vld [vmem:[#allocation7 + $0x10] sm:$0xff] }
 0x53b   : > { %v3741_v20 = vpop.eup %3740  ;;  %v2081_v35 = vmul.f32 1.442695, %v2059_v11  ;;  %v2083_v13 = vmul.f32 1.442695, %v2060_v60  ;;  %v2261_v8 = vpop.permute.xlu0 %2260  ;;  %v2112_v11 = vld [vmem:[#allocation7 + $0x18] sm:$0xff]  ;;  %v2113_v60 = vld [vmem:[#allocation7 + $0x20] sm:$0xff] }
 0x53c   : > { %v3743_v5 = vpop.eup %3742  ;;  %v2128_v58 = vmul.f32 %v4687_v6, %v2112_v11  ;;  %v2115_v11 = vld [vmem:[#allocation7 + $0x30] sm:$0xff] }
 0x53d   : > { %3748 = vpow2.f32 %v2081_v35  ;;  %v2106_v14 = vpack.c.bf16 %v3743_v5, %v3741_v20  ;;  %v3745_v23 = vpop.eup %3744  ;;  %v2318_v20 = vmul.f32 0.0, %v2241_v39  ;;  %v2117_v39 = vld [vmem:[#allocation7 + $0x40] sm:$0xff] }
 0x53e   : > { %3750 = vpow2.f32 %v2083_v13  ;;  %v3747_v46 = vpop.eup %3746  ;;  %v2127_v13 = vmul.f32 %v4663_v30, %v2111_v2  ;;  %v2319_v30 = vmul.f32 0.0, %v2246_v4 }
 0x53f   : > { %2435 = vmatmul.bf16.gmra.mxu2 %v2106_v14  ;;  %v2152_v38 = vunpack.c.h.bf16 %v2106_v14  ;;  %v2108_v7 = vpack.c.bf16 %v3747_v46, %v3745_v23  ;;  %v2151_v59 = vunpack.c.l.bf16 %v2106_v14  ;;  %3752 = vpow2.f32 %v1849_v3  ;;  %v4792_v51 = vpop.permute.xlu2 %2270 }
 0x540   : > { %3754 = vpow2.f32 %v1851_v26  ;;  %v2266_v49 = vpop.permute.xlu1 %2265  ;;  %v2133_v3 = vmul.f32 %v4711_v42, %v2117_v39  ;;  %v2120_v42 = vld [vmem:[#allocation7 + $0x58] sm:$0xff] }
 0x541   : > { %2179 = vadd.xlane.f32.xlu1 %v2152_v38  ;;  %v2155_v44 = vunpack.c.l.bf16 %v2108_v7  ;;  %v2156_v22 = vunpack.c.h.bf16 %v2108_v7  ;;  %3756 = vpow2.f32 %v1847_v57  ;;  %v2129_v38 = vmul.f32 %v4680_v1, %v2113_v60 }
 0x543   : > { %v3749_v47 = vpop.eup %3748  ;;  %v4801_v0 = vpop.permute.xlu0 %2275 }
 0x544   : > { %v3751_v56 = vpop.eup %3750 }
 0x545   : > { %v2104_v61 = vpack.c.bf16 %v3751_v56, %v3749_v47  ;;  %v4783_v41 = vpop.eup %3752 }
 0x546   : > { %v4794_v28 = vpop.eup %3754 }
 0x547   : > { %2425 = vmatmul.bf16.gmra.mxu1 %v2104_v61  ;;  %2445 = vmatmul.bf16.gmra.mxu3 %v2108_v7  ;;  %v2147_v19 = vunpack.c.l.bf16 %v2104_v61  ;;  %v2148_v54 = vunpack.c.h.bf16 %v2104_v61  ;;  %v4797_v24 = vpop.eup %3756  ;;  %v4799_v48 = vpop.permute.xlu2 %2285  ;;  %v2114_v7 = vld [vmem:[#allocation7 + $0x28] sm:$0xff] }
 0x548   : > { %v2281_v55 = vpop.permute.xlu1 %2280  ;;  %v2130_v6 = vmul.f32 %v4698_v25, %v2114_v7 }
 0x549   : > { %2169 = vadd.xlane.f32.xlu0 %v2147_v19  ;;  %2171 = vadd.xlane.f32.xlu2 %v2148_v54  ;;  %v2322_v19 = vmul.f32 0.0, %v2261_v8  ;;  %v2321_v8 = vmul.f32 0.0, %v4779_v36  ;;  %v2116_v36 = vld [vmem:[#allocation7 + $0x38] sm:$0xff] }
 0x54a   : > { %2185 = vadd.xlane.f32.xlu1 %v2155_v44 }
 0x54b   : > { %v4806_v32 = vpop.permute.xlu0 %2290 }
 0x54f   : > { %v4804_v10 = vpop.permute.xlu2 %2300 }
 0x550   : > { %v4810_v15 = vpop.permute.xlu1 %2295  ;;  %v2330_v60 = vmul.f32 0.0, %v4804_v10  ;;  %v2119_v10 = vld [vmem:[#allocation7 + $0x50] sm:$0xff] }
 0x551   : > { %2177 = vadd.xlane.f32.xlu2 %v2151_v59  ;;  %2175 = vadd.xlane.f32.xlu0 %v2150_v52  ;;  %v2135_v7 = vmul.f32 %v4708_v12, %v2119_v10  ;;  %v2325_v12 = vmul.f32 0.0, %v4801_v0 }
 0x559   : > { %2183 = vadd.xlane.f32.xlu2 %v2154_v9  ;;  %2181 = vadd.xlane.f32.xlu0 %v2153_v45  ;;  %v2320_v9 = vmul.f32 0.0, %v4781_v37 }
 0x561   : > { %2187 = vadd.xlane.f32.xlu0 %v2156_v22  ;;  %v2323_v22 = vmul.f32 0.0, %v2266_v49  ;;  %v2136_v49 = vmul.f32 %v4717_v33, %v2120_v42  ;;  %v2131_v33 = vmul.f32 %v4700_v16, %v2115_v11 }
 0x563   : > { %2310 = vperm.xlu1 %3691, %v4783_v41  }
 0x571   : > { %2315 = vperm.xlu2 %3692, %v4794_v28  }
 0x575   : > { %2305 = vperm.xlu0 %3693, %v4797_v24  }
 0x589   : > { %v2160_v53 = vpop.xlane.xlu2 %2159  ;;  %v2158_v63 = vpop.xlane.xlu0 %2157 }
 0x58a   : > { %v2190_v29 = vadd.f32 %v2160_v53, %v2126_v62  ;;  %v2189_v31 = vadd.f32 %v2158_v63, %v2125_v21  ;;  %v2326_v62 = vmul.f32 0.0, %v2281_v55  ;;  %v2327_v53 = vmul.f32 0.0, %v4799_v48  ;;  %v2123_v55 = vld [vmem:[#allocation7 + $0x70] sm:$0xff] }
 0x58b   : > { %v2139_v48 = vmul.f32 %v4783_v41, %v2123_v55  ;;  %v2324_v41 = vmul.f32 0.0, %v4792_v51  ;;  %v2121_v51 = vld [vmem:[#allocation7 + $0x60] sm:$0xff] }
 0x58c   : > { %2207 = vst.msk [vmem:[#allocation7 + $0x8] sm:$0xff] %vm1030_vm1, %v2190_v29 }
 0x58d   : > { %2206 = vst.msk [vmem:[#allocation7] sm:$0xff] %vm1030_vm1, %v2189_v31 }
 0x591   : > { %v2411_v35 = vpop.f32.mrf.mxu0  ;;  %v2164_v50 = vpop.xlane.xlu0 %2163 }
 0x592   : > { %v2451_v5 = vadd.f32 %v2411_v35, %v2318_v20  ;;  %v2162_v14 = vpop.xlane.xlu1 %2161  ;;  %v2192_v47 = vadd.f32 %v2164_v50, %v2128_v58 }
 0x593   : > { %v2191_v23 = vadd.f32 %v2162_v14, %v2127_v13  ;;  %v2166_v46 = vpop.xlane.xlu2 %2165  ;;  %v2132_v13 = vmul.f32 %v4695_v40, %v2116_v36  ;;  %v2118_v40 = vld [vmem:[#allocation7 + $0x48] sm:$0xff] }
 0x594   : > { %2467 = vst [vmem:[#allocation8 + $0x68] sm:$0xff] %v2451_v5  ;;  %v2193_v56 = vadd.f32 %v2166_v46, %v2129_v38  ;;  %v2328_v46 = vmul.f32 0.0, %v4806_v32  ;;  %v2122_v32 = vld [vmem:[#allocation7 + $0x68] sm:$0xff] }
 0x595   : > { %2208 = vst.msk [vmem:[#allocation7 + $0x10] sm:$0xff] %vm1030_vm1, %v2191_v23  ;;  %v2504_v11 = vld [vmem:[#allocation7 + $0x8] sm:$0xff] (%p458_p4) }
 0x596   : > { %2210 = vst.msk [vmem:[#allocation7 + $0x20] sm:$0xff] %vm1030_vm1, %v2193_v56 }
 0x597   : > { %2209 = vst.msk [vmem:[#allocation7 + $0x18] sm:$0xff] %vm1030_vm1, %v2192_v47 }
 0x599   : > { %v2413_v61 = vpop.f32.mrf.mxu0 }
 0x59a   : > { %v2452_v54 = vadd.f32 %v2413_v61, %v2319_v30  ;;  %v2168_v44 = vpop.xlane.xlu1 %2167 }
 0x59b   : > { %v2421_v1 = vpop.f32.mrf.mxu1  ;;  %v2194_v59 = vadd.f32 %v2168_v44, %v2130_v6  ;;  %v2134_v6 = vmul.f32 %v4713_v43, %v2118_v40  ;;  %v2138_v43 = vmul.f32 %v4797_v24, %v2122_v32 }
 0x59c   : > { %2468 = vst [vmem:[#allocation8 + $0x20] sm:$0xff] %v2452_v54  ;;  %v2455_v52 = vadd.f32 %v2421_v1, %v2322_v19 }
 0x59d   : > { %2211 = vst.msk [vmem:[#allocation7 + $0x28] sm:$0xff] %vm1030_vm1, %v2194_v59  ;;  %v2329_v59 = vmul.f32 0.0, %v4810_v15  ;;  %v2124_v15 = vld [vmem:[#allocation7 + $0x78] sm:$0xff] }
 0x59e   : > { %2471 = vst [vmem:[#allocation8 + $0x8] sm:$0xff] %v2455_v52  ;;  %v2506_v36 = vld [vmem:[#allocation7 + $0x18] sm:$0xff] (%p458_p4) }
 0x5a1   : > { %v2416_v45 = vpop.f32.mrf.mxu0 }
 0x5a2   : > { %v2453_v26 = vadd.f32 %v2416_v45, %v2320_v9  ;;  %v2174_v27 = vpop.xlane.xlu1 %2173 }
 0x5a3   : > { %v2423_v25 = vpop.f32.mrf.mxu1  ;;  %v2197_v57 = vadd.f32 %v2174_v27, %v2133_v3 }
 0x5a4   : > { %2469 = vst [vmem:[#allocation8 + $0x38] sm:$0xff] %v2453_v26  ;;  %v2456_v4 = vadd.f32 %v2423_v25, %v2323_v22  ;;  %v2137_v22 = vmul.f32 %v4719_v17, %v2121_v51 }
 0x5a5   : > { %2214 = vst.msk [vmem:[#allocation7 + $0x40] sm:$0xff] %vm1030_vm1, %v2197_v57 }
 0x5a6   : > { %2472 = vst [vmem:[#allocation8 + $0x50] sm:$0xff] %v2456_v4  ;;  %v2140_v4 = vmul.f32 %v4794_v28, %v2124_v15  ;;  %v2507_v28 = vld [vmem:[#allocation7 + $0x20] sm:$0xff] (%p458_p4) }
 0x5a7   : > { %3762 = vrcp.f32 (%p458_p4), %v2507_v28 }
 0x5a9   : > { %v2418_v18 = vpop.f32.mrf.mxu0 }
 0x5aa   : > { %v2454_v34 = vadd.f32 %v2418_v18, %v2321_v8 }
 0x5ac   : > { %2470 = vst [vmem:[#allocation8 + $0x78] sm:$0xff] %v2454_v34 }
 0x5ad   : > { %v2540_v51 = vld [vmem:[#allocation8 + $0x50] sm:$0xff] (%p458_p4) }
 0x5af   : > { %v2431_v37 = vpop.f32.mrf.mxu2 }
 0x5b0   : > { %v2459_v21 = vadd.f32 %v2431_v37, %v2326_v62 }
 0x5b2   : > { %2475 = vst [vmem:[#allocation8 + $0x10] sm:$0xff] %v2459_v21 }
 0x5b4   : > { %v2180_v63 = vpop.xlane.xlu1 %2179 }
 0x5b5   : > { %v2200_v29 = vadd.f32 %v2180_v63, %v2136_v49  ;;  %v2505_v63 = vld [vmem:[#allocation7 + $0x10] sm:$0xff] (%p458_p4) }
 0x5b6   : > { %3764 = vrcp.f32 (%p458_p4), %v2505_v63 }
 0x5b7   : > { %v2433_v31 = vpop.f32.mrf.mxu2  ;;  %2217 = vst.msk [vmem:[#allocation7 + $0x58] sm:$0xff] %vm1030_vm1, %v2200_v29  ;;  %v2503_v29 = vld [vmem:[#allocation7] sm:$0xff] (%p458_p4) }
 0x5b8   : > { %v2460_v2 = vadd.f32 %v2433_v31, %v2327_v53  ;;  %v3859_v31 = vmov (%p458_p4), 0   ;;  %3766 = vrcp.f32 (%p458_p4), %v2503_v29 }
 0x5b9   : > { %3760 = vset.pattern.permute.xlu2 (%p458_p4), %v3859_v31  ;;  %3759 = vset.pattern.permute.xlu1 (%p458_p4), %v3859_v31 }
 0x5ba   : > { %2476 = vst [vmem:[#allocation8 + $0x48] sm:$0xff] %v2460_v2  ;;  %v2441_v20 = vpop.f32.mrf.mxu3  ;;  %3758 = vset.pattern.permute.xlu0 (%p458_p4), %v3859_v31  ;;  %v2508_v2 = vld [vmem:[#allocation7 + $0x28] sm:$0xff] (%p458_p4) }
 0x5bb   : > { %v2463_v35 = vadd.f32 %v2441_v20, %v2330_v60  ;;  %v3763_v60 = vpop.eup (%p458_p4), %3762  ;;  %3768 = vrcp.f32 (%p458_p4), %v2508_v2 }
 0x5bc   : > { %v2172_v58 = vpop.xlane.xlu2 %2171  ;;  %v2170_v50 = vpop.xlane.xlu0 %2169  ;;  %2573 = vperm.xlu2 (%p458_p4), %3760, %v3763_v60   ;;  %3770 = vrcp.f32 (%p458_p4), %v2506_v36 }
 0x5bd   : > { %2479 = vst [vmem:[#allocation8 + $0x70] sm:$0xff] %v2463_v35  ;;  %v2196_v5 = vadd.f32 %v2172_v58, %v2132_v13  ;;  %v2186_v14 = vpop.xlane.xlu1 %2185  ;;  %v2195_v38 = vadd.f32 %v2170_v50, %v2131_v33  ;;  %v3765_v55 = vpop.eup (%p458_p4), %3764  ;;  %3772 = vrcp.f32 (%p458_p4), %v2504_v11  ;;  %v2511_v35 = vld [vmem:[#allocation7 + $0x40] sm:$0xff] (%p458_p4) }
 0x5be   : > { %v2203_v23 = vadd.f32 %v2186_v14, %v2139_v48  ;;  %v3767_v20 = vpop.eup (%p458_p4), %3766  ;;  %2563 = vperm.xlu1 (%p458_p4), %3759, %v3765_v55   ;;  %3774 = vrcp.f32 (%p458_p4), %v2511_v35 }
 0x5bf   : > { %2213 = vst.msk [vmem:[#allocation7 + $0x38] sm:$0xff] %vm1030_vm1, %v2196_v5  ;;  %2553 = vperm.xlu0 (%p458_p4), %3758, %v3767_v20   ;;  %v2514_v5 = vld [vmem:[#allocation7 + $0x58] sm:$0xff] (%p458_p4) }
 0x5c0   : > { %2220 = vst.msk [vmem:[#allocation7 + $0x70] sm:$0xff] %vm1030_vm1, %v2203_v23 }
 0x5c1   : > { %2212 = vst.msk [vmem:[#allocation7 + $0x30] sm:$0xff] %vm1030_vm1, %v2195_v38  ;;  %v3769_v13 = vpop.eup (%p458_p4), %3768 }
 0x5c2   : > { %v2436_v16 = vpop.f32.mrf.mxu2  ;;  %v2443_v47 = vpop.f32.mrf.mxu3 }
 0x5c3   : > { %v2461_v56 = vadd.f32 %v2436_v16, %v2328_v46  ;;  %v3771_v58 = vpop.eup (%p458_p4), %3770 }
 0x5c4   : > { %v2426_v30 = vpop.f32.mrf.mxu1  ;;  %v2178_v61 = vpop.xlane.xlu2 %2177  ;;  %2578 = vperm.xlu2 (%p458_p4), %3760, %v3769_v13   ;;  %v2543_v13 = vld [vmem:[#allocation8 + $0x10] sm:$0xff] (%p458_p4) }
 0x5c5   : > { %2477 = vst [vmem:[#allocation8 + $0x30] sm:$0xff] %v2461_v56  ;;  %v2457_v19 = vadd.f32 %v2426_v30, %v2324_v41  ;;  %v2199_v54 = vadd.f32 %v2178_v61, %v2135_v7  ;;  %v2176_v44 = vpop.xlane.xlu0 %2175  ;;  %v3773_v50 = vpop.eup (%p458_p4), %3772 }
 0x5c6   : > { %v2198_v1 = vadd.f32 %v2176_v44, %v2134_v6  ;;  %v2510_v33 = vld [vmem:[#allocation7 + $0x38] sm:$0xff] (%p458_p4)  ;;  %2568 = vperm.xlu1 (%p458_p4), %3759, %v3771_v58   ;;  %v3775_v14 = vpop.eup (%p458_p4), %3774  ;;  %v2539_v44 = vld [vmem:[#allocation8 + $0x8] sm:$0xff] (%p458_p4) }
 0x5c7   : > { %2473 = vst [vmem:[#allocation8 + $0x58] sm:$0xff] %v2457_v19  ;;  %3776 = vrcp.f32 (%p458_p4), %v2510_v33  ;;  %2558 = vperm.xlu0 (%p458_p4), %3758, %v3773_v50   ;;  %v2517_v40 = vld [vmem:[#allocation7 + $0x70] sm:$0xff] (%p458_p4) }
 0x5c8   : > { %2216 = vst.msk [vmem:[#allocation7 + $0x50] sm:$0xff] %vm1030_vm1, %v2199_v54  ;;  %v2509_v48 = vld [vmem:[#allocation7 + $0x30] sm:$0xff] (%p458_p4) }
 0x5c9   : > { %2215 = vst.msk [vmem:[#allocation7 + $0x48] sm:$0xff] %vm1030_vm1, %v2198_v1  ;;  %3778 = vrcp.f32 (%p458_p4), %v2509_v48 }
 0x5ca   : > { %v2438_v52 = vpop.f32.mrf.mxu2  ;;  %v2446_v9 = vpop.f32.mrf.mxu3  ;;  %3780 = vrcp.f32 (%p458_p4), %v2514_v5 }
 0x5cb   : > { %v2462_v39 = vadd.f32 %v2438_v52, %v2329_v59  ;;  %v4855_v59 = vld [vmem:[%s4988_s8] ss:$0 sm:$0xff] (%p458_p4) }
 0x5cc   : > { %v2428_v45 = vpop.f32.mrf.mxu1  ;;  %v2184_v3 = vpop.xlane.xlu2 %2183  ;;  %2593 = vperm.xlu2 (%p458_p4), %3760, %v3775_v14  }
 0x5cd   : > { %2478 = vst [vmem:[#allocation8 + $0x28] sm:$0xff] %v2462_v39  ;;  %v2458_v26 = vadd.f32 %v2428_v45, %v2325_v12  ;;  %v2202_v27 = vadd.f32 %v2184_v3, %v2138_v43  ;;  %v2182_v25 = vpop.xlane.xlu0 %2181  ;;  %v3777_v23 = vpop.eup (%p458_p4), %3776 }
 0x5ce   : > { %v2201_v57 = vadd.f32 %v2182_v25, %v2137_v22  ;;  %2588 = vperm.xlu1 (%p458_p4), %3759, %v3777_v23   ;;  %v2537_v22 = vld [vmem:[#allocation8 + $0x38] sm:$0xff] (%p458_p4)  ;;  %v2545_v23 = vld [vmem:[#allocation8 + $0x30] sm:$0xff] (%p458_p4) }
 0x5cf   : > { %2474 = vst [vmem:[#allocation8 + $0x40] sm:$0xff] %v2458_v26  ;;  %v2513_v38 = vld [vmem:[#allocation7 + $0x50] sm:$0xff] (%p458_p4)  ;;  %v3779_v46 = vpop.eup (%p458_p4), %3778  ;;  %v2541_v2 = vld [vmem:[#allocation8 + $0x58] sm:$0xff] (%p458_p4) }
 0x5d0   : > { %2219 = vst.msk [vmem:[#allocation7 + $0x68] sm:$0xff] %vm1030_vm1, %v2202_v27  ;;  %v2512_v10 = vld [vmem:[#allocation7 + $0x48] sm:$0xff] (%p458_p4)  ;;  %3782 = vrcp.f32 (%p458_p4), %v2513_v38  ;;  %2583 = vperm.xlu0 (%p458_p4), %3758, %v3779_v46   ;;  %v3781_v16 = vpop.eup (%p458_p4), %3780 }
 0x5d1   : > { %2218 = vst.msk [vmem:[#allocation7 + $0x60] sm:$0xff] %vm1030_vm1, %v2201_v57  ;;  %3784 = vrcp.f32 (%p458_p4), %v2512_v10  ;;  %v2535_v57 = vld [vmem:[#allocation8 + $0x68] sm:$0xff] (%p458_p4) }
 0x5d2   : > { %v2448_v34 = vpop.f32.mrf.mxu3  ;;  %3786 = vrcp.f32 (%p458_p4), %v2517_v40  ;;  %v2544_v10 = vld [vmem:[#allocation8 + $0x48] sm:$0xff] (%p458_p4) }
 0x5d4   : > { %v2316_v0 = vpop.permute.xlu2 %2315  ;;  %2608 = vperm.xlu2 (%p458_p4), %3760, %v3781_v16   ;;  %v2546_v20 = vld [vmem:[#allocation8 + $0x28] sm:$0xff] (%p458_p4) }
 0x5d5   : > { %v2333_v8 = vmul.f32 0.0, %v2316_v0  ;;  %v2311_v24 = vpop.permute.xlu1 %2310  ;;  %v2188_v18 = vpop.xlane.xlu0 %2187  ;;  %v2538_v0 = vld [vmem:[#allocation8 + $0x78] sm:$0xff] (%p458_p4) }
 0x5d6   : > { %v2332_v62 = vmul.f32 0.0, %v2311_v24  ;;  %v2204_v17 = vadd.f32 %v2188_v18, %v2140_v4  ;;  %v3783_v41 = vpop.eup (%p458_p4), %3782  ;;  %v2542_v29 = vld [vmem:[#allocation8 + $0x40] sm:$0xff] (%p458_p4) }
 0x5d7   : > { %v2466_v37 = vadd.f32 %v2448_v34, %v2333_v8  ;;  %v3785_v7 = vpop.eup (%p458_p4), %3784  ;;  %2603 = vperm.xlu1 (%p458_p4), %3759, %v3783_v41   ;;  %v2536_v8 = vld [vmem:[#allocation8 + $0x20] sm:$0xff] (%p458_p4) }
 0x5d8   : > { %v2465_v21 = vadd.f32 %v2446_v9, %v2332_v62  ;;  %2221 = vst.msk [vmem:[#allocation7 + $0x78] sm:$0xff] %vm1030_vm1, %v2204_v17  ;;  %v2515_v56 = vld [vmem:[#allocation7 + $0x60] sm:$0xff] (%p458_p4)  ;;  %2598 = vperm.xlu0 (%p458_p4), %3758, %v3785_v7   ;;  %v3787_v30 = vpop.eup (%p458_p4), %3786 }
 0x5d9   : > { %2482 = vst [vmem:[#allocation8 + $0x18] sm:$0xff] %v2466_v37 }
 0x5da   : > { %2481 = vst [vmem:[#allocation8 + $0x60] sm:$0xff] %v2465_v21 }
 0x5dc   : > { %2623 = vperm.xlu2 (%p458_p4), %3760, %v3787_v30  }
 0x5df   : > { %v2518_v6 = vld [vmem:[#allocation7 + $0x78] sm:$0xff] (%p458_p4) }
 0x5e7   : > { %v2306_v42 = vpop.permute.xlu0 %2305 }
 0x5e8   : > { %v2331_v49 = vmul.f32 0.0, %v2306_v42  ;;  %2502 = sbr.rel (!%p458_p4) target bundleno = 1655 (0x677), region = 84 }
 0x5ea   : > { %v2464_v53 = vadd.f32 %v2443_v47, %v2331_v49  ;;  %v2516_v47 = vld [vmem:[#allocation7 + $0x68] sm:$0xff] (%p458_p4) }
 0x5eb   : > { %3788 = vrcp.f32 (%p458_p4), %v2516_v47 }
 0x5ec   : > { %2480 = vst [vmem:[#allocation8] sm:$0xff] %v2464_v53  ;;  %3790 = vrcp.f32 (%p458_p4), %v2515_v56 }
 0x5ed   : > { %3792 = vrcp.f32 %v2518_v6 }
 0x5f1   : > { %v3789_v61 = vpop.eup %3788 }
 0x5f2   : > { %v3791_v19 = vpop.eup %3790  ;;  %2618 = vperm.xlu1 %3759, %v3789_v61  }
 0x5f3   : > { %2613 = vperm.xlu0 %3758, %v3791_v19   ;;  %v3793_v54 = vpop.eup %3792 }
 0x5fb   : > { %2628 = vperm.xlu0 %3758, %v3793_v54  }
 0x616   : > { %v2574_v1 = vpop.permute.xlu2 %2573 }
 0x617   : > { %v2635_v32 = vmul.f32 %v2574_v1, %v2539_v44  ;;  %v2548_v1 = vld [vmem:[#allocation8] sm:$0xff] }
 0x619   : > { %v2655_v52 = vadd.f32 %v4855_v59, %v2635_v32 }
 0x61b   : > { %v2671_v9 = vmax.f32 %v2655_v52, 0.0 }
 0x61e   : > { %v2579_v12 = vpop.permute.xlu2 %2578 }
 0x61f   : > { %v2636_v39 = vmul.f32 %v2579_v12, %v2540_v51  ;;  %v2547_v51 = vld [vmem:[#allocation8 + $0x70] sm:$0xff] }
 0x621   : > { %v2656_v43 = vadd.f32 %v4855_v59, %v2636_v39 }
 0x623   : > { %v2672_v45 = vmax.f32 %v2656_v43, 0.0 }
 0x625   : > { %v3526_v3 = vpack.c.bf16 %v2672_v45, %v2671_v9  ;;  %v2549_v45 = vld [vmem:[#allocation8 + $0x60] sm:$0xff] }
 0x626   : > { %v2594_v62 = vpop.permute.xlu2 %2593 }
 0x627   : > { %3575 = vst [vmem:[#allocation3 + $0x10] sm:$0xff] %v3526_v3   ;;  %v2639_v14 = vmul.f32 %v2594_v62, %v2543_v13 }
 0x629   : > { %v2659_v56 = vadd.f32 %v4855_v59, %v2639_v14 }
 0x62b   : > { %v2675_v54 = vmax.f32 %v2659_v56, 0.0 }
 0x62e   : > { %v2609_v58 = vpop.permute.xlu2 %2608 }
 0x62f   : > { %v2642_v50 = vmul.f32 %v2609_v58, %v2546_v20 }
 0x630   : > { %v2564_v26 = vpop.permute.xlu1 %2563 }
 0x631   : > { %v2554_v27 = vpop.permute.xlu0 %2553  ;;  %v2633_v25 = vmul.f32 %v2564_v26, %v2537_v22  ;;  %v2662_v16 = vadd.f32 %v4855_v59, %v2642_v50 }
 0x632   : > { %v2631_v15 = vmul.f32 %v2554_v27, %v2535_v57 }
 0x633   : > { %v2653_v4 = vadd.f32 %v4855_v59, %v2633_v25  ;;  %v2678_v6 = vmax.f32 %v2662_v16, 0.0 }
 0x634   : > { %v2651_v17 = vadd.f32 %v4855_v59, %v2631_v15  ;;  %v2550_v15 = vld [vmem:[#allocation8 + $0x18] sm:$0xff] }
 0x635   : > { %v2669_v21 = vmax.f32 %v2653_v4, 0.0 }
 0x636   : > { %v2667_v28 = vmax.f32 %v2651_v17, 0.0  ;;  %v2624_v3 = vpop.permute.xlu2 %2623 }
 0x637   : > { %v2645_v25 = vmul.f32 %v2624_v3, %v2549_v45 }
 0x638   : > { %v2569_v24 = vpop.permute.xlu1 %2568 }
 0x639   : > { %v2634_v18 = vmul.f32 %v2569_v24, %v2538_v0  ;;  %v2559_v34 = vpop.permute.xlu0 %2558 }
 0x63a   : > { %v2632_v37 = vmul.f32 %v2559_v34, %v2536_v8  ;;  %v2665_v8 = vadd.f32 %v4855_v59, %v2645_v25 }
 0x63b   : > { %v2654_v42 = vadd.f32 %v4855_v59, %v2634_v18 }
 0x63c   : > { %v2652_v49 = vadd.f32 %v4855_v59, %v2632_v37  ;;  %v2681_v34 = vmax.f32 %v2665_v8, 0.0 }
 0x63d   : > { %v2670_v53 = vmax.f32 %v2654_v42, 0.0 }
 0x63e   : > { %v2668_v63 = vmax.f32 %v2652_v49, 0.0 }
 0x63f   : > { %v3521_v31 = vpack.c.bf16 %v2670_v53, %v2669_v21 }
 0x640   : > { %v3516_v36 = vpack.c.bf16 %v2668_v63, %v2667_v28  ;;  %v2589_v11 = vpop.permute.xlu1 %2588 }
 0x641   : > { %3574 = vst [vmem:[#allocation3 + $0x18] sm:$0xff] %v3521_v31   ;;  %v2638_v60 = vmul.f32 %v2589_v11, %v2542_v29 }
 0x642   : > { %v2584_v55 = vpop.permute.xlu0 %2583  ;;  %3517 = vst [vmem:[#allocation3] sm:$0xff] %v3516_v36  }
 0x643   : > { %v2637_v35 = vmul.f32 %v2584_v55, %v2541_v2  ;;  %v2658_v33 = vadd.f32 %v4855_v59, %v2638_v60 }
 0x645   : > { %v2657_v48 = vadd.f32 %v4855_v59, %v2637_v35  ;;  %v2674_v5 = vmax.f32 %v2658_v33, 0.0 }
 0x647   : > { %v2673_v38 = vmax.f32 %v2657_v48, 0.0 }
 0x649   : > { %v3531_v46 = vpack.c.bf16 %v2674_v5, %v2673_v38  ;;  %v2604_v40 = vpop.permute.xlu1 %2603 }
 0x64a   : > { %v2641_v47 = vmul.f32 %v2604_v40, %v2545_v23  ;;  %v2599_v41 = vpop.permute.xlu0 %2598 }
 0x64b   : > { %3576 = vst [vmem:[#allocation3 + $0x20] sm:$0xff] %v3531_v46   ;;  %v2640_v7 = vmul.f32 %v2599_v41, %v2544_v10 }
 0x64c   : > { %v2661_v30 = vadd.f32 %v4855_v59, %v2641_v47 }
 0x64d   : > { %v2660_v61 = vadd.f32 %v4855_v59, %v2640_v7 }
 0x64e   : > { %v2677_v19 = vmax.f32 %v2661_v30, 0.0 }
 0x64f   : > { %v2676_v44 = vmax.f32 %v2660_v61, 0.0 }
 0x650   : > { %v3541_v32 = vpack.c.bf16 %v2678_v6, %v2677_v19 }
 0x651   : > { %v3536_v52 = vpack.c.bf16 %v2676_v44, %v2675_v54 }
 0x652   : > { %3578 = vst [vmem:[#allocation3 + $0x8] sm:$0xff] %v3541_v32  }
 0x653   : > { %3577 = vst [vmem:[#allocation3 + $0x28] sm:$0xff] %v3536_v52  }
 0x664   : > { %v2619_v12 = vpop.permute.xlu1 %2618 }
 0x665   : > { %v2644_v39 = vmul.f32 %v2619_v12, %v2548_v1  ;;  %v2614_v9 = vpop.permute.xlu0 %2613 }
 0x666   : > { %v2643_v43 = vmul.f32 %v2614_v9, %v2547_v51 }
 0x667   : > { %v2664_v22 = vadd.f32 %v4855_v59, %v2644_v39 }
 0x668   : > { %v2663_v26 = vadd.f32 %v4855_v59, %v2643_v43 }
 0x669   : > { %v2680_v27 = vmax.f32 %v2664_v22, 0.0 }
 0x66a   : > { %v2679_v57 = vmax.f32 %v2663_v26, 0.0 }
 0x66c   : > { %v3546_v0 = vpack.c.bf16 %v2680_v27, %v2679_v57 }
 0x66d   : > { %v2629_v4 = vpop.permute.xlu0 %2628 }
 0x66e   : > { %3579 = vst [vmem:[#allocation3 + $0x30] sm:$0xff] %v3546_v0   ;;  %v2646_v24 = vmul.f32 %v2629_v4, %v2550_v15 }
 0x670   : > { %v2666_v18 = vadd.f32 %v4855_v59, %v2646_v24 }
 0x672   : > { %v2682_v62 = vmax.f32 %v2666_v18, 0.0 }
 0x674   : > { %v3551_v17 = vpack.c.bf16 %v2682_v62, %v2681_v34 }
 0x676   : > { %3580 = vst [vmem:[#allocation3 + $0x38] sm:$0xff] %v3551_v17  }
 0x677 PF: > { %2722 = sbr.rel (!%p698_p5) target bundleno = 1962 (0x7aa), region = 88  ;;  %v2735_v37 = vld [vmem:[#allocation7 + $0x60] sm:$0xff] (%p698_p5)  ;;  %v3860_v49 = vmov (%p698_p5), 0   ;;  %v2736_v53 = vld [vmem:[#allocation7 + $0x68] sm:$0xff] (%p698_p5)  ;;  %v2733_v55 = vld [vmem:[#allocation7 + $0x50] sm:$0xff] (%p698_p5) }
 0x678   : > { %v2731_v21 = vld [vmem:[#allocation7 + $0x40] sm:$0xff] (%p698_p5)  ;;  %3796 = vset.pattern.permute.xlu2 (%p698_p5), %v3860_v49  ;;  %3795 = vset.pattern.permute.xlu1 (%p698_p5), %v3860_v49  ;;  %3799 = vrcp.f32 (%p698_p5), %v2735_v37  ;;  %v2732_v59 = vld [vmem:[#allocation7 + $0x48] sm:$0xff] (%p698_p5)  ;;  %v3400_v35 = vld [vmem:[%s4983_s3 + $0x38] sm:$0xff] (%p698_p5) }
 0x679   : > { %v2723_v42 = vld [vmem:[#allocation7] sm:$0xff] (%p698_p5)  ;;  %3794 = vset.pattern.permute.xlu0 (%p698_p5), %v3860_v49  ;;  %3801 = vrcp.f32 (%p698_p5), %v2731_v21  ;;  %v2724_v28 = vld [vmem:[#allocation7 + $0x8] sm:$0xff] (%p698_p5)  ;;  %2963 = vmatpush.bf16.msra.mxu0 (%p698_p5), %v3400_v35  ;;  %v2737_v13 = vld [vmem:[#allocation7 + $0x70] sm:$0xff] (%p698_p5) }
 0x67a   : > { %3803 = vrcp.f32 (%p698_p5), %v2723_v42  ;;  %v2728_v2 = vld [vmem:[#allocation7 + $0x28] sm:$0xff] (%p698_p5)  ;;  %v2727_v11 = vld [vmem:[#allocation7 + $0x20] sm:$0xff] (%p698_p5)  ;;  %3638 = vmatpush.bf16.msra.mxu2 (%p698_p5), %v3400_v35  ;;  %3639 = vmatpush.bf16.msra.mxu3 (%p698_p5), %v3400_v35  ;;  %v2734_v58 = vld [vmem:[#allocation7 + $0x58] sm:$0xff] (%p698_p5) }
 0x67b   : > { %3805 = vrcp.f32 (%p698_p5), %v2736_v53  ;;  %3637 = vmatpush.bf16.msra.mxu1 (%p698_p5), %v3400_v35  ;;  %v2738_v50 = vld [vmem:[#allocation7 + $0x78] sm:$0xff] (%p698_p5)  ;;  %v2725_v23 = vld [vmem:[#allocation7 + $0x10] sm:$0xff] (%p698_p5)  ;;  %v3398_v61 = vld [vmem:[%s4983_s3 + $0x28] sm:$0xff] (%p698_p5) }
 0x67c   : > { %3807 = vrcp.f32 %v2732_v59  ;;  %v2726_v14 = vld [vmem:[#allocation7 + $0x18] sm:$0xff]  ;;  %v2729_v46 = vld [vmem:[#allocation7 + $0x30] sm:$0xff]  ;;  %v3394_v44 = vld [vmem:[%s4983_s3 + $0x8] sm:$0xff] }
 0x67d   : > { %3809 = vrcp.f32 %v2724_v28  ;;  %v2730_v47 = vld [vmem:[#allocation7 + $0x38] sm:$0xff]  ;;  %v3399_v30 = vld [vmem:[%s4983_s3 + $0x30] sm:$0xff]  ;;  %v2756_v39 = vld [vmem:[#allocation8 + $0x20] sm:$0xff] }
 0x67e   : > { %v3800_v63 = vpop.eup %3799  ;;  %3811 = vrcp.f32 %v2728_v2  ;;  %2964 = vmatpush.bf16.msra.mxu0 %v3399_v30  ;;  %3641 = vmatpush.bf16.msra.mxu2 %v3399_v30  ;;  %v3397_v6 = vld [vmem:[%s4983_s3 + $0x20] sm:$0xff]  ;;  %v3396_v19 = vld [vmem:[%s4983_s3 + $0x18] sm:$0xff]  ;;  %v3395_v54 = vld [vmem:[%s4983_s3 + $0x10] sm:$0xff] }
 0x67f   : > { %v3802_v29 = vpop.eup %3801  ;;  %2833 = vperm.xlu1 %3795, %v3800_v63   ;;  %3813 = vrcp.f32 %v2727_v11  ;;  %3642 = vmatpush.bf16.msra.mxu3 %v3399_v30  ;;  %v3393_v1 = vld [vmem:[%s4983_s3] sm:$0xff]  ;;  %v2755_v51 = vld [vmem:[#allocation8 + $0x68] sm:$0xff]  ;;  %v2767_v25 = vld [vmem:[#allocation8 + $0x70] sm:$0xff] }
 0x680   : > { %v3804_v31 = vpop.eup %3803  ;;  %2813 = vperm.xlu0 %3794, %v3802_v29   ;;  %3815 = vrcp.f32 %v2733_v55  ;;  %3640 = vmatpush.bf16.msra.mxu1 %v3399_v30  ;;  %v4902_v52 = vld [vmem:[%s4989_s9] ss:$0 sm:$0xff]  ;;  %v2763_v15 = vld [vmem:[#allocation8 + $0x10] sm:$0xff]  ;;  %v2768_v0 = vld [vmem:[#allocation8] sm:$0xff] }
 0x681   : > { %2773 = vperm.xlu2 %3796, %v3804_v31   ;;  %v3806_v36 = vpop.eup %3805  ;;  %3817 = vrcp.f32 %v2737_v13  ;;  %v2764_v4 = vld [vmem:[#allocation8 + $0x48] sm:$0xff]  ;;  %v2760_v28 = vld [vmem:[#allocation8 + $0x50] sm:$0xff] }
 0x682   : > { %v3808_v60 = vpop.eup %3807  ;;  %3819 = vrcp.f32 %v2734_v58  ;;  %2965 = vmatpush.bf16.msra.mxu0 %v3398_v61  ;;  %3644 = vmatpush.bf16.msra.mxu2 %v3398_v61  ;;  %v2759_v63 = vld [vmem:[#allocation8 + $0x8] sm:$0xff] }
 0x683   : > { %v3810_v20 = vpop.eup %3809  ;;  %3821 = vrcp.f32 %v2738_v50  ;;  %3645 = vmatpush.bf16.msra.mxu3 %v3398_v61 }
 0x684   : > { %v3812_v33 = vpop.eup %3811  ;;  %3823 = vrcp.f32 %v2726_v14  ;;  %3643 = vmatpush.bf16.msra.mxu1 %v3398_v61 }
 0x685   : > { %v3814_v48 = vpop.eup %3813  ;;  %3825 = vrcp.f32 %v2725_v23 }
 0x686   : > { %v3816_v5 = vpop.eup %3815  ;;  %3827 = vrcp.f32 %v2729_v46  ;;  %2966 = vmatpush.bf16.msra.mxu0 %v3397_v6  ;;  %3647 = vmatpush.bf16.msra.mxu2 %v3397_v6 }
 0x687   : > { %2838 = vperm.xlu1 %3795, %v3806_v36   ;;  %v3818_v38 = vpop.eup %3817  ;;  %3829 = vrcp.f32 %v2730_v47  ;;  %3648 = vmatpush.bf16.msra.mxu3 %v3397_v6 }
 0x688   : > { %2818 = vperm.xlu0 %3794, %v3808_v60   ;;  %v3820_v10 = vpop.eup %3819  ;;  %3646 = vmatpush.bf16.msra.mxu1 %v3397_v6  ;;  %v2770_v60 = vld [vmem:[#allocation8 + $0x18] sm:$0xff] }
 0x689   : > { %2778 = vperm.xlu2 %3796, %v3810_v20   ;;  %v3822_v40 = vpop.eup %3821  ;;  %v2765_v20 = vld [vmem:[#allocation8 + $0x30] sm:$0xff] }
 0x68a   : > { %v3824_v16 = vpop.eup %3823  ;;  %2967 = vmatpush.bf16.msra.mxu0 %v3396_v19  ;;  %3650 = vmatpush.bf16.msra.mxu2 %v3396_v19 }
 0x68b   : > { %v3826_v41 = vpop.eup %3825  ;;  %3651 = vmatpush.bf16.msra.mxu3 %v3396_v19 }
 0x68c   : > { %v3828_v56 = vpop.eup %3827  ;;  %3649 = vmatpush.bf16.msra.mxu1 %v3396_v19 }
 0x68d   : > { %v3830_v7 = vpop.eup %3829 }
 0x68e   : > { %2968 = vmatpush.bf16.msra.mxu0 %v3395_v54  ;;  %3653 = vmatpush.bf16.msra.mxu2 %v3395_v54 }
 0x68f   : > { %2798 = vperm.xlu1 %3795, %v3812_v33   ;;  %3654 = vmatpush.bf16.msra.mxu3 %v3395_v54  ;;  %v2769_v33 = vld [vmem:[#allocation8 + $0x60] sm:$0xff] }
 0x690   : > { %2793 = vperm.xlu0 %3794, %v3814_v48   ;;  %3652 = vmatpush.bf16.msra.mxu1 %v3395_v54  ;;  %v2766_v48 = vld [vmem:[#allocation8 + $0x28] sm:$0xff] }
 0x691   : > { %2823 = vperm.xlu2 %3796, %v3816_v5  }
 0x692   : > { %2969 = vmatpush.bf16.msra.mxu0 %v3394_v44  ;;  %3656 = vmatpush.bf16.msra.mxu2 %v3394_v44 }
 0x693   : > { %3657 = vmatpush.bf16.msra.mxu3 %v3394_v44 }
 0x694   : > { %3655 = vmatpush.bf16.msra.mxu1 %v3394_v44 }
 0x696   : > { %2970 = vmatpush.bf16.msra.mxu0 %v3393_v1  ;;  %3659 = vmatpush.bf16.msra.mxu2 %v3393_v1 }
 0x697   : > { %2843 = vperm.xlu1 %3795, %v3818_v38   ;;  %3660 = vmatpush.bf16.msra.mxu3 %v3393_v1 }
 0x698   : > { %2828 = vperm.xlu0 %3794, %v3820_v10   ;;  %3658 = vmatpush.bf16.msra.mxu1 %v3393_v1  ;;  %v2761_v1 = vld [vmem:[#allocation8 + $0x58] sm:$0xff] }
 0x699   : > { %2848 = vperm.xlu2 %3796, %v3822_v40  }
 0x69f   : > { %2788 = vperm.xlu1 %3795, %v3824_v16  }
 0x6a0   : > { %2783 = vperm.xlu0 %3794, %v3826_v41  }
 0x6a1   : > { %2803 = vperm.xlu2 %3796, %v3828_v56   ;;  %v2758_v56 = vld [vmem:[#allocation8 + $0x78] sm:$0xff] }
 0x6a8   : > { %2808 = vperm.xlu0 %3794, %v3830_v7   ;;  %v2757_v7 = vld [vmem:[#allocation8 + $0x38] sm:$0xff] }
 0x6db   : > { %v2774_v32 = vpop.permute.xlu2 %2773 }
 0x6dc   : > { %v2851_v12 = vmul.f32 %v2774_v32, %v2755_v51 }
 0x6de   : > { %v2871_v43 = vadd.f32 %v4902_v52, %v2851_v12  ;;  %v2762_v12 = vld [vmem:[#allocation8 + $0x40] sm:$0xff] }
 0x6e3   : > { %v2779_v9 = vpop.permute.xlu2 %2778 }
 0x6e4   : > { %v2852_v45 = vmul.f32 %v2779_v9, %v2756_v39 }
 0x6e6   : > { %v2872_v3 = vadd.f32 %v4902_v52, %v2852_v45 }
 0x6e8   : > { %v2887_v22 = vpack.c.bf16 %v2872_v3, %v2871_v43 }
 0x6ea   : > { %2971 = vmatmul.bf16.vlgmr.msra.gmra.mxu0 %v2887_v22 }
 0x6eb   : > { %v2824_v21 = vpop.permute.xlu2 %2823 }
 0x6ec   : > { %v2861_v50 = vmul.f32 %v2824_v21, %v2765_v20 }
 0x6ee   : > { %v2881_v40 = vadd.f32 %v4902_v52, %v2861_v50 }
 0x6f1   : > { %v2834_v26 = vpop.permute.xlu1 %2833 }
 0x6f2   : > { %v2814_v27 = vpop.permute.xlu0 %2813  ;;  %v2863_v57 = vmul.f32 %v2834_v26, %v2767_v25  ;;  %v3798_v26 = vld [vmem:[%s4990_s10] ss:$0 sm:$0xff] }
 0x6f3   : > { %v2859_v8 = vmul.f32 %v2814_v27, %v2763_v15  ;;  %v2849_v35 = vpop.permute.xlu2 %2848 }
 0x6f4   : > { %v2883_v18 = vadd.f32 %v4902_v52, %v2863_v57  ;;  %v2866_v58 = vmul.f32 %v2849_v35, %v2770_v60 }
 0x6f5   : > { %v2879_v42 = vadd.f32 %v4902_v52, %v2859_v8 }
 0x6f6   : > { %v2886_v10 = vadd.f32 %v4902_v52, %v2866_v58 }
 0x6f9   : > { %v2839_v24 = vpop.permute.xlu1 %2838 }
 0x6fa   : > { %v2864_v34 = vmul.f32 %v2839_v24, %v2768_v0  ;;  %v2819_v62 = vpop.permute.xlu0 %2818 }
 0x6fb   : > { %v2860_v17 = vmul.f32 %v2819_v62, %v2764_v4  ;;  %v2804_v32 = vpop.permute.xlu2 %2803 }
 0x6fc   : > { %v2884_v37 = vadd.f32 %v4902_v52, %v2864_v34  ;;  %v2857_v39 = vmul.f32 %v2804_v32, %v2761_v1 }
 0x6fd   : > { %v2880_v49 = vadd.f32 %v4902_v52, %v2860_v17 }
 0x6fe   : > { %v2893_v53 = vpack.c.bf16 %v2884_v37, %v2883_v18  ;;  %v2877_v45 = vadd.f32 %v4902_v52, %v2857_v39 }
 0x6ff   : > { %v2891_v59 = vpack.c.bf16 %v2880_v49, %v2879_v42 }
 0x700   : > { %3001 = vmatmul.bf16.vlgmr.msra.gmra.mxu3 %v2893_v53 }
 0x701   : > { %2991 = vmatmul.bf16.vlgmr.msra.gmra.mxu2 %v2891_v59  ;;  %v2799_v29 = vpop.permute.xlu1 %2798 }
 0x702   : > { %v2856_v31 = vmul.f32 %v2799_v29, %v2760_v28  ;;  %v2794_v2 = vpop.permute.xlu0 %2793 }
 0x703   : > { %v2855_v36 = vmul.f32 %v2794_v2, %v2759_v63 }
 0x704   : > { %v2876_v11 = vadd.f32 %v4902_v52, %v2856_v31 }
 0x705   : > { %v2875_v55 = vadd.f32 %v4902_v52, %v2855_v36 }
 0x707   : > { %v2889_v13 = vpack.c.bf16 %v2876_v11, %v2875_v55 }
 0x709   : > { %2981 = vmatmul.bf16.vlgmr.msra.gmra.mxu1 %v2889_v13  ;;  %v2844_v5 = vpop.permute.xlu1 %2843 }
 0x70a   : > { %v2865_v14 = vmul.f32 %v2844_v5, %v2769_v33  ;;  %v2829_v38 = vpop.permute.xlu0 %2828 }
 0x70b   : > { %v2862_v23 = vmul.f32 %v2829_v38, %v2766_v48 }
 0x70c   : > { %v2885_v46 = vadd.f32 %v4902_v52, %v2865_v14 }
 0x70d   : > { %v2882_v16 = vadd.f32 %v4902_v52, %v2862_v23 }
 0x70e   : > { %v2894_v47 = vpack.c.bf16 %v2886_v10, %v2885_v46 }
 0x70f   : > { %v2892_v41 = vpack.c.bf16 %v2882_v16, %v2881_v40 }
 0x710   : > { %3006 = vmatmul.bf16.gmra.mxu3 %v2894_v47 }
 0x711   : > { %2996 = vmatmul.bf16.gmra.mxu2 %v2892_v41  ;;  %v2789_v30 = vpop.permute.xlu1 %2788 }
 0x712   : > { %v2854_v61 = vmul.f32 %v2789_v30, %v2758_v56  ;;  %v2784_v6 = vpop.permute.xlu0 %2783 }
 0x713   : > { %v2853_v19 = vmul.f32 %v2784_v6, %v2757_v7 }
 0x714   : > { %v2874_v54 = vadd.f32 %v4902_v52, %v2854_v61 }
 0x715   : > { %v2873_v44 = vadd.f32 %v4902_v52, %v2853_v19 }
 0x717   : > { %v2888_v51 = vpack.c.bf16 %v2874_v54, %v2873_v44 }
 0x719   : > { %2976 = vmatmul.bf16.gmra.mxu0 %v2888_v51 }
 0x71a   : > { %v2809_v9 = vpop.permute.xlu0 %2808 }
 0x71b   : > { %v2858_v43 = vmul.f32 %v2809_v9, %v2762_v12 }
 0x71d   : > { %v2878_v3 = vadd.f32 %v4902_v52, %v2858_v43 }
 0x71f   : > { %v2890_v22 = vpack.c.bf16 %v2878_v3, %v2877_v45 }
 0x721   : > { %2986 = vmatmul.bf16.gmra.mxu1 %v2890_v22 }
 0x767   : > { %v2972_v27 = vpop.f32.mrf.mxu0 }
 0x768   : > { %v2973_v25 = vadd.f32 %v3798_v26, %v2972_v27 }
 0x76a   : > { %3012 = vst [vmem:[%s4992_s12] sm:$0xff] %v2973_v25 }
 0x76f   : > { %v2974_v57 = vpop.f32.mrf.mxu0 }
 0x770   : > { %v2975_v15 = vadd.f32 %v3798_v26, %v2974_v57 }
 0x772   : > { %3013 = vst [vmem:[%s4992_s12 + $0x8] sm:$0xff] %v2975_v15 }
 0x783   : > { %v3002_v0 = vpop.f32.mrf.mxu3 }
 0x784   : > { %v2992_v52 = vpop.f32.mrf.mxu2  ;;  %v3003_v4 = vadd.f32 %v3798_v26, %v3002_v0 }
 0x785   : > { %v2993_v8 = vadd.f32 %v3798_v26, %v2992_v52 }
 0x786   : > { %3024 = vst [vmem:[%s4992_s12 + $0x60] sm:$0xff] %v3003_v4  ;;  %v2982_v24 = vpop.f32.mrf.mxu1 }
 0x787   : > { %3020 = vst [vmem:[%s4992_s12 + $0x40] sm:$0xff] %v2993_v8  ;;  %v2983_v18 = vadd.f32 %v3798_v26, %v2982_v24 }
 0x789   : > { %3016 = vst [vmem:[%s4992_s12 + $0x20] sm:$0xff] %v2983_v18 }
 0x78b   : > { %v3004_v34 = vpop.f32.mrf.mxu3 }
 0x78c   : > { %v2994_v62 = vpop.f32.mrf.mxu2  ;;  %v3005_v17 = vadd.f32 %v3798_v26, %v3004_v34 }
 0x78d   : > { %v2995_v37 = vadd.f32 %v3798_v26, %v2994_v62 }
 0x78e   : > { %3025 = vst [vmem:[%s4992_s12 + $0x68] sm:$0xff] %v3005_v17  ;;  %v2984_v21 = vpop.f32.mrf.mxu1 }
 0x78f   : > { %3021 = vst [vmem:[%s4992_s12 + $0x48] sm:$0xff] %v2995_v37  ;;  %v2985_v42 = vadd.f32 %v3798_v26, %v2984_v21 }
 0x791   : > { %3017 = vst [vmem:[%s4992_s12 + $0x28] sm:$0xff] %v2985_v42 }
 0x793   : > { %v3007_v49 = vpop.f32.mrf.mxu3 }
 0x794   : > { %v2997_v53 = vpop.f32.mrf.mxu2  ;;  %v3008_v59 = vadd.f32 %v3798_v26, %v3007_v49 }
 0x795   : > { %v2998_v28 = vadd.f32 %v3798_v26, %v2997_v53 }
 0x796   : > { %3026 = vst [vmem:[%s4992_s12 + $0x70] sm:$0xff] %v3008_v59  ;;  %v2977_v63 = vpop.f32.mrf.mxu0 }
 0x797   : > { %3022 = vst [vmem:[%s4992_s12 + $0x50] sm:$0xff] %v2998_v28  ;;  %v2978_v29 = vadd.f32 %v3798_v26, %v2977_v63 }
 0x799   : > { %3014 = vst [vmem:[%s4992_s12 + $0x10] sm:$0xff] %v2978_v29 }
 0x79b   : > { %v3009_v31 = vpop.f32.mrf.mxu3 }
 0x79c   : > { %v2999_v2 = vpop.f32.mrf.mxu2  ;;  %v3010_v36 = vadd.f32 %v3798_v26, %v3009_v31 }
 0x79d   : > { %v3000_v11 = vadd.f32 %v3798_v26, %v2999_v2 }
 0x79e   : > { %3027 = vst [vmem:[%s4992_s12 + $0x78] sm:$0xff] %v3010_v36  ;;  %v2979_v60 = vpop.f32.mrf.mxu0  ;;  %v2987_v55 = vpop.f32.mrf.mxu1 }
 0x79f   : > { %3023 = vst [vmem:[%s4992_s12 + $0x58] sm:$0xff] %v3000_v11  ;;  %v2980_v20 = vadd.f32 %v3798_v26, %v2979_v60  ;;  %v2988_v35 = vadd.f32 %v3798_v26, %v2987_v55 }
 0x7a1   : > { %3015 = vst [vmem:[%s4992_s12 + $0x18] sm:$0xff] %v2980_v20 }
 0x7a2   : > { %3018 = vst [vmem:[%s4992_s12 + $0x30] sm:$0xff] %v2988_v35 }
 0x7a6   : > { %v2989_v13 = vpop.f32.mrf.mxu1 }
 0x7a7   : > { %v2990_v33 = vadd.f32 %v3798_v26, %v2989_v13 }
 0x7a9   : > { %3019 = vst [vmem:[%s4992_s12 + $0x38] sm:$0xff] %v2990_v33 }
 0x7aa PF: > { %s22_s23 = sadd.s32 1, %s3853_s23   ;;  %s5032_s21 = smov %s3849_s22 }
 0x7ab   : > { %p19_p6 = scmp.ge.s32.totalorder %s22_s23, 4   ;;  %s5033_s22 = smov %s5035_s24 }
 0x7ad   :  { %21 = sbr.rel (!%p19_p6) target bundleno = 2 (0x2), region = 122 }

</bundles_post_ra>
